<compile_context>
chip_gen: v6e
topology: v6e:2x2x1
jax: 0.10.0
libtpu: 0.0.40
codegen_flags: <defaults>
</compile_context>

<pallas_src>
import jax
import jax.numpy as jnp
from jax import lax
from jax.experimental import pallas as pl
from jax.experimental.pallas import tpu as pltpu

block_size = 128      # max sequence length (tril buffer size in the PyTorch module)
n_embd = 384
dropout = 0.2         # nn.Dropout(0.2); eval-mode (identity) implemented

_MASK_VALUE = -1e30   # causal-mask fill value (exp() underflows to exactly 0)


def _head_kernel(x_ref, w_ref, o_ref):
    # x_ref block: (Bb, T, C) in compute dtype (bf16 by default)
    # w_ref:       (C, 3H) in compute dtype; columns are [K | Q*H**-0.5 | V]
    # o_ref block: (Bb, T, H) in the original (f32) dtype
    Bb, T, C = x_ref.shape
    H3 = w_ref.shape[-1]
    H = H3 // 3
    cdt = x_ref.dtype  # compute dtype for MXU inputs

    # Fused projection: one (Bb*T, C) @ (C, 3H) matmul, low-precision inputs
    # with f32 accumulation on the MXU.
    x2 = x_ref[...].reshape(Bb * T, C)
    qkv = jnp.dot(x2, w_ref[...], preferred_element_type=jnp.float32)  # (Bb*T, 3H)
    qkv = qkv.astype(cdt).reshape(Bb, T, H3)
    k3 = qkv[:, :, 0 * H:1 * H]
    q3 = qkv[:, :, 1 * H:2 * H]   # 1/sqrt(H) already folded into these columns
    v3 = qkv[:, :, 2 * H:3 * H]

    # Scores: batched contraction over the head dim of q and k — transpose-free,
    # feeds the MXU directly (no k.T materialization).
    wei = lax.dot_general(
        q3, k3,
        dimension_numbers=(((2,), (2,)), ((0,), (0,))),
        preferred_element_type=jnp.float32)                     # (Bb, T, T) f32

    # Causal mask built in-kernel (no HBM mask input): keep where row >= col.
    row = lax.broadcasted_iota(jnp.int32, (T, T), 0)
    col = lax.broadcasted_iota(jnp.int32, (T, T), 1)
    wei = jnp.where((row >= col)[None, :, :], wei, _MASK_VALUE)

    # Numerically stable softmax in f32; reciprocal on the EUP slot.
    m = jnp.max(wei, axis=-1, keepdims=True)
    p = jnp.exp(wei - m)
    denom = jnp.sum(p, axis=-1, keepdims=True)
    p = p * pl.reciprocal(denom, approx=True)

    # dropout(wei): identity in eval mode (see TODO above).

    out = lax.dot_general(
        p.astype(cdt), v3,
        dimension_numbers=(((2,), (1,)), ((0,), (0,))),
        preferred_element_type=jnp.float32)                     # (Bb, T, H) f32

    o_ref[...] = out.astype(o_ref.dtype)


def _build_call(B, T, C, H, bb, out_dtype, single_buffer_weights):
    """Constructs the pallas_call for the given tiling."""
    weight_kwargs = {}
    if single_buffer_weights and hasattr(pl, "Buffered"):
        # Constant index_map -> a second buffer / prologue DMA is pure waste.
        weight_kwargs["pipeline_mode"] = pl.Buffered(1)

    # Advisory cost for XLA's scheduler around this (short) custom call.
    flops = 2 * B * T * C * (3 * H) + 4 * B * T * T * H
    bytes_accessed = (B * T * C * 2                      # x (bf16)
                      + C * 3 * H * 2                    # fused weight (bf16)
                      + B * T * H * jnp.dtype(out_dtype).itemsize)  # output
    cost = pl.CostEstimate(flops=flops,
                           transcendentals=B * T * T,    # exp in softmax
                           bytes_accessed=bytes_accessed)

    return pl.pallas_call(
        _head_kernel,
        out_shape=jax.ShapeDtypeStruct((B, T, H), out_dtype),
        grid_spec=pltpu.PrefetchScalarGridSpec(
            num_scalar_prefetch=0,
            grid=(B // bb,),
            in_specs=[
                pl.BlockSpec((bb, T, C), lambda b: (b, 0, 0)),
                pl.BlockSpec((C, 3 * H), lambda b: (0, 0), **weight_kwargs),
            ],
            out_specs=pl.BlockSpec((bb, T, H), lambda b: (b, 0, 0)),
        ),
        compiler_params=pltpu.CompilerParams(
            # Batch axis is independent across steps; per-step VMEM is tiny
            # (< 1 MiB at bb=2), well under the v7x 64 MiB budget.
            dimension_semantics=("parallel",),
        ),
        cost_estimate=cost,
    )


def head_forward(x, w_key, w_query, w_value, *, batch_block=2,
                 compute_dtype=jnp.bfloat16):
    """Single-head causal self-attention.

    x:        (B, T, C) float32
    w_key:    (C, H) float32   (transposed nn.Linear weight)
    w_query:  (C, H) float32
    w_value:  (C, H) float32
    returns:  (B, T, H) in x.dtype
    """
    B, T, C = x.shape
    H = w_key.shape[1]
    out_dtype = x.dtype

    # Largest divisor of B not exceeding batch_block (keeps the grid exact).
    bb = max(1, min(batch_block, B))
    while B % bb:
        bb -= 1

    # Fold the 1/sqrt(H) score scale into the query columns and fuse all three
    # projection weights into a single (C, 3H) matrix on the host (free).
    scale = jnp.float32(H) ** -0.5
    w_fused = jnp.concatenate(
        [w_key.astype(jnp.float32),
         w_query.astype(jnp.float32) * scale,
         w_value.astype(jnp.float32)],
        axis=1).astype(compute_dtype)                    # (C, 3H)

    xc = x.astype(compute_dtype)

    try:
        return _build_call(B, T, C, H, bb, out_dtype, True)(xc, w_fused)
    except Exception:
        # pipeline_mode=pl.Buffered(1) unsupported on this JAX/libtpu combo:
        # retry with default (double) buffering for the constant weight block.
        return _build_call(B, T, C, H, bb, out_dtype, False)(xc, w_fused)


def _reference(x, w_key, w_query, w_value, compute_dtype=jnp.bfloat16):
    """Pure-JAX reference mirroring the kernel's precision choices
    (low-precision matmul inputs, f32 accumulation / softmax)."""
    f32 = jnp.float32
    H = w_key.shape[1]
    scale = H ** -0.5

    xc = x.astype(compute_dtype).astype(f32)
    wk = w_key.astype(compute_dtype).astype(f32)
    wq = (w_query * scale).astype(compute_dtype).astype(f32)
    wv = w_value.astype(compute_dtype).astype(f32)

    k = xc @ wk
    q = xc @ wq
    v = xc @ wv

    qc = q.astype(compute_dtype).astype(f32)
    kc = k.astype(compute_dtype).astype(f32)
    vc = v.astype(compute_dtype).astype(f32)

    wei = jnp.einsum("btd,bsd->bts", qc, kc)
    T = x.shape[1]
    tril = jnp.tril(jnp.ones((T, T), dtype=bool))
    wei = jnp.where(tril, wei, _MASK_VALUE)
    wei = jax.nn.softmax(wei, axis=-1)
    out = jnp.einsum("bts,bsd->btd", wei.astype(compute_dtype).astype(f32), vc)
    return out.astype(x.dtype)


if __name__ == "__main__":
    B = 8            # grid = B // batch_block = 4 -> >= 2 steps per TC on v7x
    T = block_size   # 128
    C = n_embd       # 384
    head_size = 64

    key = jax.random.PRNGKey(0)
    kx, kk, kq, kv = jax.random.split(key, 4)

    x = jax.random.normal(kx, (B, T, C), dtype=jnp.float32)
    # deterministic "Linear(no bias)" weights, stored transposed as (C, H)
    w_key = jax.random.normal(kk, (C, head_size), dtype=jnp.float32) * (C ** -0.5)
    w_query = jax.random.normal(kq, (C, head_size), dtype=jnp.float32) * (C ** -0.5)
    w_value = jax.random.normal(kv, (C, head_size), dtype=jnp.float32) * (C ** -0.5)

    out = head_forward(x, w_key, w_query, w_value, batch_block=2)
    out = jax.block_until_ready(out)

    ref = _reference(x, w_key, w_query, w_value)
    assert out.shape == (B, T, head_size)
    assert out.dtype == x.dtype
    max_err = float(jnp.max(jnp.abs(out - ref)))
    assert jnp.allclose(out, ref, atol=2e-2, rtol=2e-2), f"max abs err {max_err}"

    print("KERNEL_OK")
</pallas_src>

<mosaic_0001>
module attributes {stable_mosaic.version = 11 : i64} {
  func.func @_head_kernel(%arg0: i32, %arg1: memref<2x128x384xbf16, #tpu.memory_space<vmem>>, %arg2: memref<384x192xbf16, #tpu.memory_space<vmem>>, %arg3: memref<2x128x64xf32, #tpu.memory_space<vmem>>) attributes {dimension_semantics = [#tpu.dimension_semantics<parallel>], iteration_bounds = array<i64: 4>, scalar_prefetch = 0 : i64, scratch_operands = 0 : i64, tpu.core_type = #tpu.core_type<tc>, window_params = [{transform_indices = @transform_0, window_bounds = array<i64: 2, 128, 384>}, {pipeline_mode = #tpu.pipeline_mode<synchronous>, transform_indices = @transform_1, window_bounds = array<i64: 384, 192>}, {transform_indices = @transform_2, window_bounds = array<i64: 2, 128, 64>}]} {
    %c0 = arith.constant 0 : index
    %c0_0 = arith.constant 0 : index
    %c0_1 = arith.constant 0 : index
    %0 = vector.load %arg1[%c0, %c0_0, %c0_1] : memref<2x128x384xbf16, #tpu.memory_space<vmem>>, vector<2x128x384xbf16>
    %1 = vector.shape_cast %0 : vector<2x128x384xbf16> to vector<256x384xbf16>
    %c0_2 = arith.constant 0 : index
    %c0_3 = arith.constant 0 : index
    %2 = vector.load %arg2[%c0_2, %c0_3] : memref<384x192xbf16, #tpu.memory_space<vmem>>, vector<384x192xbf16>
    %cst = arith.constant dense<0.000000e+00> : vector<256x192xf32>
    %3 = tpu.matmul %1, %2, %cst {dimension_numbers = #tpu.dot_dimension_numbers<[1], [0], [0], [1], [0, 0, 1, 1], [], []>} : vector<256x384xbf16>, vector<384x192xbf16>, vector<256x192xf32> -> vector<256x192xf32>
    %4 = arith.truncf %3 : vector<256x192xf32> to vector<256x192xbf16>
    %5 = vector.shape_cast %4 : vector<256x192xbf16> to vector<2x128x192xbf16>
    %6 = vector.extract_strided_slice %5 {offsets = [0, 0, 0], sizes = [2, 128, 64], strides = [1, 1, 1]} : vector<2x128x192xbf16> to vector<2x128x64xbf16>
    %7 = vector.extract_strided_slice %5 {offsets = [0, 0, 64], sizes = [2, 128, 64], strides = [1, 1, 1]} : vector<2x128x192xbf16> to vector<2x128x64xbf16>
    %8 = vector.extract_strided_slice %5 {offsets = [0, 0, 128], sizes = [2, 128, 64], strides = [1, 1, 1]} : vector<2x128x192xbf16> to vector<2x128x64xbf16>
    %cst_4 = arith.constant dense<0.000000e+00> : vector<2x128x128xf32>
    %9 = tpu.matmul %7, %6, %cst_4 {dimension_numbers = #tpu.dot_dimension_numbers<[2], [2], [1], [1], [0, 0, 0, 1, 1, 1], [0], [0]>} : vector<2x128x64xbf16>, vector<2x128x64xbf16>, vector<2x128x128xf32> -> vector<2x128x128xf32>
    %10 = tpu.iota {dimensions = array<i32: 0>} : vector<128x128xi32>
    %11 = tpu.iota {dimensions = array<i32: 1>} : vector<128x128xi32>
    %12 = arith.cmpi sge, %10, %11 : vector<128x128xi32>
    %13 = vector.shape_cast %12 : vector<128x128xi1> to vector<1x128x128xi1>
    %cst_5 = arith.constant -1.000000e+30 : f32
    %14 = vector.shape_cast %13 : vector<1x128x128xi1> to vector<1x128x128xi1>
    %15 = vector.broadcast %14 : vector<1x128x128xi1> to vector<2x128x128xi1>
    %16 = vector.broadcast %cst_5 : f32 to vector<2x128x128xf32>
    %17 = arith.select %15, %9, %16 : vector<2x128x128xi1>, vector<2x128x128xf32>
    %cst_6 = arith.constant dense<0xFF800000> : vector<2x128xf32>
    %18 = vector.multi_reduction <maximumf>, %17, %cst_6 [2] : vector<2x128x128xf32> to vector<2x128xf32>
    %19 = vector.shape_cast %18 : vector<2x128xf32> to vector<2x128x1xf32>
    %20 = vector.broadcast %19 : vector<2x128x1xf32> to vector<2x128x128xf32>
    %21 = arith.subf %17, %20 : vector<2x128x128xf32>
    %22 = math.exp %21 : vector<2x128x128xf32>
    %cst_7 = arith.constant dense<0.000000e+00> : vector<2x128xf32>
    %23 = vector.multi_reduction <add>, %22, %cst_7 [2] : vector<2x128x128xf32> to vector<2x128xf32>
    %24 = vector.shape_cast %23 : vector<2x128xf32> to vector<2x128x1xf32>
    %25 = tpu.reciprocal %24 {approx = true} : vector<2x128x1xf32> -> vector<2x128x1xf32>
    %26 = vector.broadcast %25 : vector<2x128x1xf32> to vector<2x128x128xf32>
    %27 = arith.mulf %22, %26 : vector<2x128x128xf32>
    %28 = arith.truncf %27 : vector<2x128x128xf32> to vector<2x128x128xbf16>
    %cst_8 = arith.constant dense<0.000000e+00> : vector<2x128x64xf32>
    %29 = tpu.matmul %28, %8, %cst_8 {dimension_numbers = #tpu.dot_dimension_numbers<[2], [1], [1], [2], [0, 0, 0, 1, 1, 2], [0], [0]>} : vector<2x128x128xbf16>, vector<2x128x64xbf16>, vector<2x128x64xf32> -> vector<2x128x64xf32>
    %c0_9 = arith.constant 0 : index
    %c0_10 = arith.constant 0 : index
    %c0_11 = arith.constant 0 : index
    %30 = vector.load %arg3[%c0_9, %c0_10, %c0_11] : memref<2x128x64xf32, #tpu.memory_space<vmem>>, vector<2x128x64xf32>
    tpu.vector_store %arg3[%c0_9, %c0_10, %c0_11], %29 {strides = array<i32>} : memref<2x128x64xf32, #tpu.memory_space<vmem>>, vector<2x128x64xf32>,
    return
  }
  func.func @transform_0(%arg0: i32) -> (i32, i32, i32) {
    %c0_i32 = arith.constant 0 : i32
    %c0_i32_0 = arith.constant 0 : i32
    %c0_i32_1 = arith.constant 0 : i32
    return %arg0, %c0_i32, %c0_i32_0 : i32, i32, i32
  }
  func.func @transform_1(%arg0: i32) -> (i32, i32) {
    %c0_i32 = arith.constant 0 : i32
    %c0_i32_0 = arith.constant 0 : i32
    %c0_i32_1 = arith.constant 0 : i32
    return %c0_i32, %c0_i32_0 : i32, i32
  }
  func.func @transform_2(%arg0: i32) -> (i32, i32, i32) {
    %c0_i32 = arith.constant 0 : i32
    %c0_i32_0 = arith.constant 0 : i32
    %c0_i32_1 = arith.constant 0 : i32
    return %arg0, %c0_i32, %c0_i32_0 : i32, i32, i32
  }
}

module attributes {stable_mosaic.version = 11 : i64} {
  func.func @_head_kernel(%arg0: i32, %arg1: memref<2x128x384xbf16, #tpu.memory_space<vmem>>, %arg2: memref<384x192xbf16, #tpu.memory_space<vmem>>, %arg3: memref<2x128x64xf32, #tpu.memory_space<vmem>>) attributes {dimension_semantics = [#tpu.dimension_semantics<parallel>], iteration_bounds = array<i64: 4>, scalar_prefetch = 0 : i64, scratch_operands = 0 : i64, tpu.core_type = #tpu.core_type<tc>, window_params = [{transform_indices = @transform_0, window_bounds = array<i64: 2, 128, 384>}, {pipeline_mode = #tpu.pipeline_mode<synchronous>, transform_indices = @transform_1, window_bounds = array<i64: 384, 192>}, {transform_indices = @transform_2, window_bounds = array<i64: 2, 128, 64>}]} {
    %c0 = arith.constant 0 : index
    %c0_0 = arith.constant 0 : index
    %c0_1 = arith.constant 0 : index
    %0 = vector.load %arg1[%c0, %c0_0, %c0_1] : memref<2x128x384xbf16, #tpu.memory_space<vmem>>, vector<2x128x384xbf16>
    %1 = vector.shape_cast %0 : vector<2x128x384xbf16> to vector<256x384xbf16>
    %c0_2 = arith.constant 0 : index
    %c0_3 = arith.constant 0 : index
    %2 = vector.load %arg2[%c0_2, %c0_3] : memref<384x192xbf16, #tpu.memory_space<vmem>>, vector<384x192xbf16>
    %cst = arith.constant dense<0.000000e+00> : vector<256x192xf32>
    %3 = tpu.matmul %1, %2, %cst {dimension_numbers = #tpu.dot_dimension_numbers<[1], [0], [0], [1], [0, 0, 1, 1], [], []>} : vector<256x384xbf16>, vector<384x192xbf16>, vector<256x192xf32> -> vector<256x192xf32>
    %4 = arith.truncf %3 : vector<256x192xf32> to vector<256x192xbf16>
    %5 = vector.shape_cast %4 : vector<256x192xbf16> to vector<2x128x192xbf16>
    %6 = vector.extract_strided_slice %5 {offsets = [0, 0, 0], sizes = [2, 128, 64], strides = [1, 1, 1]} : vector<2x128x192xbf16> to vector<2x128x64xbf16>
    %7 = vector.extract_strided_slice %5 {offsets = [0, 0, 64], sizes = [2, 128, 64], strides = [1, 1, 1]} : vector<2x128x192xbf16> to vector<2x128x64xbf16>
    %8 = vector.extract_strided_slice %5 {offsets = [0, 0, 128], sizes = [2, 128, 64], strides = [1, 1, 1]} : vector<2x128x192xbf16> to vector<2x128x64xbf16>
    %cst_4 = arith.constant dense<0.000000e+00> : vector<2x128x128xf32>
    %9 = tpu.matmul %7, %6, %cst_4 {dimension_numbers = #tpu.dot_dimension_numbers<[2], [2], [1], [1], [0, 0, 0, 1, 1, 1], [0], [0]>} : vector<2x128x64xbf16>, vector<2x128x64xbf16>, vector<2x128x128xf32> -> vector<2x128x128xf32>
    %10 = tpu.iota {dimensions = array<i32: 0>} : vector<128x128xi32>
    %11 = tpu.iota {dimensions = array<i32: 1>} : vector<128x128xi32>
    %12 = arith.cmpi sge, %10, %11 : vector<128x128xi32>
    %13 = vector.shape_cast %12 : vector<128x128xi1> to vector<1x128x128xi1>
    %cst_5 = arith.constant -1.000000e+30 : f32
    %14 = vector.shape_cast %13 : vector<1x128x128xi1> to vector<1x128x128xi1>
    %15 = vector.broadcast %14 : vector<1x128x128xi1> to vector<2x128x128xi1>
    %16 = vector.broadcast %cst_5 : f32 to vector<2x128x128xf32>
    %17 = arith.select %15, %9, %16 : vector<2x128x128xi1>, vector<2x128x128xf32>
    %cst_6 = arith.constant dense<0xFF800000> : vector<2x128xf32>
    %18 = vector.multi_reduction <maximumf>, %17, %cst_6 [2] : vector<2x128x128xf32> to vector<2x128xf32>
    %19 = vector.shape_cast %18 : vector<2x128xf32> to vector<2x128x1xf32>
    %20 = vector.broadcast %19 : vector<2x128x1xf32> to vector<2x128x128xf32>
    %21 = arith.subf %17, %20 : vector<2x128x128xf32>
    %22 = math.exp %21 : vector<2x128x128xf32>
    %cst_7 = arith.constant dense<0.000000e+00> : vector<2x128xf32>
    %23 = vector.multi_reduction <add>, %22, %cst_7 [2] : vector<2x128x128xf32> to vector<2x128xf32>
    %24 = vector.shape_cast %23 : vector<2x128xf32> to vector<2x128x1xf32>
    %25 = tpu.reciprocal %24 {approx = true} : vector<2x128x1xf32> -> vector<2x128x1xf32>
    %26 = vector.broadcast %25 : vector<2x128x1xf32> to vector<2x128x128xf32>
    %27 = arith.mulf %22, %26 : vector<2x128x128xf32>
    %28 = arith.truncf %27 : vector<2x128x128xf32> to vector<2x128x128xbf16>
    %cst_8 = arith.constant dense<0.000000e+00> : vector<2x128x64xf32>
    %29 = tpu.matmul %28, %8, %cst_8 {dimension_numbers = #tpu.dot_dimension_numbers<[2], [1], [1], [2], [0, 0, 0, 1, 1, 2], [0], [0]>} : vector<2x128x128xbf16>, vector<2x128x64xbf16>, vector<2x128x64xf32> -> vector<2x128x64xf32>
    %c0_9 = arith.constant 0 : index
    %c0_10 = arith.constant 0 : index
    %c0_11 = arith.constant 0 : index
    %30 = vector.load %arg3[%c0_9, %c0_10, %c0_11] : memref<2x128x64xf32, #tpu.memory_space<vmem>>, vector<2x128x64xf32>
    tpu.vector_store %arg3[%c0_9, %c0_10, %c0_11], %29 {strides = array<i32>} : memref<2x128x64xf32, #tpu.memory_space<vmem>>, vector<2x128x64xf32>,
    return
  }
  func.func @transform_0(%arg0: i32) -> (i32, i32, i32) {
    %c0_i32 = arith.constant 0 : i32
    %c0_i32_0 = arith.constant 0 : i32
    %c0_i32_1 = arith.constant 0 : i32
    return %arg0, %c0_i32, %c0_i32_0 : i32, i32, i32
  }
  func.func @transform_1(%arg0: i32) -> (i32, i32) {
    %c0_i32 = arith.constant 0 : i32
    %c0_i32_0 = arith.constant 0 : i32
    %c0_i32_1 = arith.constant 0 : i32
    return %c0_i32, %c0_i32_0 : i32, i32
  }
  func.func @transform_2(%arg0: i32) -> (i32, i32, i32) {
    %c0_i32 = arith.constant 0 : i32
    %c0_i32_0 = arith.constant 0 : i32
    %c0_i32_1 = arith.constant 0 : i32
    return %arg0, %c0_i32, %c0_i32_0 : i32, i32, i32
  }
}

</mosaic_0001>

<bundles_post_ra>
// kernel: tpu_custom_call.1
= control target key start
LH: loop header
LB: loop body
LE: loop exit
PB: predicated region body
PF: predicated region fallthrough
CT: control target
= control target key end

     0   :  { %7 = vsyncpa [#allocation3], 0  ;;  %s3973_s0 = inlined_call_operand.hbm [shape: bf16[8,128,384], index: 0, kind: input, shape index: {}]   ;;  %s3974_s1 = inlined_call_operand.vmem [shape: bf16[384,192], index: 1, kind: input, shape index: {}]   ;;  %s3975_s2 = inlined_call_operand.vmem [shape: f32[8,128,64], index: 2, kind: output, shape index: {}]  }
   0x1   :  { %9 = vsyncpa [#allocation3 + $0x1], 0  ;;  %s2977_s9 = smov 0   ;;  %s2979_s10 = smov 0  }
   0x2   :  { %s2981_s11 = smov 0   ;;  %s2983_s12 = smov 0  }
   0x3 LB: > { %s2233_s13 = sadd.s32 4294967295, %s2955_s12   ;;  %s2997_s14 = sadd.s32 1, %s2955_s12   ;;  %s2955_s12 = sphi %s2983_s12, %s4016_s12   ;;  %s2951_s11 = sphi %s2981_s11, %s4015_s11   ;;  %s2947_s10 = sphi %s2979_s10, %s4014_s10   ;;  %s2943_s9 = sphi %s2977_s9, %s4013_s9  }
   0x4   : > { %s19_s15 = ssub.s32 %s2955_s12, %s2997_s14  ;;  %s22_s16 = sadd.s32 1, %s2951_s11 }
   0x5   : > { %p20_p0 = scmp.eq.s32.totalorder %s19_s15, 0  ;;  %p29_p1 = scmp.ne.s32.totalorder %s2951_s11, %s2947_s10 }
   0x6   : > { %p30_p2 = scmp.eq.s32.totalorder %s2955_s12, 0  ;;  %p35_p3 = scmp.ne.s32.totalorder %s2947_s10, %s2943_s9 }
   0x7   : > { %s3007_s17 = scalar_select %p20_p0, %s2951_s11, %s22_s16  }
   0x8   : > { %p31_p4 = por %p30_p2, %p29_p1  ;;  %p36_p5 = scmp.eq.s32.totalorder %s2233_s13, 0 }
   0x9   : > { %p2592_p6 = scmp.lt.s32.totalorder %s2955_s12, 4  ;;  %s109_s19 = sand.u32 1, %s2951_s11  }
   0xa   : > { %p3012_p7 = por %p36_p5, %p35_p3  ;;  %s2583_s20 = smul.u32 384, %s109_s19 }
   0xb   : > { %s2584_s21 = smul.u32 6144, %s2955_s12  ;;  %p3018_p8 = pnand %p2592_p6, %p31_p4 }
   0xc   : > { %s3978_s18 = scalar_select %p3012_p7, 1, 0 }
   0xd   : > { %s3025_s25 = scalar_lea.hbm %s3973_s0, %s2584_s21  ;;  %s113_s26 = scalar_lea.vmem [#allocation2], %s2583_s20 }
   0xe   : > { %s121_s27 = sshll.u32 %s113_s26, 4  ;;  %s3030_s28 = scalar_lea.sflag [#allocation3], %s109_s19  ;;  %s3027_s27 = int_to_ptr.vmem [resolvable:$true] %s121_s27 }
   0xf   : > { %s2893_s29 = scalar_lea.hbm %s3025_s25, 6144  ;;  %p2895_p11 = pneg %p3018_p8 }
  0x10   : > { %p2894_p10 = scmp.ne.s32.totalorder %s3025_s25, %s2893_s29  ;;  %s2898_s4 = scalar_lea.hbm %s3973_s0, 24576 }
  0x11   : > { %p2899_p0 = scmp.lt.s32.totalorder %s3025_s25, %s3973_s0  ;;  %p2900_p1 = scmp.lt.s32.totalorder %s2898_s4, %s2893_s29 }
  0x12   : > { %p2896_p12 = pnand %p2895_p11, %p2894_p10 }
  0x13   : > { %p2901_p2 = por %p2900_p1, %p2899_p0 }
  0x14   : > { %p2897_p13 = pneg %p2896_p12 }
  0x16   : > { %p2902_p3 = pnand %p2901_p2, %p2897_p13 }
  0x18   : > { %2905 = shalt.err (!%p2902_p3)
}
  0x19   : > { %s2906_s7 = scalar_lea.vmem %s3027_s27, 6144  ;;  %s2957_s8 = smov [#allocation2]  }
  0x1a   : > { %p2907_p4 = scmp.ne.s32.totalorder %s3027_s27, %s2906_s7  ;;  %s2911_s9 = sshll.u32 %s2957_s8, 4  ;;  %s2912_s9 = int_to_ptr.vmem [resolvable:$false] %s2911_s9 }
  0x1b   : > { %s2913_s15 = scalar_lea.vmem %s2912_s9, 12288  ;;  %p2914_p10 = scmp.lt.s32.totalorder %s3027_s27, %s2912_s9 }
  0x1c   : > { %p2909_p5 = pnand %p2907_p4, %p2895_p11  ;;  %p2915_p12 = scmp.lt.s32.totalorder %s2913_s15, %s2906_s7 }
  0x1e   : > { %p2910_p6 = pneg %p2909_p5  ;;  %p2916_p9 = por %p2915_p12, %p2914_p10 }
  0x20   : > { %p2917_p7 = pnand %p2916_p9, %p2910_p6 }
  0x22   : > { %2920 = shalt.err (!%p2917_p7)
}
  0x23   : > { %s2958_s16 = smov 192   ;;  %s2959_s19 = smov 12  }
  0x24   : > { %2591 = dma.hbm_to_vmem [thread:$0]  (!%p3018_p8), %s3025_s25, 6144, %s3027_s27, %s3030_s28, %s2958_s16, %s2958_s16, %s2959_s19  }
  0x25   : > { %p129_p11 = scmp.lt.s32.totalorder %s2955_s12, 5  ;;  %p3980_p13 = scmp.ge.s32.totalorder %s2955_s12, 1 }
  0x27   : > { %p130_p0 = pnand %p3980_p13, %p129_p11 }
  0x28   : > { %s135_s20 = sand.u32 (!%p130_p0), 1, %s2947_s10   ;;  %p3981_p7 = scmp.ne.s32.totalorder (!%p130_p0), %s3978_s18, 0 }
  0x29   : > { %133 = sbr.rel (%p130_p0) target bundleno = 1265 (0x4f1), region = 28  ;;  %s136_s23 = scalar_lea.sflag (!%p130_p0), [#allocation3], %s135_s20 }
  0x2a   : > { %s2585_s21 = smul.u32 (!%p130_p0), 384, %s135_s20 }
  0x2c   : > { %s3055_s24 = scalar_lea.vmem (!%p130_p0), [#allocation2], %s2585_s21 }
  0x2e   : > { %2938 = dma.done.wait (%p3981_p7), %s136_s23, 6144  }
  0x2f   : > { %2940 = vsyncadd (%p3981_p7), %s136_s23, 4294961152  ;;  %v2960_v0 = vmov 0   ;;  %v2629_v1 = vld [vmem:[%s3974_s1 + $0x74] ss:$8 sps:$4 sm:$0xff]   ;;  %v2631_v2 = vld [vmem:[%s3974_s1 + $0x70] ss:$8 sps:$4 sm:$0xff]  }
  0x30   : > { %1003 = vmatprep.mubr.bf16.mxu1 %v2960_v0  ;;  %778 = vmatprep.subr.bf16.mxu0 %v2629_v1  ;;  %v2632_v3 = vld [vmem:[%s3974_s1 + $0x64] ss:$8 sps:$4 sm:$0xff]   ;;  %v2634_v4 = vld [vmem:[%s3974_s1 + $0x60] ss:$8 sps:$4 sm:$0xff]   ;;  %v2635_v5 = vld [vmem:[%s3974_s1 + $0x54] ss:$8 sps:$4 sm:$0xff]  }
  0x31   : > { %779 = vmatpush1.bf16.msra.mxu0 %v2631_v2  ;;  %v2637_v6 = vld [vmem:[%s3974_s1 + $0x50] ss:$8 sps:$4 sm:$0xff]   ;;  %v2638_v7 = vld [vmem:[%s3974_s1 + $0x44] ss:$8 sps:$4 sm:$0xff]   ;;  %v2650_v8 = vld [vmem:[%s3974_s1 + $0x174] ss:$8 sps:$4 sm:$0xff]  }
  0x32   : > { %780 = vmatprep.subr.bf16.mxu0 %v2632_v3  ;;  %v2652_v9 = vld [vmem:[%s3974_s1 + $0x170] ss:$8 sps:$4 sm:$0xff]   ;;  %v2640_v10 = vld [vmem:[%s3974_s1 + $0x40] ss:$8 sps:$4 sm:$0xff]   ;;  %v2641_v11 = vld [vmem:[%s3974_s1 + $0x34] ss:$8 sps:$4 sm:$0xff]   ;;  %971 = vmatprep.subr.bf16.mxu1 %v2650_v8 }
  0x33   : > { %v2656_v12 = vld [vmem:[%s3974_s1 + $0x164] ss:$8 sps:$4 sm:$0xff]   ;;  %972 = vmatpush1.bf16.msra.mxu1 %v2652_v9  ;;  %v2658_v13 = vld [vmem:[%s3974_s1 + $0x160] ss:$8 sps:$4 sm:$0xff]   ;;  %v2643_v14 = vld [vmem:[%s3974_s1 + $0x30] ss:$8 sps:$4 sm:$0xff]  }
  0x34   : > { %973 = vmatprep.subr.bf16.mxu1 %v2656_v12  ;;  %v2662_v15 = vld [vmem:[%s3974_s1 + $0x154] ss:$8 sps:$4 sm:$0xff]   ;;  %v2644_v16 = vld [vmem:[%s3974_s1 + $0x24] ss:$8 sps:$4 sm:$0xff]   ;;  %v2664_v17 = vld [vmem:[%s3974_s1 + $0x150] ss:$8 sps:$4 sm:$0xff]  }
  0x35   : > { %781 = vmatpush1.bf16.msra.mxu0 %v2634_v4  ;;  %v2668_v18 = vld [vmem:[%s3974_s1 + $0x144] ss:$8 sps:$4 sm:$0xff]   ;;  %v2646_v19 = vld [vmem:[%s3974_s1 + $0x20] ss:$8 sps:$4 sm:$0xff]   ;;  %v2647_v20 = vld [vmem:[%s3974_s1 + $0x14] ss:$8 sps:$4 sm:$0xff]  }
  0x36   : > { %782 = vmatprep.subr.bf16.mxu0 %v2635_v5  ;;  %v2670_v21 = vld [vmem:[%s3974_s1 + $0x140] ss:$8 sps:$4 sm:$0xff]   ;;  %v2674_v22 = vld [vmem:[%s3974_s1 + $0x134] ss:$8 sps:$4 sm:$0xff]   ;;  %v2649_v23 = vld [vmem:[%s3974_s1 + $0x10] ss:$8 sps:$4 sm:$0xff]  }
  0x37   : > { %974 = vmatpush1.bf16.msra.mxu1 %v2658_v13  ;;  %v2653_v24 = vld [vmem:[%s3974_s1 + $0x4] ss:$8 sps:$4 sm:$0xff]   ;;  %v2676_v25 = vld [vmem:[%s3974_s1 + $0x130] ss:$8 sps:$4 sm:$0xff]   ;;  %v2655_v27 = vld [vmem:[%s3974_s1] ss:$8 sps:$4 sm:$0xff]  }
  0x38   : > { %975 = vmatprep.subr.bf16.mxu1 %v2662_v15  ;;  %v2680_v26 = vld [vmem:[%s3974_s1 + $0x124] ss:$8 sps:$4 sm:$0xff]   ;;  %v2659_v28 = vld [vmem:[%s3974_s1 + $0xf4] ss:$8 sps:$4 sm:$0xff]   ;;  %v2682_v29 = vld [vmem:[%s3974_s1 + $0x120] ss:$8 sps:$4 sm:$0xff]  }
  0x39   : > { %783 = vmatpush1.bf16.msra.mxu0 %v2637_v6  ;;  %v2686_v30 = vld [vmem:[%s3974_s1 + $0x114] ss:$8 sps:$4 sm:$0xff]   ;;  %v2661_v31 = vld [vmem:[%s3974_s1 + $0xf0] ss:$8 sps:$4 sm:$0xff]   ;;  %v2665_v32 = vld [vmem:[%s3974_s1 + $0xe4] ss:$8 sps:$4 sm:$0xff]  }
  0x3a   : > { %784 = vmatprep.subr.bf16.mxu0 %v2638_v7  ;;  %v2688_v33 = vld [vmem:[%s3974_s1 + $0x110] ss:$8 sps:$4 sm:$0xff]   ;;  %v2692_v34 = vld [vmem:[%s3974_s1 + $0x104] ss:$8 sps:$4 sm:$0xff]   ;;  %v2667_v36 = vld [vmem:[%s3974_s1 + $0xe0] ss:$8 sps:$4 sm:$0xff]  }
  0x3b   : > { %976 = vmatpush1.bf16.msra.mxu1 %v2664_v17  ;;  %v2704_v35 = vld [vmem:[%s3055_s24 + $0x4] ss:$12 sps:$4 sm:$0xff]   ;;  %v2671_v37 = vld [vmem:[%s3974_s1 + $0xd4] ss:$8 sps:$4 sm:$0xff]   ;;  %v2694_v38 = vld [vmem:[%s3974_s1 + $0x100] ss:$8 sps:$4 sm:$0xff]  }
  0x3c   : > { %977 = vmatprep.subr.bf16.mxu1 %v2668_v18  ;;  %810 = vmatprep.mubr.bf16.mxu0 %v2704_v35  ;;  %v2673_v39 = vld [vmem:[%s3974_s1 + $0xd0] ss:$8 sps:$4 sm:$0xff]   ;;  %v2677_v40 = vld [vmem:[%s3974_s1 + $0xc4] ss:$8 sps:$4 sm:$0xff]   ;;  %v2698_v41 = vld [vmem:[%s3055_s24 + $0x8] ss:$12 sps:$4 sm:$0xff]  }
  0x3d   : > { %785 = vmatpush1.bf16.msra.mxu0 %v2640_v10  ;;  %v2679_v42 = vld [vmem:[%s3974_s1 + $0xc0] ss:$8 sps:$4 sm:$0xff]   ;;  %v2683_v43 = vld [vmem:[%s3974_s1 + $0xb4] ss:$8 sps:$4 sm:$0xff]   ;;  %v2685_v44 = vld [vmem:[%s3974_s1 + $0xb0] ss:$8 sps:$4 sm:$0xff]  }
  0x3e   : > { %786 = vmatprep.subr.bf16.mxu0 %v2641_v11  ;;  %v2689_v45 = vld [vmem:[%s3974_s1 + $0xa4] ss:$8 sps:$4 sm:$0xff]   ;;  %v2691_v47 = vld [vmem:[%s3974_s1 + $0xa0] ss:$8 sps:$4 sm:$0xff]   ;;  %v2695_v48 = vld [vmem:[%s3974_s1 + $0x94] ss:$8 sps:$4 sm:$0xff]  }
  0x3f   : > { %978 = vmatpush1.bf16.msra.mxu1 %v2670_v21  ;;  %v2705_v46 = vld [vmem:[%s3055_s24 + $0x20] ss:$12 sps:$4 sm:$0xff]   ;;  %v2697_v49 = vld [vmem:[%s3974_s1 + $0x90] ss:$8 sps:$4 sm:$0xff]   ;;  %v2706_v54 = vld [vmem:[%s3055_s24 + $0x1c] ss:$12 sps:$4 sm:$0xff]  }
  0x40   : > { %979 = vmatprep.subr.bf16.mxu1 %v2674_v22  ;;  %v2699_v50 = vld [vmem:[%s3974_s1 + $0x84] ss:$8 sps:$4 sm:$0xff]   ;;  %v2701_v52 = vld [vmem:[%s3974_s1 + $0x80] ss:$8 sps:$4 sm:$0xff]   ;;  %v2713_v55 = vld [vmem:[%s3055_s24 + $0x50] ss:$12 sps:$4 sm:$0xff]  }
  0x41   : > { %787 = vmatpush1.bf16.msra.mxu0 %v2643_v14  ;;  %v2709_v51 = vld [vmem:[%s3055_s24 + $0x38] ss:$12 sps:$4 sm:$0xff]   ;;  %v2702_v53 = vld [vmem:[%s3055_s24] ss:$12 sps:$4 sm:$0xff]   ;;  %v2717_v58 = vld [vmem:[%s3055_s24 + $0x68] ss:$12 sps:$4 sm:$0xff]  }
  0x42   : > { %788 = vmatprep.subr.bf16.mxu0 %v2644_v16  ;;  %v2708_v56 = vld [vmem:[%s3055_s24 + $0x18] ss:$12 sps:$4 sm:$0xff]   ;;  %v2710_v57 = vld [vmem:[%s3055_s24 + $0x34] ss:$12 sps:$4 sm:$0xff]   ;;  %v2712_v59 = vld [vmem:[%s3055_s24 + $0x30] ss:$12 sps:$4 sm:$0xff]  }
  0x43   : > { %980 = vmatpush1.bf16.msra.mxu1 %v2676_v25  ;;  %v2714_v60 = vld [vmem:[%s3055_s24 + $0x4c] ss:$12 sps:$4 sm:$0xff]   ;;  %v2716_v62 = vld [vmem:[%s3055_s24 + $0x48] ss:$12 sps:$4 sm:$0xff]   ;;  %v2718_v63 = vld [vmem:[%s3055_s24 + $0x64] ss:$12 sps:$4 sm:$0xff]  }
  0x44   : > { %981 = vmatprep.subr.bf16.mxu1 %v2680_v26  ;;  %v2721_v61 = vld [vmem:[%s3055_s24 + $0x80] ss:$12 sps:$4 sm:$0xff]   ;;  %v2725_v1 = vld [vmem:[%s3055_s24 + $0x98] ss:$12 sps:$4 sm:$0xff]   ;;  %v2722_v3 = vld [vmem:[%s3055_s24 + $0x7c] ss:$12 sps:$4 sm:$0xff]  }
  0x45   : > { %789 = vmatpush1.bf16.msra.mxu0 %v2646_v19  ;;  %v2720_v2 = vld [vmem:[%s3055_s24 + $0x60] ss:$12 sps:$4 sm:$0xff]   ;;  %v2729_v4 = vld [vmem:[%s3055_s24 + $0xb0] ss:$12 sps:$4 sm:$0xff]   ;;  %v2724_v5 = vld [vmem:[%s3055_s24 + $0x78] ss:$12 sps:$4 sm:$0xff]  }
  0x46   : > { %790 = vmatprep.subr.bf16.mxu0 %v2647_v20  ;;  %v2726_v6 = vld [vmem:[%s3055_s24 + $0x94] ss:$12 sps:$4 sm:$0xff]   ;;  %v2728_v8 = vld [vmem:[%s3055_s24 + $0x90] ss:$12 sps:$4 sm:$0xff]   ;;  %v2730_v9 = vld [vmem:[%s3055_s24 + $0xac] ss:$12 sps:$4 sm:$0xff]  }
  0x47   : > { %982 = vmatpush1.bf16.msra.mxu1 %v2682_v29  ;;  %v2733_v7 = vld [vmem:[%s3055_s24 + $0xc8] ss:$12 sps:$4 sm:$0xff]   ;;  %v2737_v10 = vld [vmem:[%s3055_s24 + $0xe0] ss:$12 sps:$4 sm:$0xff]   ;;  %v2734_v12 = vld [vmem:[%s3055_s24 + $0xc4] ss:$12 sps:$4 sm:$0xff]  }
  0x48   : > { %983 = vmatprep.subr.bf16.mxu1 %v2686_v30  ;;  %v2732_v11 = vld [vmem:[%s3055_s24 + $0xa8] ss:$12 sps:$4 sm:$0xff]   ;;  %v2741_v13 = vld [vmem:[%s3055_s24 + $0xf8] ss:$12 sps:$4 sm:$0xff]   ;;  %v2736_v14 = vld [vmem:[%s3055_s24 + $0xc0] ss:$12 sps:$4 sm:$0xff]  }
  0x49   : > { %791 = vmatpush1.bf16.msra.mxu0 %v2649_v23  ;;  %v2738_v15 = vld [vmem:[%s3055_s24 + $0xdc] ss:$12 sps:$4 sm:$0xff]   ;;  %v2740_v17 = vld [vmem:[%s3055_s24 + $0xd8] ss:$12 sps:$4 sm:$0xff]   ;;  %v2742_v18 = vld [vmem:[%s3055_s24 + $0xf4] ss:$12 sps:$4 sm:$0xff]  }
  0x4a   : > { %792 = vmatprep.subr.bf16.mxu0 %v2653_v24  ;;  %v2745_v16 = vld [vmem:[%s3055_s24 + $0x110] ss:$12 sps:$4 sm:$0xff]   ;;  %v2749_v19 = vld [vmem:[%s3055_s24 + $0x128] ss:$12 sps:$4 sm:$0xff]   ;;  %v2746_v21 = vld [vmem:[%s3055_s24 + $0x10c] ss:$12 sps:$4 sm:$0xff]  }
  0x4b   : > { %984 = vmatpush1.bf16.msra.mxu1 %v2688_v33  ;;  %v2744_v20 = vld [vmem:[%s3055_s24 + $0xf0] ss:$12 sps:$4 sm:$0xff]   ;;  %v2753_v22 = vld [vmem:[%s3055_s24 + $0x140] ss:$12 sps:$4 sm:$0xff]   ;;  %v2748_v23 = vld [vmem:[%s3055_s24 + $0x108] ss:$12 sps:$4 sm:$0xff]  }
  0x4c   : > { %985 = vmatprep.subr.bf16.mxu1 %v2692_v34  ;;  %v2750_v24 = vld [vmem:[%s3055_s24 + $0x124] ss:$12 sps:$4 sm:$0xff]   ;;  %v2752_v26 = vld [vmem:[%s3055_s24 + $0x120] ss:$12 sps:$4 sm:$0xff]   ;;  %v2764_v33 = vld [vmem:[%s3055_s24 + $0x168] ss:$12 sps:$4 sm:$0xff]  }
  0x4d   : > { %793 = vmatpush1.bf16.msra.mxu0 %v2655_v27  ;;  %v2757_v25 = vld [vmem:[%s3055_s24 + $0x158] ss:$12 sps:$4 sm:$0xff]   ;;  %v2754_v27 = vld [vmem:[%s3055_s24 + $0x13c] ss:$12 sps:$4 sm:$0xff]   ;;  %v2758_v30 = vld [vmem:[%s3055_s24 + $0x154] ss:$12 sps:$4 sm:$0xff]  }
  0x4e   : > { %794 = vmatprep.subr.bf16.mxu0 %v2659_v28  ;;  %v2761_v28 = vld [vmem:[%s3055_s24 + $0x170] ss:$12 sps:$4 sm:$0xff]   ;;  %v2756_v29 = vld [vmem:[%s3055_s24 + $0x138] ss:$12 sps:$4 sm:$0xff]   ;;  %vm3977_vm0 = vcmask 523264   ;;  %s2241_s7 = sshll.u32 %s2233_s13, 1 }
  0x4f   : > { %986 = vmatpush1.bf16.msra.mxu1 %v2694_v38  ;;  %p163_p8 = scmp.lt.s32.totalorder %s2241_s7, 7 }
  0x51   : > { %795 = vmatpush2.bf16.msra.mxu0 %v2661_v31  ;;  %v2760_v31 = vld [vmem:[%s3055_s24 + $0x150] ss:$12 sps:$4 sm:$0xff]   ;;  %s4018_s7 = smov (!%p163_p8, %s2241_s7), 7 }
  0x52   : > { %796 = vmatprep.subr.bf16.mxu0 %v2665_v32  ;;  %1004 = vmatmul.mubr.bf16.vlgmr.msra.gmra.mxu1 %v2698_v41  ;;  %v2762_v32 = vld [vmem:[%s3055_s24 + $0x16c] ss:$12 sps:$4 sm:$0xff]   ;;  %s2961_s24 = smov 64   ;;  %s2358_s8 = sshll.u32 %s4018_s7, 7 }
  0x53   : > { %1013 = vmatprep.mubr.bf16.mxu1 %v2960_v0  ;;  %s3894_s16 = scalar_lea.vmem %s3975_s2, %s2358_s8 }
  0x55   : > { %797 = vmatpush2.bf16.msra.mxu0 %v2667_v36 }
  0x56   : > { %798 = vmatprep.subr.bf16.mxu0 %v2671_v37 }
  0x59   : > { %799 = vmatpush2.bf16.msra.mxu0 %v2673_v39 }
  0x5a   : > { %800 = vmatprep.subr.bf16.mxu0 %v2677_v40  ;;  %1014 = vmatmul.mubr.bf16.gmra.mxu1 %v2705_v46 }
  0x5b   : > { %1023 = vmatprep.mubr.bf16.mxu1 %v2960_v0 }
  0x5d   : > { %801 = vmatpush2.bf16.msra.mxu0 %v2679_v42 }
  0x5e   : > { %802 = vmatprep.subr.bf16.mxu0 %v2683_v43 }
  0x61   : > { %803 = vmatpush2.bf16.msra.mxu0 %v2685_v44 }
  0x62   : > { %804 = vmatprep.subr.bf16.mxu0 %v2689_v45  ;;  %1024 = vmatmul.mubr.bf16.gmra.mxu1 %v2709_v51 }
  0x63   : > { %1033 = vmatprep.mubr.bf16.mxu1 %v2960_v0 }
  0x65   : > { %805 = vmatpush2.bf16.msra.mxu0 %v2691_v47 }
  0x66   : > { %806 = vmatprep.subr.bf16.mxu0 %v2695_v48 }
  0x69   : > { %807 = vmatpush2.bf16.msra.mxu0 %v2697_v49 }
  0x6a   : > { %808 = vmatprep.subr.bf16.mxu0 %v2699_v50  ;;  %1034 = vmatmul.mubr.bf16.gmra.mxu1 %v2713_v55 }
  0x6b   : > { %1043 = vmatprep.mubr.bf16.mxu1 %v2960_v0 }
  0x6d   : > { %809 = vmatpush2.bf16.msra.mxu0 %v2701_v52 }
  0x70   : > { %811 = vmatmul.mubr.bf16.vlgmr.msra.gmra.mxu0 %v2702_v53 }
  0x71   : > { %820 = vmatprep.mubr.bf16.mxu0 %v2706_v54 }
  0x72   : > { %1044 = vmatmul.mubr.bf16.gmra.mxu1 %v2717_v58 }
  0x73   : > { %1053 = vmatprep.mubr.bf16.mxu1 %v2960_v0 }
  0x78   : > { %821 = vmatmul.mubr.bf16.gmra.mxu0 %v2708_v56 }
  0x79   : > { %830 = vmatprep.mubr.bf16.mxu0 %v2710_v57 }
  0x7a   : > { %1054 = vmatmul.mubr.bf16.gmra.mxu1 %v2721_v61 }
  0x7b   : > { %1063 = vmatprep.mubr.bf16.mxu1 %v2960_v0 }
  0x80   : > { %831 = vmatmul.mubr.bf16.gmra.mxu0 %v2712_v59 }
  0x81   : > { %840 = vmatprep.mubr.bf16.mxu0 %v2714_v60 }
  0x82   : > { %1064 = vmatmul.mubr.bf16.gmra.mxu1 %v2725_v1 }
  0x83   : > { %1073 = vmatprep.mubr.bf16.mxu1 %v2960_v0 }
  0x88   : > { %841 = vmatmul.mubr.bf16.gmra.mxu0 %v2716_v62 }
  0x89   : > { %850 = vmatprep.mubr.bf16.mxu0 %v2718_v63 }
  0x8a   : > { %1074 = vmatmul.mubr.bf16.gmra.mxu1 %v2729_v4 }
  0x8b   : > { %1083 = vmatprep.mubr.bf16.mxu1 %v2960_v0 }
  0x90   : > { %851 = vmatmul.mubr.bf16.gmra.mxu0 %v2720_v2 }
  0x91   : > { %860 = vmatprep.mubr.bf16.mxu0 %v2722_v3 }
  0x92   : > { %1084 = vmatmul.mubr.bf16.gmra.mxu1 %v2733_v7 }
  0x93   : > { %1093 = vmatprep.mubr.bf16.mxu1 %v2960_v0 }
  0x98   : > { %861 = vmatmul.mubr.bf16.gmra.mxu0 %v2724_v5 }
  0x99   : > { %870 = vmatprep.mubr.bf16.mxu0 %v2726_v6 }
  0x9a   : > { %1094 = vmatmul.mubr.bf16.gmra.mxu1 %v2737_v10 }
  0x9b   : > { %1103 = vmatprep.mubr.bf16.mxu1 %v2960_v0 }
  0xa0   : > { %871 = vmatmul.mubr.bf16.gmra.mxu0 %v2728_v8 }
  0xa1   : > { %880 = vmatprep.mubr.bf16.mxu0 %v2730_v9 }
  0xa2   : > { %1104 = vmatmul.mubr.bf16.gmra.mxu1 %v2741_v13 }
  0xa3   : > { %1113 = vmatprep.mubr.bf16.mxu1 %v2960_v0 }
  0xa8   : > { %881 = vmatmul.mubr.bf16.gmra.mxu0 %v2732_v11 }
  0xa9   : > { %890 = vmatprep.mubr.bf16.mxu0 %v2734_v12 }
  0xaa   : > { %1114 = vmatmul.mubr.bf16.gmra.mxu1 %v2745_v16 }
  0xab   : > { %1123 = vmatprep.mubr.bf16.mxu1 %v2960_v0 }
  0xb0   : > { %891 = vmatmul.mubr.bf16.gmra.mxu0 %v2736_v14 }
  0xb1   : > { %900 = vmatprep.mubr.bf16.mxu0 %v2738_v15 }
  0xb2   : > { %1124 = vmatmul.mubr.bf16.gmra.mxu1 %v2749_v19 }
  0xb3   : > { %1133 = vmatprep.mubr.bf16.mxu1 %v2960_v0 }
  0xb8   : > { %901 = vmatmul.mubr.bf16.gmra.mxu0 %v2740_v17 }
  0xb9   : > { %910 = vmatprep.mubr.bf16.mxu0 %v2742_v18 }
  0xba   : > { %1134 = vmatmul.mubr.bf16.gmra.mxu1 %v2753_v22 }
  0xbb   : > { %1143 = vmatprep.mubr.bf16.mxu1 %v2960_v0 }
  0xc0   : > { %911 = vmatmul.mubr.bf16.gmra.mxu0 %v2744_v20 }
  0xc1   : > { %920 = vmatprep.mubr.bf16.mxu0 %v2746_v21 }
  0xc2   : > { %1144 = vmatmul.mubr.bf16.gmra.mxu1 %v2757_v25 }
  0xc3   : > { %1153 = vmatprep.mubr.bf16.mxu1 %v2960_v0 }
  0xc8   : > { %921 = vmatmul.mubr.bf16.gmra.mxu0 %v2748_v23 }
  0xc9   : > { %930 = vmatprep.mubr.bf16.mxu0 %v2750_v24 }
  0xca   : > { %1154 = vmatmul.mubr.bf16.gmra.mxu1 %v2761_v28 }
  0xd0   : > { %931 = vmatmul.mubr.bf16.gmra.mxu0 %v2752_v26 }
  0xd1   : > { %940 = vmatprep.mubr.bf16.mxu0 %v2754_v27 }
  0xd8   : > { %941 = vmatmul.mubr.bf16.gmra.mxu0 %v2756_v29 }
  0xd9   : > { %950 = vmatprep.mubr.bf16.mxu0 %v2758_v30 }
  0xe0   : > { %951 = vmatmul.mubr.bf16.gmra.mxu0 %v2760_v31 }
  0xe1   : > { %960 = vmatprep.mubr.bf16.mxu0 %v2762_v32 }
  0xe8   : > { %961 = vmatmul.mubr.bf16.gmra.mxu0 %v2764_v33 }
 0x112   : > { %v1005_v34 = vpop.f32.mrf.mxu1 }
 0x114   : > { %v1007_v35 = vpop.f32.mrf.mxu1 }
 0x116   : > { %v1009_v36 = vpop.f32.mrf.mxu1 }
 0x118   : > { %v1011_v0 = vpop.f32.mrf.mxu1 }
 0x11a   : > { %v1015_v37 = vpop.f32.mrf.mxu1 }
 0x11c   : > { %v1017_v38 = vpop.f32.mrf.mxu1 }
 0x11e   : > { %v1019_v39 = vpop.f32.mrf.mxu1 }
 0x120   : > { %v1021_v40 = vpop.f32.mrf.mxu1 }
 0x122   : > { %v1025_v41 = vpop.f32.mrf.mxu1 }
 0x124   : > { %v1027_v42 = vpop.f32.mrf.mxu1 }
 0x126   : > { %v1029_v43 = vpop.f32.mrf.mxu1 }
 0x128   : > { %v1031_v45 = vpop.f32.mrf.mxu1 }
 0x12a   : > { %v1035_v47 = vpop.f32.mrf.mxu1 }
 0x12c   : > { %v1037_v50 = vpop.f32.mrf.mxu1 }
 0x12e   : > { %v1039_v54 = vpop.f32.mrf.mxu1 }
 0x130   : > { %v812_v44 = vpop.f32.mrf.mxu0  ;;  %v1041_v58 = vpop.f32.mrf.mxu1 }
 0x131   : > { %v1006_v51 = vadd.f32 %v1005_v34, %v812_v44 }
 0x132   : > { %v814_v46 = vpop.f32.mrf.mxu0  ;;  %v1045_v61 = vpop.f32.mrf.mxu1 }
 0x133   : > { %v1008_v48 = vadd.f32 %v1007_v35, %v814_v46 }
 0x134   : > { %v816_v49 = vpop.f32.mrf.mxu0  ;;  %v1047_v1 = vpop.f32.mrf.mxu1 }
 0x135   : > { %v1010_v52 = vadd.f32 %v1009_v36, %v816_v49 }
 0x136   : > { %v818_v53 = vpop.f32.mrf.mxu0  ;;  %v1049_v5 = vpop.f32.mrf.mxu1 }
 0x137   : > { %v3269_v55 = vpack.c.bf16 %v1010_v52, %v1006_v51  ;;  %v1012_v56 = vadd.f32 %v1011_v0, %v818_v53 }
 0x138   : > { %v822_v57 = vpop.f32.mrf.mxu0  ;;  %v1051_v9 = vpop.f32.mrf.mxu1 }
 0x139   : > { %v3271_v59 = vpack.c.bf16 %v1012_v56, %v1008_v48  ;;  %1204 = vrot.lane.b32.xlu0 %v3269_v55, %s2961_s24  ;;  %v1016_v2 = vadd.f32 %v1015_v37, %v822_v57 }
 0x13a   : > { %v824_v60 = vpop.f32.mrf.mxu0  ;;  %v1055_v12 = vpop.f32.mrf.mxu1 }
 0x13b   : > { %v1018_v62 = vadd.f32 %v1017_v38, %v824_v60 }
 0x13c   : > { %v826_v63 = vpop.f32.mrf.mxu0  ;;  %v1057_v15 = vpop.f32.mrf.mxu1 }
 0x13d   : > { %v1020_v3 = vadd.f32 %v1019_v39, %v826_v63 }
 0x13e   : > { %v828_v4 = vpop.f32.mrf.mxu0  ;;  %v1059_v19 = vpop.f32.mrf.mxu1 }
 0x13f   : > { %v3275_v6 = vpack.c.bf16 %v1020_v3, %v1016_v2  ;;  %v1022_v7 = vadd.f32 %v1021_v40, %v828_v4 }
 0x140   : > { %v832_v8 = vpop.f32.mrf.mxu0  ;;  %v1061_v23 = vpop.f32.mrf.mxu1 }
 0x141   : > { %v3277_v10 = vpack.c.bf16 %v1022_v7, %v1018_v62  ;;  %1206 = vrot.lane.b32.xlu0 %v3275_v6, %s2961_s24  ;;  %v1026_v16 = vadd.f32 %v1025_v41, %v832_v8 }
 0x142   : > { %v834_v11 = vpop.f32.mrf.mxu0  ;;  %v1065_v26 = vpop.f32.mrf.mxu1 }
 0x143   : > { %v1028_v13 = vadd.f32 %v1027_v42, %v834_v11 }
 0x144   : > { %v836_v14 = vpop.f32.mrf.mxu0  ;;  %v1067_v29 = vpop.f32.mrf.mxu1 }
 0x145   : > { %v1030_v17 = vadd.f32 %v1029_v43, %v836_v14 }
 0x146   : > { %v838_v18 = vpop.f32.mrf.mxu0  ;;  %v1069_v33 = vpop.f32.mrf.mxu1 }
 0x147   : > { %v3281_v20 = vpack.c.bf16 %v1030_v17, %v1026_v16  ;;  %v1032_v21 = vadd.f32 %v1031_v45, %v838_v18 }
 0x148   : > { %v842_v22 = vpop.f32.mrf.mxu0  ;;  %v1071_v0 = vpop.f32.mrf.mxu1 }
 0x149   : > { %v3283_v24 = vpack.c.bf16 %v1032_v21, %v1028_v13  ;;  %1208 = vrot.lane.b32.xlu1 %v3281_v20, %s2961_s24  ;;  %v1036_v30 = vadd.f32 %v1035_v47, %v842_v22 }
 0x14a   : > { %v844_v25 = vpop.f32.mrf.mxu0  ;;  %v1075_v39 = vpop.f32.mrf.mxu1 }
 0x14b   : > { %v1038_v27 = vadd.f32 %v1037_v50, %v844_v25 }
 0x14c   : > { %v846_v28 = vpop.f32.mrf.mxu0  ;;  %v3293_v42 = vpop.f32.mrf.mxu1 }
 0x14d   : > { %v1040_v31 = vadd.f32 %v1039_v54, %v846_v28 }
 0x14e   : > { %v848_v32 = vpop.f32.mrf.mxu0  ;;  %v1079_v46 = vpop.f32.mrf.mxu1 }
 0x14f   : > { %v3287_v34 = vpack.c.bf16 %v1040_v31, %v1036_v30  ;;  %v1042_v35 = vadd.f32 %v1041_v58, %v848_v32 }
 0x150   : > { %v852_v36 = vpop.f32.mrf.mxu0  ;;  %v3297_v50 = vpop.f32.mrf.mxu1 }
 0x151   : > { %v3289_v37 = vpack.c.bf16 %v1042_v35, %v1038_v27  ;;  %1210 = vrot.lane.b32.xlu1 %v3287_v34, %s2961_s24  ;;  %v1046_v43 = vadd.f32 %v1045_v61, %v852_v36 }
 0x152   : > { %v854_v38 = vpop.f32.mrf.mxu0  ;;  %v1085_v53 = vpop.f32.mrf.mxu1 }
 0x153   : > { %v1048_v40 = vadd.f32 %v1047_v1, %v854_v38 }
 0x154   : > { %v856_v41 = vpop.f32.mrf.mxu0  ;;  %v1087_v57 = vpop.f32.mrf.mxu1 }
 0x155   : > { %v1050_v44 = vadd.f32 %v1049_v5, %v856_v41 }
 0x156   : > { %v858_v45 = vpop.f32.mrf.mxu0  ;;  %v1089_v62 = vpop.f32.mrf.mxu1 }
 0x157   : > { %v3295_v47 = vpack.c.bf16 %v1050_v44, %v1046_v43  ;;  %v1052_v48 = vadd.f32 %v1051_v9, %v858_v45 }
 0x158   : > { %v862_v49 = vpop.f32.mrf.mxu0  ;;  %v1091_v3 = vpop.f32.mrf.mxu1 }
 0x159   : > { %v3299_v51 = vpack.c.bf16 %v1052_v48, %v1048_v40  ;;  %1212 = vrot.lane.b32.xlu0 %v3295_v47, %s2961_s24  ;;  %v1056_v58 = vadd.f32 %v1055_v12, %v862_v49 }
 0x15a   : > { %v864_v52 = vpop.f32.mrf.mxu0  ;;  %v1095_v7 = vpop.f32.mrf.mxu1 }
 0x15b   : > { %v1058_v54 = vadd.f32 %v1057_v15, %v864_v52 }
 0x15c   : > { %v866_v56 = vpop.f32.mrf.mxu0  ;;  %v1097_v11 = vpop.f32.mrf.mxu1 }
 0x15d   : > { %v1060_v60 = vadd.f32 %v1059_v19, %v866_v56 }
 0x15e   : > { %v868_v61 = vpop.f32.mrf.mxu0  ;;  %v1099_v15 = vpop.f32.mrf.mxu1 }
 0x15f   : > { %v3303_v63 = vpack.c.bf16 %v1060_v60, %v1056_v58  ;;  %v1062_v1 = vadd.f32 %v1061_v23, %v868_v61 }
 0x160   : > { %v872_v2 = vpop.f32.mrf.mxu0  ;;  %v1101_v19 = vpop.f32.mrf.mxu1 }
 0x161   : > { %v3305_v4 = vpack.c.bf16 %v1062_v1, %v1058_v54  ;;  %1214 = vrot.lane.b32.xlu0 %v3303_v63, %s2961_s24  ;;  %v1066_v13 = vadd.f32 %v1065_v26, %v872_v2 }
 0x162   : > { %v874_v5 = vpop.f32.mrf.mxu0  ;;  %v1105_v23 = vpop.f32.mrf.mxu1 }
 0x163   : > { %v1068_v8 = vadd.f32 %v1067_v29, %v874_v5 }
 0x164   : > { %v876_v9 = vpop.f32.mrf.mxu0  ;;  %v1107_v27 = vpop.f32.mrf.mxu1 }
 0x165   : > { %v1070_v12 = vadd.f32 %v1069_v33, %v876_v9 }
 0x166   : > { %v878_v14 = vpop.f32.mrf.mxu0  ;;  %v1109_v26 = vpop.f32.mrf.mxu1 }
 0x167   : > { %v1176_v16 = vpack.c.bf16 %v1070_v12, %v1066_v13  ;;  %v1072_v17 = vadd.f32 %v1071_v0, %v878_v14 }
 0x168   : > { %v882_v18 = vpop.f32.mrf.mxu0  ;;  %v1111_v33 = vpop.f32.mrf.mxu1 }
 0x169   : > { %v3309_v21 = vpack.c.bf16 %v1072_v17, %v1068_v8  ;;  %1216 = vrot.lane.b32.xlu0 %v1176_v16, %s2961_s24  ;;  %v1076_v28 = vadd.f32 %v1075_v39, %v882_v18  ;;  %v1264_v56 = vsel %vm3977_vm0, %v1176_v16, 0 }
 0x16a   : > { %v3312_v22 = vpop.f32.mrf.mxu0  ;;  %v1115_v0 = vpop.f32.mrf.mxu1 }
 0x16c   : > { %v886_v25 = vpop.f32.mrf.mxu0  ;;  %v1117_v40 = vpop.f32.mrf.mxu1 }
 0x16d   : > { %v1080_v29 = vadd.f32 %v1079_v46, %v886_v25 }
 0x16e   : > { %v3314_v30 = vpop.f32.mrf.mxu0  ;;  %v1119_v45 = vpop.f32.mrf.mxu1 }
 0x16f   : > { %v1178_v31 = vpack.c.bf16 %v1080_v29, %v1076_v28 }
 0x170   : > { %v892_v32 = vpop.f32.mrf.mxu0  ;;  %v1121_v52 = vpop.f32.mrf.mxu1 }
 0x171   : > { %1218 = vrot.lane.b32.xlu0 %v1178_v31, %s2961_s24  ;;  %2567 = vmatprep.subr.msk.bf16.mxu1 %vm3977_vm0, %v1178_v31  ;;  %v1267_v35 = vsel %vm3977_vm0, %v1178_v31, 0  ;;  %v1086_v41 = vadd.f32 %v1085_v53, %v892_v32 }
 0x172   : > { %v894_v36 = vpop.f32.mrf.mxu0  ;;  %2424 = vmatpush3.bf16.xpose.msra.mxu1 %v1267_v35  ;;  %v1125_v58 = vpop.f32.mrf.mxu1 }
 0x173   : > { %v1088_v38 = vadd.f32 %v1087_v57, %v894_v36  ;;  %2568 = vmatprep.subr.msk.bf16.mxu1 %vm3977_vm0, %v1176_v16 }
 0x174   : > { %v896_v39 = vpop.f32.mrf.mxu0  ;;  %v1127_v61 = vpop.f32.mrf.mxu1 }
 0x175   : > { %v1090_v43 = vadd.f32 %v1089_v62, %v896_v39 }
 0x176   : > { %v898_v44 = vpop.f32.mrf.mxu0 }
 0x177   : > { %v3320_v46 = vpack.c.bf16 %v1090_v43, %v1086_v41  ;;  %v1092_v48 = vadd.f32 %v1091_v3, %v898_v44  ;;  %v1129_v3 = vpop.f32.mrf.mxu1 }
 0x178   : > { %v902_v49 = vpop.f32.mrf.mxu0 }
 0x179   : > { %v3322_v54 = vpack.c.bf16 %v1092_v48, %v1088_v38  ;;  %1374 = vrot.lane.b32.xlu1 %v3320_v46, %s2961_s24  ;;  %v1096_v62 = vadd.f32 %v1095_v7, %v902_v49  ;;  %v1131_v13 = vpop.f32.mrf.mxu1 }
 0x17a   : > { %v904_v57 = vpop.f32.mrf.mxu0  ;;  %2426 = vmatpush3.bf16.xpose.msra.mxu1 %v1264_v56 }
 0x17b   : > { %v1098_v60 = vadd.f32 %v1097_v11, %v904_v57  ;;  %2569 = vmatprep.subr.msk.bf16.mxu1 %vm3977_vm0, %v3303_v63  ;;  %v1261_v11 = vsel %vm3977_vm0, %v3303_v63, 0  ;;  %v1258_v63 = vsel %vm3977_vm0, %v3295_v47, 0 }
 0x17c   : > { %v906_v53 = vpop.f32.mrf.mxu0 }
 0x17d   : > { %v1100_v1 = vadd.f32 %v1099_v15, %v906_v53  ;;  %v1135_v15 = vpop.f32.mrf.mxu1 }
 0x17e   : > { %v908_v2 = vpop.f32.mrf.mxu0 }
 0x17f   : > { %v3329_v5 = vpack.c.bf16 %v1100_v1, %v1096_v62  ;;  %v1102_v8 = vadd.f32 %v1101_v19, %v908_v2  ;;  %v1137_v31 = vpop.f32.mrf.mxu1 }
 0x180   : > { %v912_v9 = vpop.f32.mrf.mxu0 }
 0x181   : > { %v3331_v12 = vpack.c.bf16 %v1102_v8, %v1098_v60  ;;  %1376 = vrot.lane.b32.xlu1 %v3329_v5, %s2961_s24  ;;  %v1106_v17 = vadd.f32 %v1105_v23, %v912_v9 }
 0x182   : > { %v914_v14 = vpop.f32.mrf.mxu0  ;;  %2428 = vmatpush3.bf16.xpose.msra.mxu1 %v1261_v11 }
 0x183   : > { %v1108_v16 = vadd.f32 %v1107_v27, %v914_v14  ;;  %2570 = vmatprep.subr.msk.bf16.mxu1 %vm3977_vm0, %v3295_v47  ;;  %v1255_v47 = vsel %vm3977_vm0, %v3287_v34, 0 }
 0x184   : > { %v916_v7 = vpop.f32.mrf.mxu0 }
 0x185   : > { %v1110_v18 = vadd.f32 %v1109_v26, %v916_v7  ;;  %v1139_v26 = vpop.f32.mrf.mxu1 }
 0x186   : > { %v918_v19 = vpop.f32.mrf.mxu0 }
 0x187   : > { %v3339_v25 = vpack.c.bf16 %v1110_v18, %v1106_v17  ;;  %v1112_v28 = vadd.f32 %v1111_v33, %v918_v19  ;;  %v1141_v44 = vpop.f32.mrf.mxu1 }
 0x188   : > { %v922_v29 = vpop.f32.mrf.mxu0 }
 0x189   : > { %v3341_v32 = vpack.c.bf16 %v1112_v28, %v1108_v16  ;;  %1378 = vrot.lane.b32.xlu1 %v3339_v25, %s2961_s24  ;;  %v1116_v36 = vadd.f32 %v1115_v0, %v922_v29 }
 0x18a   : > { %v924_v27 = vpop.f32.mrf.mxu0  ;;  %2430 = vmatpush3.bf16.xpose.msra.mxu1 %v1258_v63 }
 0x18b   : > { %v1118_v35 = vadd.f32 %v1117_v40, %v924_v27  ;;  %2571 = vmatprep.subr.msk.bf16.mxu1 %vm3977_vm0, %v3287_v34  ;;  %v1252_v34 = vsel %vm3977_vm0, %v3281_v20, 0 }
 0x18c   : > { %v926_v23 = vpop.f32.mrf.mxu0 }
 0x18d   : > { %v1120_v33 = vadd.f32 %v1119_v45, %v926_v23  ;;  %v1145_v45 = vpop.f32.mrf.mxu1  ;;  %v1078_v23 = vadd.f32 %v3293_v42, %v3312_v22 }
 0x18e   : > { %v928_v38 = vpop.f32.mrf.mxu0 }
 0x18f   : > { %v3349_v39 = vpack.c.bf16 %v1120_v33, %v1116_v36  ;;  %v1122_v41 = vadd.f32 %v1121_v52, %v928_v38  ;;  %v1147_v1 = vpop.f32.mrf.mxu1 }
 0x190   : > { %v932_v43 = vpop.f32.mrf.mxu0 }
 0x191   : > { %v3351_v48 = vpack.c.bf16 %v1122_v41, %v1118_v35  ;;  %1380 = vrot.lane.b32.xlu1 %v3349_v39, %s2961_s24  ;;  %v1126_v56 = vadd.f32 %v1125_v58, %v932_v43  ;;  %v1246_v43 = vsel %vm3977_vm0, %v3269_v55, 0 }
 0x192   : > { %v934_v40 = vpop.f32.mrf.mxu0  ;;  %2432 = vmatpush3.bf16.xpose.msra.mxu1 %v1255_v47 }
 0x193   : > { %v1128_v49 = vadd.f32 %v1127_v61, %v934_v40  ;;  %2572 = vmatprep.subr.msk.bf16.mxu1 %vm3977_vm0, %v3281_v20  ;;  %v1249_v20 = vsel %vm3977_vm0, %v3275_v6, 0 }
 0x194   : > { %v936_v0 = vpop.f32.mrf.mxu0 }
 0x195   : > { %v1130_v52 = vadd.f32 %v1129_v3, %v936_v0  ;;  %v1149_v3 = vpop.f32.mrf.mxu1 }
 0x196   : > { %v938_v57 = vpop.f32.mrf.mxu0 }
 0x197   : > { %v3359_v60 = vpack.c.bf16 %v1130_v52, %v1126_v56  ;;  %v1132_v53 = vadd.f32 %v1131_v13, %v938_v57  ;;  %v1151_v17 = vpop.f32.mrf.mxu1 }
 0x198   : > { %v942_v62 = vpop.f32.mrf.mxu0 }
 0x199   : > { %v3361_v2 = vpack.c.bf16 %v1132_v53, %v1128_v49  ;;  %1382 = vrot.lane.b32.xlu0 %v3359_v60, %s2961_s24  ;;  %v1136_v9 = vadd.f32 %v1135_v15, %v942_v62  ;;  %v1155_v15 = vpop.f32.mrf.mxu1 }
 0x19a   : > { %v944_v61 = vpop.f32.mrf.mxu0  ;;  %2434 = vmatpush3.bf16.xpose.msra.mxu1 %v1252_v34 }
 0x19b   : > { %v1138_v8 = vadd.f32 %v1137_v31, %v944_v61  ;;  %2573 = vmatprep.subr.msk.bf16.mxu1 %vm3977_vm0, %v3275_v6  ;;  %v1082_v31 = vadd.f32 %v3297_v50, %v3314_v30  ;;  %v1157_v6 = vpop.f32.mrf.mxu1 }
 0x19c   : > { %v946_v58 = vpop.f32.mrf.mxu0 }
 0x19d   : > { %v1140_v13 = vadd.f32 %v1139_v26, %v946_v58  ;;  %v1179_v38 = vpack.c.bf16 %v1082_v31, %v1078_v23  ;;  %v1159_v30 = vpop.f32.mrf.mxu1 }
 0x19e   : > { %v948_v11 = vpop.f32.mrf.mxu0 }
 0x19f   : > { %v1190_v14 = vpack.c.bf16 %v1140_v13, %v1136_v9  ;;  %v1142_v16 = vadd.f32 %v1141_v44, %v948_v11  ;;  %v1161_v52 = vpop.f32.mrf.mxu1  ;;  %v1535_v13 = vlaneseq }
 0x1a0   : > { %v952_v7 = vpop.f32.mrf.mxu0 }
 0x1a1   : > { %v3369_v18 = vpack.c.bf16 %v1142_v16, %v1138_v8  ;;  %1384 = vrot.lane.b32.xlu1 %v1190_v14, %s2961_s24  ;;  %v1146_v63 = vadd.f32 %v1145_v45, %v952_v7  ;;  %v1430_v56 = vsel %vm3977_vm0, %v1190_v14, 0  ;;  %v3461_v11 = vshrl.u32 %v1535_v13, 7 }
 0x1a2   : > { %v954_v19 = vpop.f32.mrf.mxu0  ;;  %2436 = vmatpush3.bf16.xpose.msra.mxu1 %v1249_v20  ;;  %v3466_v16 = vand.u32 127, %v1535_v13 }
 0x1a3   : > { %v1148_v28 = vadd.f32 %v1147_v1, %v954_v19  ;;  %2574 = vmatprep.subr.msk.bf16.mxu1 %vm3977_vm0, %v3269_v55  ;;  %v3512_v23 = vadd.s32 56, %v3461_v11 }
 0x1a4   : > { %v956_v29 = vpop.f32.mrf.mxu0  ;;  %vm1554_vm2 = vcmp.ge.s32.totalorder %v3461_v11, %v3466_v16 }
 0x1a5   : > { %v1150_v27 = vadd.f32 %v1149_v3, %v956_v29  ;;  %vm1561_vm6 = vcmp.ge.s32.totalorder %v3512_v23, %v3466_v16 }
 0x1a6   : > { %v958_v35 = vpop.f32.mrf.mxu0 }
 0x1a7   : > { %v1192_v26 = vpack.c.bf16 %v1150_v27, %v1146_v63  ;;  %v1152_v36 = vadd.f32 %v1151_v17, %v958_v35  ;;  %v3471_v17 = vadd.s32 8, %v3461_v11  ;;  %v3507_v35 = vadd.s32 48, %v3461_v11 }
 0x1a8   : > { %v962_v33 = vpop.f32.mrf.mxu0 }
 0x1a9   : > { %v3380_v41 = vpack.c.bf16 %v1152_v36, %v1148_v28  ;;  %1386 = vrot.lane.b32.xlu0 %v1192_v26, %s2961_s24  ;;  %v1156_v42 = vadd.f32 %v1155_v15, %v962_v33  ;;  %v1433_v55 = vsel %vm3977_vm0, %v1192_v26, 0  ;;  %v3482_v28 = vadd.s32 24, %v3461_v11 }
 0x1aa   : > { %v964_v44 = vpop.f32.mrf.mxu0  ;;  %2438 = vmatpush3.bf16.xpose.msra.mxu1 %v1246_v43  ;;  %vm1555_vm3 = vcmp.ge.s32.totalorder %v3471_v17, %v3466_v16  ;;  %vm1560_vm5 = vcmp.ge.s32.totalorder %v3507_v35, %v3466_v16 }
 0x1ab   : > { %v1205_v50 = vpop.permute.xlu0 %1204  ;;  %2487 = vmatprep.subr.bf16.mxu1 %v1179_v38  ;;  %vm1557_vm4 = vcmp.ge.s32.totalorder %v3482_v28, %v3466_v16 }
 0x1ac   : > { %v966_v47 = vpop.f32.mrf.mxu0  ;;  %2439 = vmatprep.mubr.msk.bf16.mxu1 %vm3977_vm0, %v1205_v50 }
 0x1ad   : > { %v1160_v22 = vadd.f32 %v1159_v30, %v966_v47 }
 0x1af   : > { %v1194_v40 = vpack.c.bf16 %v1160_v22, %v1156_v42  ;;  %v1546_v42 = vadd.s32 80, %v3461_v11  ;;  %v3553_v22 = vadd.s32 88, %v3461_v11 }
 0x1b1   : > { %1388 = vrot.lane.b32.xlu1 %v1194_v40, %s2961_s24  ;;  %2575 = vmatprep.subr.msk.bf16.mxu0 %vm3977_vm0, %v1194_v40  ;;  %v1436_v49 = vsel %vm3977_vm0, %v1194_v40, 0  ;;  %vm1564_vm9 = vcmp.ge.s32.totalorder %v1546_v42, %v3466_v16  ;;  %v3556_v40 = vadd.s32 64, %v3461_v11  ;;  %vm1565_vm10 = vcmp.ge.s32.totalorder %v3553_v22, %v3466_v16 }
 0x1b2   : > { %2456 = vmatpush3.bf16.xpose.msra.mxu0 %v1436_v49 }
 0x1b3   : > { %v1207_v0 = vpop.permute.xlu0 %1206  ;;  %2576 = vmatprep.subr.msk.bf16.mxu0 %vm3977_vm0, %v1192_v26  ;;  %v3515_v26 = vadd.s32 32, %v3461_v11  ;;  %vm1562_vm11 = vcmp.ge.s32.totalorder %v3556_v40, %v3466_v16 }
 0x1b4   : > { %2440 = vmatmul.mubr.msk.bf16.vlgmr.msra.gmra.mxu1 %vm3977_vm0, %v1207_v0 }
 0x1b5   : > { %2488 = vmatpush3.bf16.msra.mxu1 %v1179_v38  ;;  %vm1558_vm7 = vcmp.ge.s32.totalorder %v3515_v26, %v3466_v16  ;;  %v3528_v38 = vadd.s32 40, %v3461_v11 }
 0x1b6   : > { %2489 = vmatprep.subr.bf16.mxu1 %v3309_v21 }
 0x1b7   : > { %vm1559_vm8 = vcmp.ge.s32.totalorder %v3528_v38, %v3466_v16 }
 0x1b9   : > { %2490 = vmatpush3.bf16.msra.mxu1 %v3309_v21 }
 0x1ba   : > { %2491 = vmatprep.subr.bf16.mxu1 %v3305_v4  ;;  %2458 = vmatpush3.bf16.xpose.msra.mxu0 %v1433_v55 }
 0x1bb   : > { %v1209_v45 = vpop.permute.xlu1 %1208  ;;  %2577 = vmatprep.subr.msk.bf16.mxu0 %vm3977_vm0, %v1190_v14  ;;  %v3464_v14 = vadd.s32 16, %v3461_v11 }
 0x1bc   : > { %2443 = vmatprep.mubr.msk.bf16.mxu1 %vm3977_vm0, %v1209_v45  ;;  %v1545_v45 = vadd.s32 72, %v3461_v11 }
 0x1bd   : > { %2492 = vmatpush3.bf16.msra.mxu1 %v3305_v4  ;;  %v968_v4 = vpop.f32.mrf.mxu0  ;;  %vm1556_vm1 = vcmp.ge.s32.totalorder %v3464_v14, %v3466_v16 }
 0x1be   : > { %2493 = vmatprep.subr.bf16.mxu1 %v3299_v51  ;;  %v1162_v53 = vadd.f32 %v1161_v52, %v968_v4  ;;  %vm1563_vm12 = vcmp.ge.s32.totalorder %v1545_v45, %v3466_v16 }
 0x1c1   : > { %2494 = vmatpush3.bf16.msra.mxu1 %v3299_v51  ;;  %v1427_v51 = vsel %vm3977_vm0, %v3359_v60, 0 }
 0x1c2   : > { %2495 = vmatprep.subr.bf16.mxu1 %v3289_v37  ;;  %2460 = vmatpush3.bf16.xpose.msra.mxu0 %v1430_v56 }
 0x1c3   : > { %v1211_v21 = vpop.permute.xlu1 %1210  ;;  %2578 = vmatprep.subr.msk.bf16.mxu0 %vm3977_vm0, %v3359_v60  ;;  %v1424_v60 = vsel %vm3977_vm0, %v3349_v39, 0 }
 0x1c4   : > { %2444 = vmatmul.mubr.msk.bf16.gmra.mxu1 %vm3977_vm0, %v1211_v21 }
 0x1c5   : > { %2496 = vmatpush3.bf16.msra.mxu1 %v3289_v37  ;;  %v1158_v37 = vadd.f32 %v1157_v6, %v964_v44 }
 0x1c6   : > { %2497 = vmatprep.subr.bf16.mxu1 %v3283_v24 }
 0x1c9   : > { %2498 = vmatpush3.bf16.msra.mxu1 %v3283_v24  ;;  %v3416_v24 = vpack.c.bf16 %v1162_v53, %v1158_v37  ;;  %v3592_v53 = vadd.s32 120, %v3461_v11  ;;  %v1548_v37 = vadd.s32 96, %v3461_v11 }
 0x1ca   : > { %2499 = vmatprep.subr.bf16.mxu1 %v3277_v10  ;;  %2462 = vmatpush3.bf16.xpose.msra.mxu0 %v1427_v51 }
 0x1cb   : > { %v1213_v57 = vpop.permute.xlu0 %1212  ;;  %2579 = vmatprep.subr.msk.bf16.mxu0 %vm3977_vm0, %v3349_v39  ;;  %vm1569_vm14 = vcmp.ge.s32.totalorder %v3592_v53, %v3466_v16  ;;  %vm1566_vm15 = vcmp.ge.s32.totalorder %v1548_v37, %v3466_v16 }
 0x1cc   : > { %2447 = vmatprep.mubr.msk.bf16.mxu1 %vm3977_vm0, %v1213_v57  ;;  %v3587_v57 = vadd.s32 112, %v3461_v11 }
 0x1cd   : > { %2500 = vmatpush3.bf16.msra.mxu1 %v3277_v10  ;;  %v1421_v10 = vsel %vm3977_vm0, %v3339_v25, 0 }
 0x1ce   : > { %2501 = vmatprep.subr.bf16.mxu1 %v3271_v59  ;;  %vm1568_vm13 = vcmp.ge.s32.totalorder %v3587_v57, %v3466_v16 }
 0x1d1   : > { %2502 = vmatpush3.bf16.msra.mxu1 %v3271_v59  ;;  %v1418_v59 = vsel %vm3977_vm0, %v3329_v5, 0 }
 0x1d2   : > { %2551 = vmatprep.subr.bf16.mxu1 %v3416_v24  ;;  %2464 = vmatpush3.bf16.xpose.msra.mxu0 %v1424_v60 }
 0x1d3   : > { %v1215_v62 = vpop.permute.xlu0 %1214  ;;  %2580 = vmatprep.subr.msk.bf16.mxu0 %vm3977_vm0, %v3339_v25  ;;  %v1415_v25 = vsel %vm3977_vm0, %v3320_v46, 0 }
 0x1d4   : > { %2448 = vmatmul.mubr.msk.bf16.gmra.mxu1 %vm3977_vm0, %v1215_v62 }
 0x1da   : > { %2466 = vmatpush3.bf16.xpose.msra.mxu0 %v1421_v10 }
 0x1db   : > { %v1217_v1 = vpop.permute.xlu0 %1216  ;;  %2581 = vmatprep.subr.msk.bf16.mxu0 %vm3977_vm0, %v3329_v5 }
 0x1dc   : > { %2451 = vmatprep.mubr.msk.bf16.mxu1 %vm3977_vm0, %v1217_v1  ;;  %v1549_v1 = vadd.s32 104, %v3461_v11 }
 0x1e2   : > { %2468 = vmatpush3.bf16.xpose.msra.mxu0 %v1418_v59 }
 0x1e3   : > { %v1219_v39 = vpop.permute.xlu0 %1218  ;;  %2582 = vmatprep.subr.msk.bf16.mxu0 %vm3977_vm0, %v3320_v46 }
 0x1e4   : > { %2452 = vmatmul.mubr.msk.bf16.gmra.mxu1 %vm3977_vm0, %v1219_v39 }
 0x1ea   : > { %2470 = vmatpush3.bf16.xpose.msra.mxu0 %v1415_v25 }
 0x1eb   : > { %v1375_v34 = vpop.permute.xlu1 %1374  ;;  %2519 = vmatprep.subr.bf16.mxu0 %v3416_v24 }
 0x1ec   : > { %2471 = vmatprep.mubr.msk.bf16.mxu0 %vm3977_vm0, %v1375_v34 }
 0x1f3   : > { %v1377_v61 = vpop.permute.xlu1 %1376 }
 0x1f4   : > { %2472 = vmatmul.mubr.msk.bf16.vlgmr.msra.gmra.mxu0 %vm3977_vm0, %v1377_v61 }
 0x1f5   : > { %2520 = vmatpush3.bf16.msra.mxu0 %v3416_v24 }
 0x1f6   : > { %2521 = vmatprep.subr.bf16.mxu0 %v3380_v41 }
 0x1f9   : > { %2522 = vmatpush3.bf16.msra.mxu0 %v3380_v41 }
 0x1fa   : > { %2523 = vmatprep.subr.bf16.mxu0 %v3369_v18 }
 0x1fb   : > { %v1379_v5 = vpop.permute.xlu1 %1378 }
 0x1fc   : > { %2475 = vmatprep.mubr.msk.bf16.mxu0 %vm3977_vm0, %v1379_v5 }
 0x1fd   : > { %2524 = vmatpush3.bf16.msra.mxu0 %v3369_v18 }
 0x1fe   : > { %2525 = vmatprep.subr.bf16.mxu0 %v3361_v2 }
 0x201   : > { %2526 = vmatpush3.bf16.msra.mxu0 %v3361_v2 }
 0x202   : > { %2527 = vmatprep.subr.bf16.mxu0 %v3351_v48 }
 0x203   : > { %v1381_v46 = vpop.permute.xlu1 %1380 }
 0x204   : > { %2476 = vmatmul.mubr.msk.bf16.gmra.mxu0 %vm3977_vm0, %v1381_v46 }
 0x205   : > { %2528 = vmatpush3.bf16.msra.mxu0 %v3351_v48 }
 0x206   : > { %2529 = vmatprep.subr.bf16.mxu0 %v3341_v32 }
 0x209   : > { %2530 = vmatpush3.bf16.msra.mxu0 %v3341_v32 }
 0x20a   : > { %2531 = vmatprep.subr.bf16.mxu0 %v3331_v12 }
 0x20b   : > { %v1383_v8 = vpop.permute.xlu0 %1382 }
 0x20c   : > { %2479 = vmatprep.mubr.msk.bf16.mxu0 %vm3977_vm0, %v1383_v8 }
 0x20d   : > { %2532 = vmatpush3.bf16.msra.mxu0 %v3331_v12 }
 0x20e   : > { %2533 = vmatprep.subr.bf16.mxu0 %v3322_v54 }
 0x211   : > { %2534 = vmatpush3.bf16.msra.mxu0 %v3322_v54 }
 0x213   : > { %v1385_v58 = vpop.permute.xlu1 %1384 }
 0x214   : > { %2480 = vmatmul.mubr.msk.bf16.gmra.mxu0 %vm3977_vm0, %v1385_v58 }
 0x21b   : > { %v1387_v3 = vpop.permute.xlu0 %1386 }
 0x21c   : > { %2483 = vmatprep.mubr.msk.bf16.mxu0 %vm3977_vm0, %v1387_v3 }
 0x223   : > { %v1389_v9 = vpop.permute.xlu1 %1388 }
 0x224   : > { %2484 = vmatmul.mubr.msk.bf16.gmra.mxu0 %vm3977_vm0, %v1389_v9  ;;  %vm1567_vm0 = vcmp.ge.s32.totalorder %v1549_v1, %v3466_v16 }
 0x274   : > { %v2441_v7 = vpop.f32.mrf.mxu1 }
 0x275   : > { %v3476_v20 = vsel %vm1556_vm1, %v2441_v7, -1e+30 }
 0x276   : > { %v1303_v19 = vpop.f32.mrf.mxu1  ;;  %1638 = vmax.xlane.f32.xlu0 %v3476_v20 }
 0x277   : > { %v3489_v29 = vsel %vm1554_vm2, %v1303_v19, -1e+30 }
 0x278   : > { %v2442_v15 = vpop.f32.mrf.mxu1 }
 0x279   : > { %v3503_v27 = vsel %vm1557_vm4, %v2442_v15, -1e+30 }
 0x27a   : > { %v1306_v31 = vpop.f32.mrf.mxu1  ;;  %1634 = vmax.xlane.f32.xlu0 %v3489_v29 }
 0x27b   : > { %v3497_v63 = vsel %vm1555_vm3, %v1306_v31, -1e+30 }
 0x27c   : > { %1636 = vmax.xlane.f32.xlu1 %v3497_v63 }
 0x27e   : > { %1640 = vmax.xlane.f32.xlu0 %v3503_v27 }
 0x284   : > { %v2445_v36 = vpop.f32.mrf.mxu1 }
 0x285   : > { %v3520_v6 = vsel %vm1560_vm5, %v2445_v36, -1e+30 }
 0x286   : > { %v1319_v33 = vpop.f32.mrf.mxu1  ;;  %1646 = vmax.xlane.f32.xlu1 %v3520_v6 }
 0x287   : > { %v3538_v50 = vsel %vm1558_vm7, %v1319_v33, -1e+30 }
 0x288   : > { %v2446_v43 = vpop.f32.mrf.mxu1 }
 0x289   : > { %v3533_v44 = vsel %vm1561_vm6, %v2446_v43, -1e+30 }
 0x28a   : > { %v1322_v30 = vpop.f32.mrf.mxu1  ;;  %1648 = vmax.xlane.f32.xlu0 %v3533_v44  ;;  %1642 = vmax.xlane.f32.xlu1 %v3538_v50 }
 0x28b   : > { %v3547_v47 = vsel %vm1559_vm8, %v1322_v30, -1e+30 }
 0x28e   : > { %1644 = vmax.xlane.f32.xlu0 %v3547_v47 }
 0x294   : > { %v2449_v49 = vpop.f32.mrf.mxu1 }
 0x295   : > { %v3560_v0 = vsel %vm1564_vm9, %v2449_v49, -1e+30 }
 0x296   : > { %v1335_v55 = vpop.f32.mrf.mxu1  ;;  %1654 = vmax.xlane.f32.xlu1 %v3560_v0 }
 0x297   : > { %v3576_v4 = vsel %vm1562_vm11, %v1335_v55, -1e+30 }
 0x298   : > { %v2450_v56 = vpop.f32.mrf.mxu1 }
 0x299   : > { %v3571_v21 = vsel %vm1565_vm10, %v2450_v56, -1e+30 }
 0x29a   : > { %v1338_v51 = vpop.f32.mrf.mxu1  ;;  %1656 = vmax.xlane.f32.xlu0 %v3571_v21  ;;  %1650 = vmax.xlane.f32.xlu1 %v3576_v4 }
 0x29b   : > { %v3583_v52 = vsel %vm1563_vm12, %v1338_v51, -1e+30 }
 0x29e   : > { %1652 = vmax.xlane.f32.xlu0 %v3583_v52 }
 0x2a4   : > { %v2453_v60 = vpop.f32.mrf.mxu1 }
 0x2a5   : > { %v3598_v62 = vsel %vm1568_vm13, %v2453_v60, -1e+30 }
 0x2a6   : > { %v1351_v10 = vpop.f32.mrf.mxu1  ;;  %1662 = vmax.xlane.f32.xlu1 %v3598_v62 }
 0x2a7   : > { %v3612_v25 = vsel %vm1566_vm15, %v1351_v10, -1e+30 }
 0x2a8   : > { %v2454_v59 = vpop.f32.mrf.mxu1 }
 0x2a9   : > { %v3608_v39 = vsel %vm1569_vm14, %v2454_v59, -1e+30 }
 0x2aa   : > { %v1354_v34 = vpop.f32.mrf.mxu1  ;;  %1664 = vmax.xlane.f32.xlu0 %v3608_v39  ;;  %1658 = vmax.xlane.f32.xlu1 %v3612_v25 }
 0x2ab   : > { %v3619_v61 = vsel %vm1567_vm0, %v1354_v34, -1e+30 }
 0x2ae   : > { %1660 = vmax.xlane.f32.xlu0 %v3619_v61 }
 0x2b4   : > { %v2473_v5 = vpop.f32.mrf.mxu0 }
 0x2b5   : > { %v3625_v46 = vsel %vm1556_vm1, %v2473_v5, -1e+30 }
 0x2b6   : > { %1670 = vmax.xlane.f32.xlu1 %v3625_v46  ;;  %v1472_v8 = vpop.f32.mrf.mxu0 }
 0x2b7   : > { %v3631_v3 = vsel %vm1554_vm2, %v1472_v8, -1e+30 }
 0x2b8   : > { %v2474_v58 = vpop.f32.mrf.mxu0 }
 0x2b9   : > { %v3636_v9 = vsel %vm1557_vm4, %v2474_v58, -1e+30 }
 0x2ba   : > { %1666 = vmax.xlane.f32.xlu1 %v3631_v3  ;;  %1672 = vmax.xlane.f32.xlu0 %v3636_v9  ;;  %v1475_v13 = vpop.f32.mrf.mxu0 }
 0x2bb   : > { %v3643_v14 = vsel %vm1555_vm3, %v1475_v13, -1e+30 }
 0x2be   : > { %1668 = vmax.xlane.f32.xlu0 %v3643_v14 }
 0x2c4   : > { %v2477_v11 = vpop.f32.mrf.mxu0 }
 0x2c5   : > { %v3678_v42 = vsel %vm1560_vm5, %v2477_v11, -1e+30 }
 0x2c6   : > { %v1488_v7 = vpop.f32.mrf.mxu0 }
 0x2c7   : > { %v3649_v19 = vsel %vm1558_vm7, %v1488_v7, -1e+30 }
 0x2c8   : > { %1674 = vmax.xlane.f32.xlu1 %v3649_v19  ;;  %v2478_v28 = vpop.f32.mrf.mxu0 }
 0x2c9   : > { %v3689_v22 = vsel %vm1561_vm6, %v2478_v28, -1e+30 }
 0x2ca   : > { %v1491_v15 = vpop.f32.mrf.mxu0 }
 0x2cb   : > { %v3655_v31 = vsel %vm1559_vm8, %v1491_v15, -1e+30 }
 0x2cc   : > { %1676 = vmax.xlane.f32.xlu0 %v3655_v31 }
 0x2d4   : > { %v2481_v17 = vpop.f32.mrf.mxu0 }
 0x2d5   : > { %v3660_v36 = vsel %vm1564_vm9, %v2481_v17, -1e+30 }
 0x2d6   : > { %1686 = vmax.xlane.f32.xlu1 %v3660_v36  ;;  %v1504_v26 = vpop.f32.mrf.mxu0 }
 0x2d7   : > { %v3666_v43 = vsel %vm1562_vm11, %v1504_v26, -1e+30 }
 0x2d8   : > { %v2482_v33 = vpop.f32.mrf.mxu0 }
 0x2d9   : > { %v3671_v38 = vsel %vm1565_vm10, %v2482_v33, -1e+30 }
 0x2da   : > { %1682 = vmax.xlane.f32.xlu1 %v3666_v43  ;;  %1688 = vmax.xlane.f32.xlu0 %v3671_v38  ;;  %v1507_v30 = vpop.f32.mrf.mxu0 }
 0x2db   : > { %v3682_v40 = vsel %vm1563_vm12, %v1507_v30, -1e+30 }
 0x2de   : > { %1678 = vmax.xlane.f32.xlu1 %v3678_v42  ;;  %1684 = vmax.xlane.f32.xlu0 %v3682_v40 }
 0x2e2   : > { %1680 = vmax.xlane.f32.xlu0 %v3689_v22 }
 0x2e4   : > { %v2485_v49 = vpop.f32.mrf.mxu0 }
 0x2e5   : > { %v3700_v51 = vsel %vm1568_vm13, %v2485_v49, -1e+30 }
 0x2e6   : > { %v1520_v55 = vpop.f32.mrf.mxu0 }
 0x2e7   : > { %v3694_v35 = vsel %vm1566_vm15, %v1520_v55, -1e+30 }
 0x2e8   : > { %1690 = vmax.xlane.f32.xlu1 %v3694_v35  ;;  %v2486_v45 = vpop.f32.mrf.mxu0 }
 0x2e9   : > { %v3711_v37 = vsel %vm1569_vm14, %v2486_v45, -1e+30 }
 0x2ea   : > { %v1523_v56 = vpop.f32.mrf.mxu0 }
 0x2eb   : > { %v3704_v23 = vsel %vm1567_vm0, %v1523_v56, -1e+30  ;;  %vm3982_vm0 = vcmask 523264  }
 0x2ec   : > { %1694 = vmax.xlane.f32.xlu1 %v3700_v51  ;;  %1692 = vmax.xlane.f32.xlu0 %v3704_v23  ;;  %vm3983_vm1 = vmmov %vm3982_vm0 }
 0x2ed   : > { %vm3984_vm2 = vmmov %vm3982_vm0 }
 0x2ee   : > { %vm3985_vm3 = vmmov %vm3982_vm0 }
 0x2ef   : > { %vm3986_vm4 = vmmov %vm3982_vm0 }
 0x2f0   : > { %1696 = vmax.xlane.f32.xlu0 %v3711_v37  ;;  %vm3987_vm5 = vmmov %vm3982_vm0 }
 0x2f1   : > { %vm3988_vm6 = vmmov %vm3982_vm0 }
 0x2f2   : > { %vm3989_vm7 = vmmov %vm3982_vm0 }
 0x2f3   : > { %vm3990_vm8 = vmmov %vm3982_vm0 }
 0x2f4   : > { %vm3991_vm9 = vmmov %vm3982_vm0 }
 0x2f5   : > { %vm3992_vm10 = vmmov %vm3982_vm0 }
 0x2f6   : > { %vm3993_vm11 = vmmov %vm3982_vm0 }
 0x2f7   : > { %vm3994_vm12 = vmmov %vm3982_vm0 }
 0x2f8   : > { %vm3995_vm13 = vmmov %vm3982_vm0 }
 0x2f9   : > { %vm3996_vm14 = vmmov %vm3982_vm0 }
 0x2fa   : > { %vm3997_vm15 = vmmov %vm3982_vm0 }
 0x2ff   : > { %v1639_v60 = vpop.xlane.xlu0 %1638 }
 0x300   : > { %v1700_v57 = vsub.f32 %v3476_v20, %v1639_v60 }
 0x302   : > { %v1734_v10 = vmul.f32 1.442695, %v1700_v57 }
 0x303   : > { %v1635_v59 = vpop.xlane.xlu0 %1634 }
 0x304   : > { %2765 = vpow2.f32 %v1734_v10  ;;  %v1698_v1 = vsub.f32 %v3489_v29, %v1635_v59 }
 0x305   : > { %v1637_v34 = vpop.xlane.xlu1 %1636 }
 0x306   : > { %v1730_v5 = vmul.f32 1.442695, %v1698_v1  ;;  %v1699_v58 = vsub.f32 %v3497_v63, %v1637_v34 }
 0x307   : > { %v1641_v8 = vpop.xlane.xlu0 %1640 }
 0x308   : > { %2767 = vpow2.f32 %v1730_v5  ;;  %v1701_v16 = vsub.f32 %v3503_v27, %v1641_v8  ;;  %v1732_v13 = vmul.f32 1.442695, %v1699_v58 }
 0x30a   : > { %v1736_v53 = vmul.f32 1.442695, %v1701_v16 }
 0x30c   : > { %2769 = vpow2.f32 %v1736_v53 }
 0x30d   : > { %2771 = vpow2.f32 %v1732_v13 }
 0x30f   : > { %v1647_v11 = vpop.xlane.xlu1 %1646 }
 0x310   : > { %v1704_v20 = vsub.f32 %v3520_v6, %v1647_v11 }
 0x311   : > { %v3719_v7 = vpop.eup %2765 }
 0x312   : > { %v1742_v28 = vmul.f32 1.442695, %v1704_v20  ;;  %1798 = vadd.xlane.f32.xlu1 %v3719_v7 }
 0x313   : > { %v1649_v29 = vpop.xlane.xlu0 %1648  ;;  %v1643_v15 = vpop.xlane.xlu1 %1642 }
 0x314   : > { %2773 = vpow2.f32 %v1742_v28  ;;  %v1705_v17 = vsub.f32 %v3533_v44, %v1649_v29  ;;  %v1702_v63 = vsub.f32 %v3538_v50, %v1643_v15 }
 0x315   : > { %v3724_v27 = vpop.eup %2767 }
 0x316   : > { %v1744_v26 = vmul.f32 1.442695, %v1705_v17  ;;  %v1738_v33 = vmul.f32 1.442695, %v1702_v63  ;;  %1794 = vadd.xlane.f32.xlu1 %v3724_v27 }
 0x317   : > { %v1645_v30 = vpop.xlane.xlu0 %1644 }
 0x318   : > { %2775 = vpow2.f32 %v1744_v26  ;;  %v1703_v6 = vsub.f32 %v3547_v47, %v1645_v30 }
 0x319   : > { %v3728_v49 = vpop.eup %2769  ;;  %2777 = vpow2.f32 %v1738_v33 }
 0x31a   : > { %v1740_v55 = vmul.f32 1.442695, %v1703_v6  ;;  %1800 = vadd.xlane.f32.xlu0 %v3728_v49  ;;  %v3731_v44 = vpop.eup %2771 }
 0x31c   : > { %2779 = vpow2.f32 %v1740_v55 }
 0x31e   : > { %1796 = vadd.xlane.f32.xlu0 %v3731_v44 }
 0x31f   : > { %v1655_v50 = vpop.xlane.xlu1 %1654 }
 0x320   : > { %v1708_v45 = vsub.f32 %v3560_v0, %v1655_v50 }
 0x321   : > { %v3735_v56 = vpop.eup %2773 }
 0x322   : > { %v1750_v60 = vmul.f32 1.442695, %v1708_v45  ;;  %1806 = vadd.xlane.f32.xlu1 %v3735_v56 }
 0x323   : > { %v1657_v47 = vpop.xlane.xlu0 %1656  ;;  %v1651_v57 = vpop.xlane.xlu1 %1650 }
 0x324   : > { %2781 = vpow2.f32 %v1750_v60  ;;  %v1709_v10 = vsub.f32 %v3571_v21, %v1657_v47  ;;  %v1706_v59 = vsub.f32 %v3576_v4, %v1651_v57 }
 0x325   : > { %v3740_v1 = vpop.eup %2775 }
 0x326   : > { %v3742_v34 = vpop.eup %2777  ;;  %v1752_v5 = vmul.f32 1.442695, %v1709_v10  ;;  %v1746_v8 = vmul.f32 1.442695, %v1706_v59  ;;  %1808 = vadd.xlane.f32.xlu0 %v3740_v1 }
 0x327   : > { %1802 = vadd.xlane.f32.xlu1 %v3742_v34  ;;  %v1653_v0 = vpop.xlane.xlu0 %1652 }
 0x328   : > { %2783 = vpow2.f32 %v1752_v5  ;;  %v1707_v58 = vsub.f32 %v3583_v52, %v1653_v0 }
 0x329   : > { %v3747_v16 = vpop.eup %2779  ;;  %2785 = vpow2.f32 %v1746_v8 }
 0x32a   : > { %v1748_v21 = vmul.f32 1.442695, %v1707_v58  ;;  %1804 = vadd.xlane.f32.xlu0 %v3747_v16 }
 0x32c   : > { %2787 = vpow2.f32 %v1748_v21 }
 0x32f   : > { %v1663_v4 = vpop.xlane.xlu1 %1662 }
 0x330   : > { %v1712_v53 = vsub.f32 %v3598_v62, %v1663_v4 }
 0x331   : > { %v3751_v13 = vpop.eup %2781 }
 0x332   : > { %v1758_v11 = vmul.f32 1.442695, %v1712_v53  ;;  %1814 = vadd.xlane.f32.xlu1 %v3751_v13 }
 0x333   : > { %v1665_v20 = vpop.xlane.xlu0 %1664  ;;  %v1659_v28 = vpop.xlane.xlu1 %1658 }
 0x334   : > { %2789 = vpow2.f32 %v1758_v11  ;;  %v1713_v52 = vsub.f32 %v3608_v39, %v1665_v20  ;;  %v1710_v29 = vsub.f32 %v3612_v25, %v1659_v28 }
 0x335   : > { %v3756_v15 = vpop.eup %2783 }
 0x336   : > { %v3758_v17 = vpop.eup %2785  ;;  %v1760_v63 = vmul.f32 1.442695, %v1713_v52  ;;  %v1754_v26 = vmul.f32 1.442695, %v1710_v29  ;;  %1816 = vadd.xlane.f32.xlu0 %v3756_v15 }
 0x337   : > { %1810 = vadd.xlane.f32.xlu1 %v3758_v17  ;;  %v1661_v62 = vpop.xlane.xlu0 %1660 }
 0x338   : > { %2791 = vpow2.f32 %v1760_v63  ;;  %v1711_v33 = vsub.f32 %v3619_v61, %v1661_v62 }
 0x339   : > { %v3763_v30 = vpop.eup %2787  ;;  %2793 = vpow2.f32 %v1754_v26 }
 0x33a   : > { %v1756_v39 = vmul.f32 1.442695, %v1711_v33  ;;  %1812 = vadd.xlane.f32.xlu0 %v3763_v30 }
 0x33c   : > { %2795 = vpow2.f32 %v1756_v39 }
 0x33f   : > { %v1671_v25 = vpop.xlane.xlu1 %1670 }
 0x340   : > { %v1716_v6 = vsub.f32 %v3625_v46, %v1671_v25 }
 0x341   : > { %v3767_v55 = vpop.eup %2789 }
 0x342   : > { %v1766_v50 = vmul.f32 1.442695, %v1716_v6  ;;  %1822 = vadd.xlane.f32.xlu1 %v3767_v55 }
 0x343   : > { %v1667_v45 = vpop.xlane.xlu1 %1666  ;;  %v1673_v60 = vpop.xlane.xlu0 %1672 }
 0x344   : > { %2797 = vpow2.f32 %v1766_v50  ;;  %v1714_v61 = vsub.f32 %v3631_v3, %v1667_v45  ;;  %v1717_v47 = vsub.f32 %v3636_v9, %v1673_v60 }
 0x345   : > { %v3772_v57 = vpop.eup %2791 }
 0x346   : > { %v3774_v10 = vpop.eup %2793  ;;  %v1762_v59 = vmul.f32 1.442695, %v1714_v61  ;;  %v1768_v5 = vmul.f32 1.442695, %v1717_v47  ;;  %1824 = vadd.xlane.f32.xlu0 %v3772_v57 }
 0x347   : > { %1818 = vadd.xlane.f32.xlu1 %v3774_v10  ;;  %v1669_v46 = vpop.xlane.xlu0 %1668 }
 0x348   : > { %2799 = vpow2.f32 %v1762_v59  ;;  %v1715_v8 = vsub.f32 %v3643_v14, %v1669_v46 }
 0x349   : > { %v3779_v0 = vpop.eup %2795  ;;  %2801 = vpow2.f32 %v1768_v5 }
 0x34a   : > { %v1764_v3 = vmul.f32 1.442695, %v1715_v8  ;;  %1820 = vadd.xlane.f32.xlu0 %v3779_v0 }
 0x34c   : > { %2803 = vpow2.f32 %v1764_v3 }
 0x351   : > { %v3782_v9 = vpop.eup %2797  ;;  %v1675_v58 = vpop.xlane.xlu1 %1674 }
 0x352   : > { %v1718_v21 = vsub.f32 %v3649_v19, %v1675_v58  ;;  %1830 = vadd.xlane.f32.xlu1 %v3782_v9 }
 0x354   : > { %v1770_v4 = vmul.f32 1.442695, %v1718_v21 }
 0x355   : > { %v3786_v53 = vpop.eup %2799  ;;  %v1677_v11 = vpop.xlane.xlu0 %1676 }
 0x356   : > { %v3788_v20 = vpop.eup %2801  ;;  %2805 = vpow2.f32 %v1770_v4  ;;  %v1719_v14 = vsub.f32 %v3655_v31, %v1677_v11  ;;  %1826 = vadd.xlane.f32.xlu1 %v3786_v53 }
 0x357   : > { %1832 = vadd.xlane.f32.xlu0 %v3788_v20 }
 0x358   : > { %v1772_v28 = vmul.f32 1.442695, %v1719_v14 }
 0x359   : > { %v3793_v52 = vpop.eup %2803 }
 0x35a   : > { %2807 = vpow2.f32 %v1772_v28 }
 0x35b   : > { %1828 = vadd.xlane.f32.xlu0 %v3793_v52 }
 0x35f   : > { %v1687_v19 = vpop.xlane.xlu1 %1686 }
 0x360   : > { %v1724_v29 = vsub.f32 %v3660_v36, %v1687_v19 }
 0x362   : > { %v1782_v63 = vmul.f32 1.442695, %v1724_v29 }
 0x363   : > { %v3797_v26 = vpop.eup %2805  ;;  %v1683_v62 = vpop.xlane.xlu1 %1682 }
 0x364   : > { %v1689_v33 = vpop.xlane.xlu0 %1688  ;;  %2809 = vpow2.f32 %v1782_v63  ;;  %v1722_v31 = vsub.f32 %v3666_v43, %v1683_v62  ;;  %1834 = vadd.xlane.f32.xlu1 %v3797_v26 }
 0x365   : > { %v1725_v39 = vsub.f32 %v3671_v38, %v1689_v33 }
 0x366   : > { %v1778_v25 = vmul.f32 1.442695, %v1722_v31 }
 0x367   : > { %v1784_v6 = vmul.f32 1.442695, %v1725_v39  ;;  %v3802_v50 = vpop.eup %2807  ;;  %v1679_v45 = vpop.xlane.xlu1 %1678 }
 0x368   : > { %v1685_v60 = vpop.xlane.xlu0 %1684  ;;  %2811 = vpow2.f32 %v1778_v25  ;;  %v1720_v36 = vsub.f32 %v3678_v42, %v1679_v45  ;;  %1836 = vadd.xlane.f32.xlu0 %v3802_v50 }
 0x369   : > { %v1723_v61 = vsub.f32 %v3682_v40, %v1685_v60  ;;  %2813 = vpow2.f32 %v1784_v6 }
 0x36a   : > { %v1774_v47 = vmul.f32 1.442695, %v1720_v36 }
 0x36b   : > { %v1780_v43 = vmul.f32 1.442695, %v1723_v61 }
 0x36c   : > { %v1681_v59 = vpop.xlane.xlu0 %1680  ;;  %2815 = vpow2.f32 %v1774_v47 }
 0x36d   : > { %v1721_v38 = vsub.f32 %v3689_v22, %v1681_v59  ;;  %2817 = vpow2.f32 %v1780_v43 }
 0x36f   : > { %v1776_v5 = vmul.f32 1.442695, %v1721_v38 }
 0x371   : > { %2819 = vpow2.f32 %v1776_v5  ;;  %v3808_v46 = vpop.eup %2809  ;;  %v1691_v8 = vpop.xlane.xlu1 %1690 }
 0x372   : > { %v1726_v3 = vsub.f32 %v3694_v35, %v1691_v8  ;;  %1846 = vadd.xlane.f32.xlu1 %v3808_v46 }
 0x374   : > { %v1786_v42 = vmul.f32 1.442695, %v1726_v3 }
 0x375   : > { %v3812_v40 = vpop.eup %2811  ;;  %v1695_v58 = vpop.xlane.xlu1 %1694 }
 0x376   : > { %v1693_v21 = vpop.xlane.xlu0 %1692  ;;  %v3814_v4 = vpop.eup %2813  ;;  %2821 = vpow2.f32 %v1786_v42  ;;  %v1728_v22 = vsub.f32 %v3700_v51, %v1695_v58  ;;  %1842 = vadd.xlane.f32.xlu1 %v3812_v40 }
 0x377   : > { %v1727_v11 = vsub.f32 %v3704_v23, %v1693_v21  ;;  %1848 = vadd.xlane.f32.xlu0 %v3814_v4 }
 0x378   : > { %v1790_v14 = vmul.f32 1.442695, %v1728_v22 }
 0x379   : > { %v1788_v35 = vmul.f32 1.442695, %v1727_v11  ;;  %v3820_v28 = vpop.eup %2815 }
 0x37a   : > { %v1697_v19 = vpop.xlane.xlu0 %1696  ;;  %v3822_v29 = vpop.eup %2817  ;;  %2823 = vpow2.f32 %v1790_v14  ;;  %1838 = vadd.xlane.f32.xlu1 %v3820_v28 }
 0x37b   : > { %v1729_v63 = vsub.f32 %v3711_v37, %v1697_v19  ;;  %2825 = vpow2.f32 %v1788_v35  ;;  %1844 = vadd.xlane.f32.xlu0 %v3822_v29 }
 0x37d   : > { %v1792_v51 = vmul.f32 1.442695, %v1729_v63 }
 0x37e   : > { %v3827_v23 = vpop.eup %2819 }
 0x37f   : > { %2827 = vpow2.f32 %v1792_v51  ;;  %1840 = vadd.xlane.f32.xlu0 %v3827_v23 }
 0x383   : > { %v3830_v62 = vpop.eup %2821 }
 0x384   : > { %1850 = vadd.xlane.f32.xlu1 %v3830_v62 }
 0x387   : > { %v3833_v33 = vpop.eup %2823 }
 0x388   : > { %v3835_v31 = vpop.eup %2825  ;;  %1854 = vadd.xlane.f32.xlu1 %v3833_v33 }
 0x389   : > { %1852 = vadd.xlane.f32.xlu0 %v3835_v31 }
 0x38c   : > { %v3839_v37 = vpop.eup %2827 }
 0x38d   : > { %1856 = vadd.xlane.f32.xlu0 %v3839_v37 }
 0x39b   : > { %v1799_v39 = vpop.xlane.xlu1 %1798 }
 0x39f   : > { %v1795_v25 = vpop.xlane.xlu1 %1794 }
 0x3a3   : > { %v1801_v6 = vpop.xlane.xlu0 %1800 }
 0x3a4   : > { %2829 = vrcp.f32 %v1801_v6 }
 0x3a5   : > { %2831 = vrcp.f32 %v1795_v25 }
 0x3a6   : > { %2833 = vrcp.f32 %v1799_v39 }
 0x3a7   : > { %v1797_v45 = vpop.xlane.xlu0 %1796 }
 0x3a8   : > { %2835 = vrcp.f32 %v1797_v45 }
 0x3ab   : > { %v1807_v60 = vpop.xlane.xlu1 %1806 }
 0x3af   : > { %v1809_v36 = vpop.xlane.xlu0 %1808 }
 0x3b0   : > { %v1803_v61 = vpop.xlane.xlu1 %1802  ;;  %2837 = vrcp.f32 %v1809_v36 }
 0x3b1   : > { %v2830_v47 = vpop.eup %2829  ;;  %2839 = vrcp.f32 %v1803_v61 }
 0x3b2   : > { %v2832_v43 = vpop.eup %2831  ;;  %2841 = vrcp.f32 %v1807_v60  ;;  %v1893_v8 = vmul.f32 %v2830_v47, %v3728_v49 }
 0x3b3   : > { %v1805_v59 = vpop.xlane.xlu0 %1804  ;;  %v2834_v38 = vpop.eup %2833  ;;  %v1890_v3 = vmul.f32 %v2832_v43, %v3724_v27 }
 0x3b4   : > { %2843 = vrcp.f32 %v1805_v59  ;;  %v1892_v58 = vmul.f32 %v2834_v38, %v3719_v7 }
 0x3b5   : > { %v2836_v5 = vpop.eup %2835 }
 0x3b6   : > { %v1891_v42 = vmul.f32 %v2836_v5, %v3731_v44  ;;  %v1923_v22 = vpack.c.bf16 %v1893_v8, %v1892_v58 }
 0x3b8   : > { %v1922_v21 = vpack.c.bf16 %v1891_v42, %v1890_v3 }
 0x3ba   : > { %2503 = vmatprep.mubr.bf16.mxu1 %v1922_v21 }
 0x3bb   : > { %v1815_v11 = vpop.xlane.xlu1 %1814  ;;  %2504 = vmatmul.mubr.bf16.vlgmr.msra.gmra.mxu1 %v1923_v22 }
 0x3bc   : > { %2559 = vmatpush3.bf16.msra.mxu1 %v3416_v24 }
 0x3bd   : > { %2552 = vmatprep.subr.bf16.mxu1 %v3380_v41  ;;  %v2838_v14 = vpop.eup %2837 }
 0x3be   : > { %v2840_v35 = vpop.eup %2839  ;;  %v1897_v7 = vmul.f32 %v2838_v14, %v3740_v1 }
 0x3bf   : > { %v1817_v19 = vpop.xlane.xlu0 %1816  ;;  %v2842_v63 = vpop.eup %2841  ;;  %v1894_v44 = vmul.f32 %v2840_v35, %v3742_v34 }
 0x3c0   : > { %v1811_v49 = vpop.xlane.xlu1 %1810  ;;  %2560 = vmatpush3.bf16.msra.mxu1 %v3380_v41  ;;  %2845 = vrcp.f32 %v1817_v19  ;;  %v1896_v39 = vmul.f32 %v2842_v63, %v3735_v56 }
 0x3c1   : > { %v2844_v27 = vpop.eup %2843  ;;  %2553 = vmatprep.subr.bf16.mxu1 %v3369_v18  ;;  %2847 = vrcp.f32 %v1811_v49 }
 0x3c2   : > { %v1895_v24 = vmul.f32 %v2844_v27, %v3747_v16  ;;  %2849 = vrcp.f32 %v1815_v11  ;;  %v1925_v41 = vpack.c.bf16 %v1897_v7, %v1896_v39 }
 0x3c3   : > { %v1813_v51 = vpop.xlane.xlu0 %1812 }
 0x3c4   : > { %2851 = vrcp.f32 %v1813_v51  ;;  %2561 = vmatpush3.bf16.msra.mxu1 %v3369_v18  ;;  %v1924_v25 = vpack.c.bf16 %v1895_v24, %v1894_v44 }
 0x3c5   : > { %2554 = vmatprep.subr.bf16.mxu1 %v3361_v2 }
 0x3c6   : > { %2507 = vmatprep.mubr.bf16.mxu1 %v1924_v25 }
 0x3c7   : > { %2508 = vmatmul.mubr.bf16.gmra.mxu1 %v1925_v41 }
 0x3c8   : > { %2562 = vmatpush3.bf16.msra.mxu1 %v3361_v2 }
 0x3c9   : > { %2555 = vmatprep.subr.bf16.mxu1 %v3351_v48 }
 0x3cb   : > { %v1823_v1 = vpop.xlane.xlu1 %1822 }
 0x3cc   : > { %2563 = vmatpush3.bf16.msra.mxu1 %v3351_v48 }
 0x3cd   : > { %2556 = vmatprep.subr.bf16.mxu1 %v3341_v32  ;;  %v2846_v34 = vpop.eup %2845 }
 0x3ce   : > { %v2848_v56 = vpop.eup %2847  ;;  %v1901_v2 = vmul.f32 %v2846_v34, %v3756_v15 }
 0x3cf   : > { %v1825_v16 = vpop.xlane.xlu0 %1824  ;;  %v2850_v6 = vpop.eup %2849  ;;  %v1898_v60 = vmul.f32 %v2848_v56, %v3758_v17 }
 0x3d0   : > { %v1819_v18 = vpop.xlane.xlu1 %1818  ;;  %2564 = vmatpush3.bf16.msra.mxu1 %v3341_v32  ;;  %2853 = vrcp.f32 %v1825_v16  ;;  %v1900_v61 = vmul.f32 %v2850_v6, %v3751_v13 }
 0x3d1   : > { %v2852_v45 = vpop.eup %2851  ;;  %2557 = vmatprep.subr.bf16.mxu1 %v3331_v12  ;;  %2855 = vrcp.f32 %v1819_v18 }
 0x3d2   : > { %v1899_v48 = vmul.f32 %v2852_v45, %v3763_v30  ;;  %2857 = vrcp.f32 %v1823_v1  ;;  %v1927_v32 = vpack.c.bf16 %v1901_v2, %v1900_v61 }
 0x3d3   : > { %v1821_v36 = vpop.xlane.xlu0 %1820 }
 0x3d4   : > { %2859 = vrcp.f32 %v1821_v36  ;;  %2565 = vmatpush3.bf16.msra.mxu1 %v3331_v12  ;;  %v1926_v47 = vpack.c.bf16 %v1899_v48, %v1898_v60 }
 0x3d5   : > { %2558 = vmatprep.subr.bf16.mxu1 %v3322_v54 }
 0x3d6   : > { %2511 = vmatprep.mubr.bf16.mxu1 %v1926_v47 }
 0x3d7   : > { %2512 = vmatmul.mubr.bf16.gmra.mxu1 %v1927_v32 }
 0x3d8   : > { %2566 = vmatpush3.bf16.msra.mxu1 %v3322_v54 }
 0x3db   : > { %v1831_v15 = vpop.xlane.xlu1 %1830 }
 0x3dd   : > { %v2854_v43 = vpop.eup %2853 }
 0x3de   : > { %v2856_v17 = vpop.eup %2855  ;;  %v1905_v13 = vmul.f32 %v2854_v43, %v3772_v57 }
 0x3df   : > { %v2858_v59 = vpop.eup %2857  ;;  %v1827_v30 = vpop.xlane.xlu1 %1826  ;;  %v1902_v12 = vmul.f32 %v2856_v17, %v3774_v10 }
 0x3e0   : > { %v1833_v38 = vpop.xlane.xlu0 %1832  ;;  %v1904_v3 = vmul.f32 %v2858_v59, %v3767_v55 }
 0x3e1   : > { %v2860_v5 = vpop.eup %2859  ;;  %2861 = vrcp.f32 %v1833_v38 }
 0x3e2   : > { %v1903_v8 = vmul.f32 %v2860_v5, %v3779_v0  ;;  %2863 = vrcp.f32 %v1827_v30  ;;  %v1929_v58 = vpack.c.bf16 %v1905_v13, %v1904_v3 }
 0x3e3   : > { %2865 = vrcp.f32 %v1831_v15 }
 0x3e4   : > { %v1829_v42 = vpop.xlane.xlu0 %1828  ;;  %v1928_v54 = vpack.c.bf16 %v1903_v8, %v1902_v12 }
 0x3e5   : > { %2867 = vrcp.f32 %v1829_v42 }
 0x3e6   : > { %2515 = vmatprep.mubr.bf16.mxu1 %v1928_v54 }
 0x3e7   : > { %2516 = vmatmul.mubr.bf16.gmra.mxu1 %v1929_v58 }
 0x3ed   : > { %v1835_v21 = vpop.xlane.xlu1 %1834 }
 0x3ee   : > { %v2862_v22 = vpop.eup %2861  ;;  %2869 = vrcp.f32 %v1835_v21 }
 0x3ef   : > { %v2864_v11 = vpop.eup %2863  ;;  %v1909_v10 = vmul.f32 %v2862_v22, %v3788_v20 }
 0x3f0   : > { %v2866_v57 = vpop.eup %2865  ;;  %v1906_v0 = vmul.f32 %v2864_v11, %v3786_v53 }
 0x3f1   : > { %v1837_v14 = vpop.xlane.xlu0 %1836  ;;  %v1908_v19 = vmul.f32 %v2866_v57, %v3782_v9 }
 0x3f2   : > { %v2868_v35 = vpop.eup %2867  ;;  %2871 = vrcp.f32 %v1837_v14 }
 0x3f3   : > { %v1907_v55 = vmul.f32 %v2868_v35, %v3793_v52  ;;  %v1931_v49 = vpack.c.bf16 %v1909_v10, %v1908_v19 }
 0x3f5   : > { %v1930_v63 = vpack.c.bf16 %v1907_v55, %v1906_v0 }
 0x3f7   : > { %2535 = vmatprep.mubr.bf16.mxu0 %v1930_v63 }
 0x3f8   : > { %2536 = vmatmul.mubr.bf16.vlgmr.msra.gmra.mxu0 %v1931_v49 }
 0x3fb   : > { %v1847_v27 = vpop.xlane.xlu1 %1846  ;;  %v2870_v7 = vpop.eup %2869 }
 0x3fc   : > { %v1910_v39 = vmul.f32 %v2870_v7, %v3797_v26 }
 0x3ff   : > { %v2872_v44 = vpop.eup %2871  ;;  %v1843_v24 = vpop.xlane.xlu1 %1842 }
 0x400   : > { %v1849_v51 = vpop.xlane.xlu0 %1848  ;;  %v1911_v25 = vmul.f32 %v2872_v44, %v3802_v50 }
 0x401   : > { %2873 = vrcp.f32 %v1849_v51 }
 0x402   : > { %v1932_v20 = vpack.c.bf16 %v1911_v25, %v1910_v39  ;;  %2875 = vrcp.f32 %v1843_v24 }
 0x403   : > { %2877 = vrcp.f32 %v1847_v27  ;;  %v1839_v53 = vpop.xlane.xlu1 %1838 }
 0x404   : > { %v1845_v52 = vpop.xlane.xlu0 %1844  ;;  %2539 = vmatprep.mubr.bf16.mxu0 %v1932_v20 }
 0x405   : > { %2879 = vrcp.f32 %v1845_v52 }
 0x406   : > { %2881 = vrcp.f32 %v1839_v53 }
 0x408   : > { %v1841_v9 = vpop.xlane.xlu0 %1840 }
 0x409   : > { %2883 = vrcp.f32 %v1841_v9 }
 0x40d   : > { %v1851_v41 = vpop.xlane.xlu1 %1850 }
 0x40e   : > { %v2874_v1 = vpop.eup %2873  ;;  %2885 = vrcp.f32 %v1851_v41 }
 0x40f   : > { %v2876_v34 = vpop.eup %2875  ;;  %v1917_v50 = vmul.f32 %v2874_v1, %v3814_v4 }
 0x410   : > { %v2878_v56 = vpop.eup %2877  ;;  %v1914_v18 = vmul.f32 %v2876_v34, %v3812_v40 }
 0x411   : > { %v1855_v26 = vpop.xlane.xlu1 %1854  ;;  %v1916_v60 = vmul.f32 %v2878_v56, %v3808_v46 }
 0x412   : > { %v2880_v16 = vpop.eup %2879  ;;  %v1853_v6 = vpop.xlane.xlu0 %1852 }
 0x413   : > { %2887 = vrcp.f32 %v1853_v6  ;;  %v1915_v45 = vmul.f32 %v2880_v16, %v3822_v29  ;;  %v2882_v2 = vpop.eup %2881  ;;  %v1935_v47 = vpack.c.bf16 %v1917_v50, %v1916_v60 }
 0x414   : > { %2889 = vrcp.f32 %v1855_v26  ;;  %v1912_v32 = vmul.f32 %v2882_v2, %v3820_v28 }
 0x415   : > { %v1934_v48 = vpack.c.bf16 %v1915_v45, %v1914_v18 }
 0x416   : > { %v2884_v36 = vpop.eup %2883  ;;  %v1857_v61 = vpop.xlane.xlu0 %1856 }
 0x417   : > { %2891 = vrcp.f32 %v1857_v61  ;;  %2543 = vmatprep.mubr.bf16.mxu1 %v1934_v48  ;;  %v1913_v15 = vmul.f32 %v2884_v36, %v3827_v23 }
 0x418   : > { %2544 = vmatmul.mubr.bf16.vlgmr.msra.gmra.mxu1 %v1935_v47 }
 0x419   : > { %v1933_v4 = vpack.c.bf16 %v1913_v15, %v1912_v32 }
 0x41b   : > { %2540 = vmatmul.mubr.bf16.gmra.mxu0 %v1933_v4  ;;  %v2886_v40 = vpop.eup %2885 }
 0x41c   : > { %v1918_v43 = vmul.f32 %v2886_v40, %v3830_v62 }
 0x420   : > { %v2888_v29 = vpop.eup %2887 }
 0x421   : > { %v1919_v46 = vmul.f32 %v2888_v29, %v3835_v31  ;;  %v2890_v17 = vpop.eup %2889 }
 0x422   : > { %v1920_v38 = vmul.f32 %v2890_v17, %v3833_v33 }
 0x423   : > { %v1936_v59 = vpack.c.bf16 %v1919_v46, %v1918_v43 }
 0x424   : > { %v2892_v30 = vpop.eup %2891 }
 0x425   : > { %2547 = vmatprep.mubr.bf16.mxu1 %v1936_v59  ;;  %v1921_v28 = vmul.f32 %v2892_v30, %v3839_v37 }
 0x427   : > { %v1937_v5 = vpack.c.bf16 %v1921_v28, %v1920_v38 }
 0x429   : > { %2548 = vmatmul.mubr.bf16.gmra.mxu1 %v1937_v5 }
 0x47b   : > { %v2505_v23 = vpop.f32.mrf.mxu1 }
 0x47c   : > { %2134 = vst.msk [vmem:[%s3894_s16 + $0x10] sm:$0xff] %vm3982_vm0, %v2505_v23 }
 0x47d   : > { %v1972_v62 = vpop.f32.mrf.mxu1 }
 0x47e   : > { %2132 = vst.msk [vmem:[%s3894_s16] sm:$0xff] %vm3983_vm1, %v1972_v62  ;;  %vm3998_vm1 = vmmov %vm3982_vm0 }
 0x47f   : > { %v2506_v33 = vpop.f32.mrf.mxu1 }
 0x480   : > { %2135 = vst.msk [vmem:[%s3894_s16 + $0x18] sm:$0xff] %vm3984_vm2, %v2506_v33  ;;  %vm3999_vm2 = vmmov %vm3982_vm0 }
 0x481   : > { %v1975_v31 = vpop.f32.mrf.mxu1 }
 0x482   : > { %2133 = vst.msk [vmem:[%s3894_s16 + $0x8] sm:$0xff] %vm3985_vm3, %v1975_v31  ;;  %vm4000_vm3 = vmmov %vm3982_vm0 }
 0x487   : > { %v2509_v37 = vpop.f32.mrf.mxu1 }
 0x488   : > { %2138 = vst.msk [vmem:[%s3894_s16 + $0x30] sm:$0xff] %vm3986_vm4, %v2509_v37  ;;  %vm4001_vm4 = vmmov %vm3982_vm0 }
 0x489   : > { %v1988_v13 = vpop.f32.mrf.mxu1 }
 0x48a   : > { %2136 = vst.msk [vmem:[%s3894_s16 + $0x20] sm:$0xff] %vm3987_vm5, %v1988_v13  ;;  %vm4002_vm5 = vmmov %vm3982_vm0 }
 0x48b   : > { %v2510_v12 = vpop.f32.mrf.mxu1 }
 0x48c   : > { %2139 = vst.msk [vmem:[%s3894_s16 + $0x38] sm:$0xff] %vm3988_vm6, %v2510_v12  ;;  %vm4003_vm6 = vmmov %vm3982_vm0 }
 0x48d   : > { %v1991_v8 = vpop.f32.mrf.mxu1 }
 0x48e   : > { %2137 = vst.msk [vmem:[%s3894_s16 + $0x28] sm:$0xff] %vm3989_vm7, %v1991_v8  ;;  %vm4004_vm7 = vmmov %vm3982_vm0 }
 0x497   : > { %v2513_v3 = vpop.f32.mrf.mxu1 }
 0x498   : > { %2142 = vst.msk [vmem:[%s3894_s16 + $0x50] sm:$0xff] %vm3990_vm8, %v2513_v3  ;;  %vm4005_vm8 = vmmov %vm3982_vm0 }
 0x499   : > { %v2004_v42 = vpop.f32.mrf.mxu1 }
 0x49a   : > { %2140 = vst.msk [vmem:[%s3894_s16 + $0x40] sm:$0xff] %vm3991_vm9, %v2004_v42  ;;  %vm4006_vm9 = vmmov %vm3982_vm0 }
 0x49b   : > { %v2514_v54 = vpop.f32.mrf.mxu1 }
 0x49c   : > { %2143 = vst.msk [vmem:[%s3894_s16 + $0x58] sm:$0xff] %vm3992_vm10, %v2514_v54  ;;  %vm4007_vm10 = vmmov %vm3982_vm0 }
 0x49d   : > { %v2007_v58 = vpop.f32.mrf.mxu1 }
 0x49e   : > { %2141 = vst.msk [vmem:[%s3894_s16 + $0x48] sm:$0xff] %vm3993_vm11, %v2007_v58  ;;  %vm4008_vm11 = vmmov %vm3982_vm0 }
 0x4a7   : > { %v2517_v21 = vpop.f32.mrf.mxu1 }
 0x4a8   : > { %2146 = vst.msk [vmem:[%s3894_s16 + $0x70] sm:$0xff] %vm3994_vm12, %v2517_v21  ;;  %vm4009_vm12 = vmmov %vm3982_vm0 }
 0x4a9   : > { %v2020_v22 = vpop.f32.mrf.mxu1 }
 0x4aa   : > { %2144 = vst.msk [vmem:[%s3894_s16 + $0x60] sm:$0xff] %vm3995_vm13, %v2020_v22  ;;  %vm4010_vm13 = vmmov %vm3982_vm0 }
 0x4ab   : > { %v2518_v11 = vpop.f32.mrf.mxu1 }
 0x4ac   : > { %2147 = vst.msk [vmem:[%s3894_s16 + $0x78] sm:$0xff] %vm3996_vm14, %v2518_v11  ;;  %vm4011_vm14 = vmmov %vm3982_vm0 }
 0x4ad   : > { %v2023_v57 = vpop.f32.mrf.mxu1 }
 0x4ae   : > { %2145 = vst.msk [vmem:[%s3894_s16 + $0x68] sm:$0xff] %vm3997_vm15, %v2023_v57  ;;  %vm4012_vm15 = vmmov %vm3982_vm0 }
 0x4b8   : > { %v2537_v14 = vpop.f32.mrf.mxu0 }
 0x4b9   : > { %2150 = vst.msk [vmem:[%s3894_s16 + $0x90] sm:$0xff] %vm3982_vm0, %v2537_v14 }
 0x4ba   : > { %v2069_v35 = vpop.f32.mrf.mxu0 }
 0x4bb   : > { %2148 = vst.msk [vmem:[%s3894_s16 + $0x80] sm:$0xff] %vm3998_vm1, %v2069_v35 }
 0x4bc   : > { %v2538_v10 = vpop.f32.mrf.mxu0 }
 0x4bd   : > { %2151 = vst.msk [vmem:[%s3894_s16 + $0x98] sm:$0xff] %vm3999_vm2, %v2538_v10 }
 0x4be   : > { %v2072_v0 = vpop.f32.mrf.mxu0 }
 0x4bf   : > { %2149 = vst.msk [vmem:[%s3894_s16 + $0x88] sm:$0xff] %vm4000_vm3, %v2072_v0 }
 0x4d8   : > { %v2545_v55 = vpop.f32.mrf.mxu1 }
 0x4d9   : > { %2158 = vst.msk [vmem:[%s3894_s16 + $0xd0] sm:$0xff] %vm4001_vm4, %v2545_v55 }
 0x4da   : > { %v2101_v19 = vpop.f32.mrf.mxu1 }
 0x4db   : > { %2156 = vst.msk [vmem:[%s3894_s16 + $0xc0] sm:$0xff] %vm4002_vm5, %v2101_v19  ;;  %v2541_v63 = vpop.f32.mrf.mxu0 }
 0x4dc   : > { %2154 = vst.msk [vmem:[%s3894_s16 + $0xb0] sm:$0xff] %vm4003_vm6, %v2541_v63  ;;  %v2546_v49 = vpop.f32.mrf.mxu1 }
 0x4dd   : > { %2159 = vst.msk [vmem:[%s3894_s16 + $0xd8] sm:$0xff] %vm4004_vm7, %v2546_v49  ;;  %v2085_v27 = vpop.f32.mrf.mxu0 }
 0x4de   : > { %2152 = vst.msk [vmem:[%s3894_s16 + $0xa0] sm:$0xff] %vm4005_vm8, %v2085_v27  ;;  %v2104_v7 = vpop.f32.mrf.mxu1 }
 0x4df   : > { %2157 = vst.msk [vmem:[%s3894_s16 + $0xc8] sm:$0xff] %vm4006_vm9, %v2104_v7  ;;  %v2542_v44 = vpop.f32.mrf.mxu0 }
 0x4e0   : > { %2155 = vst.msk [vmem:[%s3894_s16 + $0xb8] sm:$0xff] %vm4007_vm10, %v2542_v44 }
 0x4e1   : > { %v2088_v24 = vpop.f32.mrf.mxu0 }
 0x4e2   : > { %2153 = vst.msk [vmem:[%s3894_s16 + $0xa8] sm:$0xff] %vm4008_vm11, %v2088_v24 }
 0x4e9   : > { %v2549_v51 = vpop.f32.mrf.mxu1 }
 0x4ea   : > { %2162 = vst.msk [vmem:[%s3894_s16 + $0xf0] sm:$0xff] %vm4009_vm12, %v2549_v51 }
 0x4eb   : > { %v2117_v39 = vpop.f32.mrf.mxu1 }
 0x4ec   : > { %2160 = vst.msk [vmem:[%s3894_s16 + $0xe0] sm:$0xff] %vm4010_vm13, %v2117_v39 }
 0x4ed   : > { %v2550_v25 = vpop.f32.mrf.mxu1 }
 0x4ee   : > { %2163 = vst.msk [vmem:[%s3894_s16 + $0xf8] sm:$0xff] %vm4011_vm14, %v2550_v25 }
 0x4ef   : > { %v2120_v20 = vpop.f32.mrf.mxu1 }
 0x4f0   : > { %2161 = vst.msk [vmem:[%s3894_s16 + $0xe8] sm:$0xff] %vm4012_vm15, %v2120_v20 }
 0x4f1 PF: > { %p12_p9 = scmp.ge.s32.totalorder %s2997_s14, 6   ;;  %s4013_s9 = smov %s2947_s10 }
 0x4f2   : > { %s4014_s10 = smov %s2951_s11  ;;  %s4015_s11 = smov %s3007_s17 }
 0x4f3   : > { %s4016_s12 = smov %s2997_s14  ;;  %14 = sbr.rel (!%p12_p9) target bundleno = 3 (0x3), region = 68 }
 0x4f8   :  { %2188 = vsyncpa [#allocation3], 1 }
 0x4f9   :  { %2190 = vsyncpa [#allocation3 + $0x1], 1 }

// kernel: tpu_custom_call.1
= control target key start
LH: loop header
LB: loop body
LE: loop exit
PB: predicated region body
PF: predicated region fallthrough
CT: control target
= control target key end

     0   :  { %7 = vsyncpa [#allocation3], 0  ;;  %s3973_s0 = inlined_call_operand.hbm [shape: bf16[8,128,384], index: 0, kind: input, shape index: {}]   ;;  %s3974_s1 = inlined_call_operand.vmem [shape: bf16[384,192], index: 1, kind: input, shape index: {}]   ;;  %s3975_s2 = inlined_call_operand.vmem [shape: f32[8,128,64], index: 2, kind: output, shape index: {}]  }
   0x1   :  { %9 = vsyncpa [#allocation3 + $0x1], 0  ;;  %s2977_s9 = smov 0   ;;  %s2979_s10 = smov 0  }
   0x2   :  { %s2981_s11 = smov 0   ;;  %s2983_s12 = smov 0  }
   0x3 LB: > { %s2233_s13 = sadd.s32 4294967295, %s2955_s12   ;;  %s2997_s14 = sadd.s32 1, %s2955_s12   ;;  %s2955_s12 = sphi %s2983_s12, %s4016_s12   ;;  %s2951_s11 = sphi %s2981_s11, %s4015_s11   ;;  %s2947_s10 = sphi %s2979_s10, %s4014_s10   ;;  %s2943_s9 = sphi %s2977_s9, %s4013_s9  }
   0x4   : > { %s19_s15 = ssub.s32 %s2955_s12, %s2997_s14  ;;  %s22_s16 = sadd.s32 1, %s2951_s11 }
   0x5   : > { %p20_p0 = scmp.eq.s32.totalorder %s19_s15, 0  ;;  %p29_p1 = scmp.ne.s32.totalorder %s2951_s11, %s2947_s10 }
   0x6   : > { %p30_p2 = scmp.eq.s32.totalorder %s2955_s12, 0  ;;  %p35_p3 = scmp.ne.s32.totalorder %s2947_s10, %s2943_s9 }
   0x7   : > { %s3007_s17 = scalar_select %p20_p0, %s2951_s11, %s22_s16  }
   0x8   : > { %p31_p4 = por %p30_p2, %p29_p1  ;;  %p36_p5 = scmp.eq.s32.totalorder %s2233_s13, 0 }
   0x9   : > { %p2592_p6 = scmp.lt.s32.totalorder %s2955_s12, 4  ;;  %s109_s19 = sand.u32 1, %s2951_s11  }
   0xa   : > { %p3012_p7 = por %p36_p5, %p35_p3  ;;  %s2583_s20 = smul.u32 384, %s109_s19 }
   0xb   : > { %s2584_s21 = smul.u32 6144, %s2955_s12  ;;  %p3018_p8 = pnand %p2592_p6, %p31_p4 }
   0xc   : > { %s3978_s18 = scalar_select %p3012_p7, 1, 0 }
   0xd   : > { %s3025_s25 = scalar_lea.hbm %s3973_s0, %s2584_s21  ;;  %s113_s26 = scalar_lea.vmem [#allocation2], %s2583_s20 }
   0xe   : > { %s121_s27 = sshll.u32 %s113_s26, 4  ;;  %s3030_s28 = scalar_lea.sflag [#allocation3], %s109_s19  ;;  %s3027_s27 = int_to_ptr.vmem [resolvable:$true] %s121_s27 }
   0xf   : > { %s2893_s29 = scalar_lea.hbm %s3025_s25, 6144  ;;  %p2895_p11 = pneg %p3018_p8 }
  0x10   : > { %p2894_p10 = scmp.ne.s32.totalorder %s3025_s25, %s2893_s29  ;;  %s2898_s4 = scalar_lea.hbm %s3973_s0, 24576 }
  0x11   : > { %p2899_p0 = scmp.lt.s32.totalorder %s3025_s25, %s3973_s0  ;;  %p2900_p1 = scmp.lt.s32.totalorder %s2898_s4, %s2893_s29 }
  0x12   : > { %p2896_p12 = pnand %p2895_p11, %p2894_p10 }
  0x13   : > { %p2901_p2 = por %p2900_p1, %p2899_p0 }
  0x14   : > { %p2897_p13 = pneg %p2896_p12 }
  0x16   : > { %p2902_p3 = pnand %p2901_p2, %p2897_p13 }
  0x18   : > { %2905 = shalt.err (!%p2902_p3)
}
  0x19   : > { %s2906_s7 = scalar_lea.vmem %s3027_s27, 6144  ;;  %s2957_s8 = smov [#allocation2]  }
  0x1a   : > { %p2907_p4 = scmp.ne.s32.totalorder %s3027_s27, %s2906_s7  ;;  %s2911_s9 = sshll.u32 %s2957_s8, 4  ;;  %s2912_s9 = int_to_ptr.vmem [resolvable:$false] %s2911_s9 }
  0x1b   : > { %s2913_s15 = scalar_lea.vmem %s2912_s9, 12288  ;;  %p2914_p10 = scmp.lt.s32.totalorder %s3027_s27, %s2912_s9 }
  0x1c   : > { %p2909_p5 = pnand %p2907_p4, %p2895_p11  ;;  %p2915_p12 = scmp.lt.s32.totalorder %s2913_s15, %s2906_s7 }
  0x1e   : > { %p2910_p6 = pneg %p2909_p5  ;;  %p2916_p9 = por %p2915_p12, %p2914_p10 }
  0x20   : > { %p2917_p7 = pnand %p2916_p9, %p2910_p6 }
  0x22   : > { %2920 = shalt.err (!%p2917_p7)
}
  0x23   : > { %s2958_s16 = smov 192   ;;  %s2959_s19 = smov 12  }
  0x24   : > { %2591 = dma.hbm_to_vmem [thread:$0]  (!%p3018_p8), %s3025_s25, 6144, %s3027_s27, %s3030_s28, %s2958_s16, %s2958_s16, %s2959_s19  }
  0x25   : > { %p129_p11 = scmp.lt.s32.totalorder %s2955_s12, 5  ;;  %p3980_p13 = scmp.ge.s32.totalorder %s2955_s12, 1 }
  0x27   : > { %p130_p0 = pnand %p3980_p13, %p129_p11 }
  0x28   : > { %s135_s20 = sand.u32 (!%p130_p0), 1, %s2947_s10   ;;  %p3981_p7 = scmp.ne.s32.totalorder (!%p130_p0), %s3978_s18, 0 }
  0x29   : > { %133 = sbr.rel (%p130_p0) target bundleno = 1265 (0x4f1), region = 28  ;;  %s136_s23 = scalar_lea.sflag (!%p130_p0), [#allocation3], %s135_s20 }
  0x2a   : > { %s2585_s21 = smul.u32 (!%p130_p0), 384, %s135_s20 }
  0x2c   : > { %s3055_s24 = scalar_lea.vmem (!%p130_p0), [#allocation2], %s2585_s21 }
  0x2e   : > { %2938 = dma.done.wait (%p3981_p7), %s136_s23, 6144  }
  0x2f   : > { %2940 = vsyncadd (%p3981_p7), %s136_s23, 4294961152  ;;  %v2960_v0 = vmov 0   ;;  %v2629_v1 = vld [vmem:[%s3974_s1 + $0x74] ss:$8 sps:$4 sm:$0xff]   ;;  %v2631_v2 = vld [vmem:[%s3974_s1 + $0x70] ss:$8 sps:$4 sm:$0xff]  }
  0x30   : > { %1003 = vmatprep.mubr.bf16.mxu1 %v2960_v0  ;;  %778 = vmatprep.subr.bf16.mxu0 %v2629_v1  ;;  %v2632_v3 = vld [vmem:[%s3974_s1 + $0x64] ss:$8 sps:$4 sm:$0xff]   ;;  %v2634_v4 = vld [vmem:[%s3974_s1 + $0x60] ss:$8 sps:$4 sm:$0xff]   ;;  %v2635_v5 = vld [vmem:[%s3974_s1 + $0x54] ss:$8 sps:$4 sm:$0xff]  }
  0x31   : > { %779 = vmatpush1.bf16.msra.mxu0 %v2631_v2  ;;  %v2637_v6 = vld [vmem:[%s3974_s1 + $0x50] ss:$8 sps:$4 sm:$0xff]   ;;  %v2638_v7 = vld [vmem:[%s3974_s1 + $0x44] ss:$8 sps:$4 sm:$0xff]   ;;  %v2650_v8 = vld [vmem:[%s3974_s1 + $0x174] ss:$8 sps:$4 sm:$0xff]  }
  0x32   : > { %780 = vmatprep.subr.bf16.mxu0 %v2632_v3  ;;  %v2652_v9 = vld [vmem:[%s3974_s1 + $0x170] ss:$8 sps:$4 sm:$0xff]   ;;  %v2640_v10 = vld [vmem:[%s3974_s1 + $0x40] ss:$8 sps:$4 sm:$0xff]   ;;  %v2641_v11 = vld [vmem:[%s3974_s1 + $0x34] ss:$8 sps:$4 sm:$0xff]   ;;  %971 = vmatprep.subr.bf16.mxu1 %v2650_v8 }
  0x33   : > { %v2656_v12 = vld [vmem:[%s3974_s1 + $0x164] ss:$8 sps:$4 sm:$0xff]   ;;  %972 = vmatpush1.bf16.msra.mxu1 %v2652_v9  ;;  %v2658_v13 = vld [vmem:[%s3974_s1 + $0x160] ss:$8 sps:$4 sm:$0xff]   ;;  %v2643_v14 = vld [vmem:[%s3974_s1 + $0x30] ss:$8 sps:$4 sm:$0xff]  }
  0x34   : > { %973 = vmatprep.subr.bf16.mxu1 %v2656_v12  ;;  %v2662_v15 = vld [vmem:[%s3974_s1 + $0x154] ss:$8 sps:$4 sm:$0xff]   ;;  %v2644_v16 = vld [vmem:[%s3974_s1 + $0x24] ss:$8 sps:$4 sm:$0xff]   ;;  %v2664_v17 = vld [vmem:[%s3974_s1 + $0x150] ss:$8 sps:$4 sm:$0xff]  }
  0x35   : > { %781 = vmatpush1.bf16.msra.mxu0 %v2634_v4  ;;  %v2668_v18 = vld [vmem:[%s3974_s1 + $0x144] ss:$8 sps:$4 sm:$0xff]   ;;  %v2646_v19 = vld [vmem:[%s3974_s1 + $0x20] ss:$8 sps:$4 sm:$0xff]   ;;  %v2647_v20 = vld [vmem:[%s3974_s1 + $0x14] ss:$8 sps:$4 sm:$0xff]  }
  0x36   : > { %782 = vmatprep.subr.bf16.mxu0 %v2635_v5  ;;  %v2670_v21 = vld [vmem:[%s3974_s1 + $0x140] ss:$8 sps:$4 sm:$0xff]   ;;  %v2674_v22 = vld [vmem:[%s3974_s1 + $0x134] ss:$8 sps:$4 sm:$0xff]   ;;  %v2649_v23 = vld [vmem:[%s3974_s1 + $0x10] ss:$8 sps:$4 sm:$0xff]  }
  0x37   : > { %974 = vmatpush1.bf16.msra.mxu1 %v2658_v13  ;;  %v2653_v24 = vld [vmem:[%s3974_s1 + $0x4] ss:$8 sps:$4 sm:$0xff]   ;;  %v2676_v25 = vld [vmem:[%s3974_s1 + $0x130] ss:$8 sps:$4 sm:$0xff]   ;;  %v2655_v27 = vld [vmem:[%s3974_s1] ss:$8 sps:$4 sm:$0xff]  }
  0x38   : > { %975 = vmatprep.subr.bf16.mxu1 %v2662_v15  ;;  %v2680_v26 = vld [vmem:[%s3974_s1 + $0x124] ss:$8 sps:$4 sm:$0xff]   ;;  %v2659_v28 = vld [vmem:[%s3974_s1 + $0xf4] ss:$8 sps:$4 sm:$0xff]   ;;  %v2682_v29 = vld [vmem:[%s3974_s1 + $0x120] ss:$8 sps:$4 sm:$0xff]  }
  0x39   : > { %783 = vmatpush1.bf16.msra.mxu0 %v2637_v6  ;;  %v2686_v30 = vld [vmem:[%s3974_s1 + $0x114] ss:$8 sps:$4 sm:$0xff]   ;;  %v2661_v31 = vld [vmem:[%s3974_s1 + $0xf0] ss:$8 sps:$4 sm:$0xff]   ;;  %v2665_v32 = vld [vmem:[%s3974_s1 + $0xe4] ss:$8 sps:$4 sm:$0xff]  }
  0x3a   : > { %784 = vmatprep.subr.bf16.mxu0 %v2638_v7  ;;  %v2688_v33 = vld [vmem:[%s3974_s1 + $0x110] ss:$8 sps:$4 sm:$0xff]   ;;  %v2692_v34 = vld [vmem:[%s3974_s1 + $0x104] ss:$8 sps:$4 sm:$0xff]   ;;  %v2667_v36 = vld [vmem:[%s3974_s1 + $0xe0] ss:$8 sps:$4 sm:$0xff]  }
  0x3b   : > { %976 = vmatpush1.bf16.msra.mxu1 %v2664_v17  ;;  %v2704_v35 = vld [vmem:[%s3055_s24 + $0x4] ss:$12 sps:$4 sm:$0xff]   ;;  %v2671_v37 = vld [vmem:[%s3974_s1 + $0xd4] ss:$8 sps:$4 sm:$0xff]   ;;  %v2694_v38 = vld [vmem:[%s3974_s1 + $0x100] ss:$8 sps:$4 sm:$0xff]  }
  0x3c   : > { %977 = vmatprep.subr.bf16.mxu1 %v2668_v18  ;;  %810 = vmatprep.mubr.bf16.mxu0 %v2704_v35  ;;  %v2673_v39 = vld [vmem:[%s3974_s1 + $0xd0] ss:$8 sps:$4 sm:$0xff]   ;;  %v2677_v40 = vld [vmem:[%s3974_s1 + $0xc4] ss:$8 sps:$4 sm:$0xff]   ;;  %v2698_v41 = vld [vmem:[%s3055_s24 + $0x8] ss:$12 sps:$4 sm:$0xff]  }
  0x3d   : > { %785 = vmatpush1.bf16.msra.mxu0 %v2640_v10  ;;  %v2679_v42 = vld [vmem:[%s3974_s1 + $0xc0] ss:$8 sps:$4 sm:$0xff]   ;;  %v2683_v43 = vld [vmem:[%s3974_s1 + $0xb4] ss:$8 sps:$4 sm:$0xff]   ;;  %v2685_v44 = vld [vmem:[%s3974_s1 + $0xb0] ss:$8 sps:$4 sm:$0xff]  }
  0x3e   : > { %786 = vmatprep.subr.bf16.mxu0 %v2641_v11  ;;  %v2689_v45 = vld [vmem:[%s3974_s1 + $0xa4] ss:$8 sps:$4 sm:$0xff]   ;;  %v2691_v47 = vld [vmem:[%s3974_s1 + $0xa0] ss:$8 sps:$4 sm:$0xff]   ;;  %v2695_v48 = vld [vmem:[%s3974_s1 + $0x94] ss:$8 sps:$4 sm:$0xff]  }
  0x3f   : > { %978 = vmatpush1.bf16.msra.mxu1 %v2670_v21  ;;  %v2705_v46 = vld [vmem:[%s3055_s24 + $0x20] ss:$12 sps:$4 sm:$0xff]   ;;  %v2697_v49 = vld [vmem:[%s3974_s1 + $0x90] ss:$8 sps:$4 sm:$0xff]   ;;  %v2706_v54 = vld [vmem:[%s3055_s24 + $0x1c] ss:$12 sps:$4 sm:$0xff]  }
  0x40   : > { %979 = vmatprep.subr.bf16.mxu1 %v2674_v22  ;;  %v2699_v50 = vld [vmem:[%s3974_s1 + $0x84] ss:$8 sps:$4 sm:$0xff]   ;;  %v2701_v52 = vld [vmem:[%s3974_s1 + $0x80] ss:$8 sps:$4 sm:$0xff]   ;;  %v2713_v55 = vld [vmem:[%s3055_s24 + $0x50] ss:$12 sps:$4 sm:$0xff]  }
  0x41   : > { %787 = vmatpush1.bf16.msra.mxu0 %v2643_v14  ;;  %v2709_v51 = vld [vmem:[%s3055_s24 + $0x38] ss:$12 sps:$4 sm:$0xff]   ;;  %v2702_v53 = vld [vmem:[%s3055_s24] ss:$12 sps:$4 sm:$0xff]   ;;  %v2717_v58 = vld [vmem:[%s3055_s24 + $0x68] ss:$12 sps:$4 sm:$0xff]  }
  0x42   : > { %788 = vmatprep.subr.bf16.mxu0 %v2644_v16  ;;  %v2708_v56 = vld [vmem:[%s3055_s24 + $0x18] ss:$12 sps:$4 sm:$0xff]   ;;  %v2710_v57 = vld [vmem:[%s3055_s24 + $0x34] ss:$12 sps:$4 sm:$0xff]   ;;  %v2712_v59 = vld [vmem:[%s3055_s24 + $0x30] ss:$12 sps:$4 sm:$0xff]  }
  0x43   : > { %980 = vmatpush1.bf16.msra.mxu1 %v2676_v25  ;;  %v2714_v60 = vld [vmem:[%s3055_s24 + $0x4c] ss:$12 sps:$4 sm:$0xff]   ;;  %v2716_v62 = vld [vmem:[%s3055_s24 + $0x48] ss:$12 sps:$4 sm:$0xff]   ;;  %v2718_v63 = vld [vmem:[%s3055_s24 + $0x64] ss:$12 sps:$4 sm:$0xff]  }
  0x44   : > { %981 = vmatprep.subr.bf16.mxu1 %v2680_v26  ;;  %v2721_v61 = vld [vmem:[%s3055_s24 + $0x80] ss:$12 sps:$4 sm:$0xff]   ;;  %v2725_v1 = vld [vmem:[%s3055_s24 + $0x98] ss:$12 sps:$4 sm:$0xff]   ;;  %v2722_v3 = vld [vmem:[%s3055_s24 + $0x7c] ss:$12 sps:$4 sm:$0xff]  }
  0x45   : > { %789 = vmatpush1.bf16.msra.mxu0 %v2646_v19  ;;  %v2720_v2 = vld [vmem:[%s3055_s24 + $0x60] ss:$12 sps:$4 sm:$0xff]   ;;  %v2729_v4 = vld [vmem:[%s3055_s24 + $0xb0] ss:$12 sps:$4 sm:$0xff]   ;;  %v2724_v5 = vld [vmem:[%s3055_s24 + $0x78] ss:$12 sps:$4 sm:$0xff]  }
  0x46   : > { %790 = vmatprep.subr.bf16.mxu0 %v2647_v20  ;;  %v2726_v6 = vld [vmem:[%s3055_s24 + $0x94] ss:$12 sps:$4 sm:$0xff]   ;;  %v2728_v8 = vld [vmem:[%s3055_s24 + $0x90] ss:$12 sps:$4 sm:$0xff]   ;;  %v2730_v9 = vld [vmem:[%s3055_s24 + $0xac] ss:$12 sps:$4 sm:$0xff]  }
  0x47   : > { %982 = vmatpush1.bf16.msra.mxu1 %v2682_v29  ;;  %v2733_v7 = vld [vmem:[%s3055_s24 + $0xc8] ss:$12 sps:$4 sm:$0xff]   ;;  %v2737_v10 = vld [vmem:[%s3055_s24 + $0xe0] ss:$12 sps:$4 sm:$0xff]   ;;  %v2734_v12 = vld [vmem:[%s3055_s24 + $0xc4] ss:$12 sps:$4 sm:$0xff]  }
  0x48   : > { %983 = vmatprep.subr.bf16.mxu1 %v2686_v30  ;;  %v2732_v11 = vld [vmem:[%s3055_s24 + $0xa8] ss:$12 sps:$4 sm:$0xff]   ;;  %v2741_v13 = vld [vmem:[%s3055_s24 + $0xf8] ss:$12 sps:$4 sm:$0xff]   ;;  %v2736_v14 = vld [vmem:[%s3055_s24 + $0xc0] ss:$12 sps:$4 sm:$0xff]  }
  0x49   : > { %791 = vmatpush1.bf16.msra.mxu0 %v2649_v23  ;;  %v2738_v15 = vld [vmem:[%s3055_s24 + $0xdc] ss:$12 sps:$4 sm:$0xff]   ;;  %v2740_v17 = vld [vmem:[%s3055_s24 + $0xd8] ss:$12 sps:$4 sm:$0xff]   ;;  %v2742_v18 = vld [vmem:[%s3055_s24 + $0xf4] ss:$12 sps:$4 sm:$0xff]  }
  0x4a   : > { %792 = vmatprep.subr.bf16.mxu0 %v2653_v24  ;;  %v2745_v16 = vld [vmem:[%s3055_s24 + $0x110] ss:$12 sps:$4 sm:$0xff]   ;;  %v2749_v19 = vld [vmem:[%s3055_s24 + $0x128] ss:$12 sps:$4 sm:$0xff]   ;;  %v2746_v21 = vld [vmem:[%s3055_s24 + $0x10c] ss:$12 sps:$4 sm:$0xff]  }
  0x4b   : > { %984 = vmatpush1.bf16.msra.mxu1 %v2688_v33  ;;  %v2744_v20 = vld [vmem:[%s3055_s24 + $0xf0] ss:$12 sps:$4 sm:$0xff]   ;;  %v2753_v22 = vld [vmem:[%s3055_s24 + $0x140] ss:$12 sps:$4 sm:$0xff]   ;;  %v2748_v23 = vld [vmem:[%s3055_s24 + $0x108] ss:$12 sps:$4 sm:$0xff]  }
  0x4c   : > { %985 = vmatprep.subr.bf16.mxu1 %v2692_v34  ;;  %v2750_v24 = vld [vmem:[%s3055_s24 + $0x124] ss:$12 sps:$4 sm:$0xff]   ;;  %v2752_v26 = vld [vmem:[%s3055_s24 + $0x120] ss:$12 sps:$4 sm:$0xff]   ;;  %v2764_v33 = vld [vmem:[%s3055_s24 + $0x168] ss:$12 sps:$4 sm:$0xff]  }
  0x4d   : > { %793 = vmatpush1.bf16.msra.mxu0 %v2655_v27  ;;  %v2757_v25 = vld [vmem:[%s3055_s24 + $0x158] ss:$12 sps:$4 sm:$0xff]   ;;  %v2754_v27 = vld [vmem:[%s3055_s24 + $0x13c] ss:$12 sps:$4 sm:$0xff]   ;;  %v2758_v30 = vld [vmem:[%s3055_s24 + $0x154] ss:$12 sps:$4 sm:$0xff]  }
  0x4e   : > { %794 = vmatprep.subr.bf16.mxu0 %v2659_v28  ;;  %v2761_v28 = vld [vmem:[%s3055_s24 + $0x170] ss:$12 sps:$4 sm:$0xff]   ;;  %v2756_v29 = vld [vmem:[%s3055_s24 + $0x138] ss:$12 sps:$4 sm:$0xff]   ;;  %vm3977_vm0 = vcmask 523264   ;;  %s2241_s7 = sshll.u32 %s2233_s13, 1 }
  0x4f   : > { %986 = vmatpush1.bf16.msra.mxu1 %v2694_v38  ;;  %p163_p8 = scmp.lt.s32.totalorder %s2241_s7, 7 }
  0x51   : > { %795 = vmatpush2.bf16.msra.mxu0 %v2661_v31  ;;  %v2760_v31 = vld [vmem:[%s3055_s24 + $0x150] ss:$12 sps:$4 sm:$0xff]   ;;  %s4018_s7 = smov (!%p163_p8, %s2241_s7), 7 }
  0x52   : > { %796 = vmatprep.subr.bf16.mxu0 %v2665_v32  ;;  %1004 = vmatmul.mubr.bf16.vlgmr.msra.gmra.mxu1 %v2698_v41  ;;  %v2762_v32 = vld [vmem:[%s3055_s24 + $0x16c] ss:$12 sps:$4 sm:$0xff]   ;;  %s2961_s24 = smov 64   ;;  %s2358_s8 = sshll.u32 %s4018_s7, 7 }
  0x53   : > { %1013 = vmatprep.mubr.bf16.mxu1 %v2960_v0  ;;  %s3894_s16 = scalar_lea.vmem %s3975_s2, %s2358_s8 }
  0x55   : > { %797 = vmatpush2.bf16.msra.mxu0 %v2667_v36 }
  0x56   : > { %798 = vmatprep.subr.bf16.mxu0 %v2671_v37 }
  0x59   : > { %799 = vmatpush2.bf16.msra.mxu0 %v2673_v39 }
  0x5a   : > { %800 = vmatprep.subr.bf16.mxu0 %v2677_v40  ;;  %1014 = vmatmul.mubr.bf16.gmra.mxu1 %v2705_v46 }
  0x5b   : > { %1023 = vmatprep.mubr.bf16.mxu1 %v2960_v0 }
  0x5d   : > { %801 = vmatpush2.bf16.msra.mxu0 %v2679_v42 }
  0x5e   : > { %802 = vmatprep.subr.bf16.mxu0 %v2683_v43 }
  0x61   : > { %803 = vmatpush2.bf16.msra.mxu0 %v2685_v44 }
  0x62   : > { %804 = vmatprep.subr.bf16.mxu0 %v2689_v45  ;;  %1024 = vmatmul.mubr.bf16.gmra.mxu1 %v2709_v51 }
  0x63   : > { %1033 = vmatprep.mubr.bf16.mxu1 %v2960_v0 }
  0x65   : > { %805 = vmatpush2.bf16.msra.mxu0 %v2691_v47 }
  0x66   : > { %806 = vmatprep.subr.bf16.mxu0 %v2695_v48 }
  0x69   : > { %807 = vmatpush2.bf16.msra.mxu0 %v2697_v49 }
  0x6a   : > { %808 = vmatprep.subr.bf16.mxu0 %v2699_v50  ;;  %1034 = vmatmul.mubr.bf16.gmra.mxu1 %v2713_v55 }
  0x6b   : > { %1043 = vmatprep.mubr.bf16.mxu1 %v2960_v0 }
  0x6d   : > { %809 = vmatpush2.bf16.msra.mxu0 %v2701_v52 }
  0x70   : > { %811 = vmatmul.mubr.bf16.vlgmr.msra.gmra.mxu0 %v2702_v53 }
  0x71   : > { %820 = vmatprep.mubr.bf16.mxu0 %v2706_v54 }
  0x72   : > { %1044 = vmatmul.mubr.bf16.gmra.mxu1 %v2717_v58 }
  0x73   : > { %1053 = vmatprep.mubr.bf16.mxu1 %v2960_v0 }
  0x78   : > { %821 = vmatmul.mubr.bf16.gmra.mxu0 %v2708_v56 }
  0x79   : > { %830 = vmatprep.mubr.bf16.mxu0 %v2710_v57 }
  0x7a   : > { %1054 = vmatmul.mubr.bf16.gmra.mxu1 %v2721_v61 }
  0x7b   : > { %1063 = vmatprep.mubr.bf16.mxu1 %v2960_v0 }
  0x80   : > { %831 = vmatmul.mubr.bf16.gmra.mxu0 %v2712_v59 }
  0x81   : > { %840 = vmatprep.mubr.bf16.mxu0 %v2714_v60 }
  0x82   : > { %1064 = vmatmul.mubr.bf16.gmra.mxu1 %v2725_v1 }
  0x83   : > { %1073 = vmatprep.mubr.bf16.mxu1 %v2960_v0 }
  0x88   : > { %841 = vmatmul.mubr.bf16.gmra.mxu0 %v2716_v62 }
  0x89   : > { %850 = vmatprep.mubr.bf16.mxu0 %v2718_v63 }
  0x8a   : > { %1074 = vmatmul.mubr.bf16.gmra.mxu1 %v2729_v4 }
  0x8b   : > { %1083 = vmatprep.mubr.bf16.mxu1 %v2960_v0 }
  0x90   : > { %851 = vmatmul.mubr.bf16.gmra.mxu0 %v2720_v2 }
  0x91   : > { %860 = vmatprep.mubr.bf16.mxu0 %v2722_v3 }
  0x92   : > { %1084 = vmatmul.mubr.bf16.gmra.mxu1 %v2733_v7 }
  0x93   : > { %1093 = vmatprep.mubr.bf16.mxu1 %v2960_v0 }
  0x98   : > { %861 = vmatmul.mubr.bf16.gmra.mxu0 %v2724_v5 }
  0x99   : > { %870 = vmatprep.mubr.bf16.mxu0 %v2726_v6 }
  0x9a   : > { %1094 = vmatmul.mubr.bf16.gmra.mxu1 %v2737_v10 }
  0x9b   : > { %1103 = vmatprep.mubr.bf16.mxu1 %v2960_v0 }
  0xa0   : > { %871 = vmatmul.mubr.bf16.gmra.mxu0 %v2728_v8 }
  0xa1   : > { %880 = vmatprep.mubr.bf16.mxu0 %v2730_v9 }
  0xa2   : > { %1104 = vmatmul.mubr.bf16.gmra.mxu1 %v2741_v13 }
  0xa3   : > { %1113 = vmatprep.mubr.bf16.mxu1 %v2960_v0 }
  0xa8   : > { %881 = vmatmul.mubr.bf16.gmra.mxu0 %v2732_v11 }
  0xa9   : > { %890 = vmatprep.mubr.bf16.mxu0 %v2734_v12 }
  0xaa   : > { %1114 = vmatmul.mubr.bf16.gmra.mxu1 %v2745_v16 }
  0xab   : > { %1123 = vmatprep.mubr.bf16.mxu1 %v2960_v0 }
  0xb0   : > { %891 = vmatmul.mubr.bf16.gmra.mxu0 %v2736_v14 }
  0xb1   : > { %900 = vmatprep.mubr.bf16.mxu0 %v2738_v15 }
  0xb2   : > { %1124 = vmatmul.mubr.bf16.gmra.mxu1 %v2749_v19 }
  0xb3   : > { %1133 = vmatprep.mubr.bf16.mxu1 %v2960_v0 }
  0xb8   : > { %901 = vmatmul.mubr.bf16.gmra.mxu0 %v2740_v17 }
  0xb9   : > { %910 = vmatprep.mubr.bf16.mxu0 %v2742_v18 }
  0xba   : > { %1134 = vmatmul.mubr.bf16.gmra.mxu1 %v2753_v22 }
  0xbb   : > { %1143 = vmatprep.mubr.bf16.mxu1 %v2960_v0 }
  0xc0   : > { %911 = vmatmul.mubr.bf16.gmra.mxu0 %v2744_v20 }
  0xc1   : > { %920 = vmatprep.mubr.bf16.mxu0 %v2746_v21 }
  0xc2   : > { %1144 = vmatmul.mubr.bf16.gmra.mxu1 %v2757_v25 }
  0xc3   : > { %1153 = vmatprep.mubr.bf16.mxu1 %v2960_v0 }
  0xc8   : > { %921 = vmatmul.mubr.bf16.gmra.mxu0 %v2748_v23 }
  0xc9   : > { %930 = vmatprep.mubr.bf16.mxu0 %v2750_v24 }
  0xca   : > { %1154 = vmatmul.mubr.bf16.gmra.mxu1 %v2761_v28 }
  0xd0   : > { %931 = vmatmul.mubr.bf16.gmra.mxu0 %v2752_v26 }
  0xd1   : > { %940 = vmatprep.mubr.bf16.mxu0 %v2754_v27 }
  0xd8   : > { %941 = vmatmul.mubr.bf16.gmra.mxu0 %v2756_v29 }
  0xd9   : > { %950 = vmatprep.mubr.bf16.mxu0 %v2758_v30 }
  0xe0   : > { %951 = vmatmul.mubr.bf16.gmra.mxu0 %v2760_v31 }
  0xe1   : > { %960 = vmatprep.mubr.bf16.mxu0 %v2762_v32 }
  0xe8   : > { %961 = vmatmul.mubr.bf16.gmra.mxu0 %v2764_v33 }
 0x112   : > { %v1005_v34 = vpop.f32.mrf.mxu1 }
 0x114   : > { %v1007_v35 = vpop.f32.mrf.mxu1 }
 0x116   : > { %v1009_v36 = vpop.f32.mrf.mxu1 }
 0x118   : > { %v1011_v0 = vpop.f32.mrf.mxu1 }
 0x11a   : > { %v1015_v37 = vpop.f32.mrf.mxu1 }
 0x11c   : > { %v1017_v38 = vpop.f32.mrf.mxu1 }
 0x11e   : > { %v1019_v39 = vpop.f32.mrf.mxu1 }
 0x120   : > { %v1021_v40 = vpop.f32.mrf.mxu1 }
 0x122   : > { %v1025_v41 = vpop.f32.mrf.mxu1 }
 0x124   : > { %v1027_v42 = vpop.f32.mrf.mxu1 }
 0x126   : > { %v1029_v43 = vpop.f32.mrf.mxu1 }
 0x128   : > { %v1031_v45 = vpop.f32.mrf.mxu1 }
 0x12a   : > { %v1035_v47 = vpop.f32.mrf.mxu1 }
 0x12c   : > { %v1037_v50 = vpop.f32.mrf.mxu1 }
 0x12e   : > { %v1039_v54 = vpop.f32.mrf.mxu1 }
 0x130   : > { %v812_v44 = vpop.f32.mrf.mxu0  ;;  %v1041_v58 = vpop.f32.mrf.mxu1 }
 0x131   : > { %v1006_v51 = vadd.f32 %v1005_v34, %v812_v44 }
 0x132   : > { %v814_v46 = vpop.f32.mrf.mxu0  ;;  %v1045_v61 = vpop.f32.mrf.mxu1 }
 0x133   : > { %v1008_v48 = vadd.f32 %v1007_v35, %v814_v46 }
 0x134   : > { %v816_v49 = vpop.f32.mrf.mxu0  ;;  %v1047_v1 = vpop.f32.mrf.mxu1 }
 0x135   : > { %v1010_v52 = vadd.f32 %v1009_v36, %v816_v49 }
 0x136   : > { %v818_v53 = vpop.f32.mrf.mxu0  ;;  %v1049_v5 = vpop.f32.mrf.mxu1 }
 0x137   : > { %v3269_v55 = vpack.c.bf16 %v1010_v52, %v1006_v51  ;;  %v1012_v56 = vadd.f32 %v1011_v0, %v818_v53 }
 0x138   : > { %v822_v57 = vpop.f32.mrf.mxu0  ;;  %v1051_v9 = vpop.f32.mrf.mxu1 }
 0x139   : > { %v3271_v59 = vpack.c.bf16 %v1012_v56, %v1008_v48  ;;  %1204 = vrot.lane.b32.xlu0 %v3269_v55, %s2961_s24  ;;  %v1016_v2 = vadd.f32 %v1015_v37, %v822_v57 }
 0x13a   : > { %v824_v60 = vpop.f32.mrf.mxu0  ;;  %v1055_v12 = vpop.f32.mrf.mxu1 }
 0x13b   : > { %v1018_v62 = vadd.f32 %v1017_v38, %v824_v60 }
 0x13c   : > { %v826_v63 = vpop.f32.mrf.mxu0  ;;  %v1057_v15 = vpop.f32.mrf.mxu1 }
 0x13d   : > { %v1020_v3 = vadd.f32 %v1019_v39, %v826_v63 }
 0x13e   : > { %v828_v4 = vpop.f32.mrf.mxu0  ;;  %v1059_v19 = vpop.f32.mrf.mxu1 }
 0x13f   : > { %v3275_v6 = vpack.c.bf16 %v1020_v3, %v1016_v2  ;;  %v1022_v7 = vadd.f32 %v1021_v40, %v828_v4 }
 0x140   : > { %v832_v8 = vpop.f32.mrf.mxu0  ;;  %v1061_v23 = vpop.f32.mrf.mxu1 }
 0x141   : > { %v3277_v10 = vpack.c.bf16 %v1022_v7, %v1018_v62  ;;  %1206 = vrot.lane.b32.xlu0 %v3275_v6, %s2961_s24  ;;  %v1026_v16 = vadd.f32 %v1025_v41, %v832_v8 }
 0x142   : > { %v834_v11 = vpop.f32.mrf.mxu0  ;;  %v1065_v26 = vpop.f32.mrf.mxu1 }
 0x143   : > { %v1028_v13 = vadd.f32 %v1027_v42, %v834_v11 }
 0x144   : > { %v836_v14 = vpop.f32.mrf.mxu0  ;;  %v1067_v29 = vpop.f32.mrf.mxu1 }
 0x145   : > { %v1030_v17 = vadd.f32 %v1029_v43, %v836_v14 }
 0x146   : > { %v838_v18 = vpop.f32.mrf.mxu0  ;;  %v1069_v33 = vpop.f32.mrf.mxu1 }
 0x147   : > { %v3281_v20 = vpack.c.bf16 %v1030_v17, %v1026_v16  ;;  %v1032_v21 = vadd.f32 %v1031_v45, %v838_v18 }
 0x148   : > { %v842_v22 = vpop.f32.mrf.mxu0  ;;  %v1071_v0 = vpop.f32.mrf.mxu1 }
 0x149   : > { %v3283_v24 = vpack.c.bf16 %v1032_v21, %v1028_v13  ;;  %1208 = vrot.lane.b32.xlu1 %v3281_v20, %s2961_s24  ;;  %v1036_v30 = vadd.f32 %v1035_v47, %v842_v22 }
 0x14a   : > { %v844_v25 = vpop.f32.mrf.mxu0  ;;  %v1075_v39 = vpop.f32.mrf.mxu1 }
 0x14b   : > { %v1038_v27 = vadd.f32 %v1037_v50, %v844_v25 }
 0x14c   : > { %v846_v28 = vpop.f32.mrf.mxu0  ;;  %v3293_v42 = vpop.f32.mrf.mxu1 }
 0x14d   : > { %v1040_v31 = vadd.f32 %v1039_v54, %v846_v28 }
 0x14e   : > { %v848_v32 = vpop.f32.mrf.mxu0  ;;  %v1079_v46 = vpop.f32.mrf.mxu1 }
 0x14f   : > { %v3287_v34 = vpack.c.bf16 %v1040_v31, %v1036_v30  ;;  %v1042_v35 = vadd.f32 %v1041_v58, %v848_v32 }
 0x150   : > { %v852_v36 = vpop.f32.mrf.mxu0  ;;  %v3297_v50 = vpop.f32.mrf.mxu1 }
 0x151   : > { %v3289_v37 = vpack.c.bf16 %v1042_v35, %v1038_v27  ;;  %1210 = vrot.lane.b32.xlu1 %v3287_v34, %s2961_s24  ;;  %v1046_v43 = vadd.f32 %v1045_v61, %v852_v36 }
 0x152   : > { %v854_v38 = vpop.f32.mrf.mxu0  ;;  %v1085_v53 = vpop.f32.mrf.mxu1 }
 0x153   : > { %v1048_v40 = vadd.f32 %v1047_v1, %v854_v38 }
 0x154   : > { %v856_v41 = vpop.f32.mrf.mxu0  ;;  %v1087_v57 = vpop.f32.mrf.mxu1 }
 0x155   : > { %v1050_v44 = vadd.f32 %v1049_v5, %v856_v41 }
 0x156   : > { %v858_v45 = vpop.f32.mrf.mxu0  ;;  %v1089_v62 = vpop.f32.mrf.mxu1 }
 0x157   : > { %v3295_v47 = vpack.c.bf16 %v1050_v44, %v1046_v43  ;;  %v1052_v48 = vadd.f32 %v1051_v9, %v858_v45 }
 0x158   : > { %v862_v49 = vpop.f32.mrf.mxu0  ;;  %v1091_v3 = vpop.f32.mrf.mxu1 }
 0x159   : > { %v3299_v51 = vpack.c.bf16 %v1052_v48, %v1048_v40  ;;  %1212 = vrot.lane.b32.xlu0 %v3295_v47, %s2961_s24  ;;  %v1056_v58 = vadd.f32 %v1055_v12, %v862_v49 }
 0x15a   : > { %v864_v52 = vpop.f32.mrf.mxu0  ;;  %v1095_v7 = vpop.f32.mrf.mxu1 }
 0x15b   : > { %v1058_v54 = vadd.f32 %v1057_v15, %v864_v52 }
 0x15c   : > { %v866_v56 = vpop.f32.mrf.mxu0  ;;  %v1097_v11 = vpop.f32.mrf.mxu1 }
 0x15d   : > { %v1060_v60 = vadd.f32 %v1059_v19, %v866_v56 }
 0x15e   : > { %v868_v61 = vpop.f32.mrf.mxu0  ;;  %v1099_v15 = vpop.f32.mrf.mxu1 }
 0x15f   : > { %v3303_v63 = vpack.c.bf16 %v1060_v60, %v1056_v58  ;;  %v1062_v1 = vadd.f32 %v1061_v23, %v868_v61 }
 0x160   : > { %v872_v2 = vpop.f32.mrf.mxu0  ;;  %v1101_v19 = vpop.f32.mrf.mxu1 }
 0x161   : > { %v3305_v4 = vpack.c.bf16 %v1062_v1, %v1058_v54  ;;  %1214 = vrot.lane.b32.xlu0 %v3303_v63, %s2961_s24  ;;  %v1066_v13 = vadd.f32 %v1065_v26, %v872_v2 }
 0x162   : > { %v874_v5 = vpop.f32.mrf.mxu0  ;;  %v1105_v23 = vpop.f32.mrf.mxu1 }
 0x163   : > { %v1068_v8 = vadd.f32 %v1067_v29, %v874_v5 }
 0x164   : > { %v876_v9 = vpop.f32.mrf.mxu0  ;;  %v1107_v27 = vpop.f32.mrf.mxu1 }
 0x165   : > { %v1070_v12 = vadd.f32 %v1069_v33, %v876_v9 }
 0x166   : > { %v878_v14 = vpop.f32.mrf.mxu0  ;;  %v1109_v26 = vpop.f32.mrf.mxu1 }
 0x167   : > { %v1176_v16 = vpack.c.bf16 %v1070_v12, %v1066_v13  ;;  %v1072_v17 = vadd.f32 %v1071_v0, %v878_v14 }
 0x168   : > { %v882_v18 = vpop.f32.mrf.mxu0  ;;  %v1111_v33 = vpop.f32.mrf.mxu1 }
 0x169   : > { %v3309_v21 = vpack.c.bf16 %v1072_v17, %v1068_v8  ;;  %1216 = vrot.lane.b32.xlu0 %v1176_v16, %s2961_s24  ;;  %v1076_v28 = vadd.f32 %v1075_v39, %v882_v18  ;;  %v1264_v56 = vsel %vm3977_vm0, %v1176_v16, 0 }
 0x16a   : > { %v3312_v22 = vpop.f32.mrf.mxu0  ;;  %v1115_v0 = vpop.f32.mrf.mxu1 }
 0x16c   : > { %v886_v25 = vpop.f32.mrf.mxu0  ;;  %v1117_v40 = vpop.f32.mrf.mxu1 }
 0x16d   : > { %v1080_v29 = vadd.f32 %v1079_v46, %v886_v25 }
 0x16e   : > { %v3314_v30 = vpop.f32.mrf.mxu0  ;;  %v1119_v45 = vpop.f32.mrf.mxu1 }
 0x16f   : > { %v1178_v31 = vpack.c.bf16 %v1080_v29, %v1076_v28 }
 0x170   : > { %v892_v32 = vpop.f32.mrf.mxu0  ;;  %v1121_v52 = vpop.f32.mrf.mxu1 }
 0x171   : > { %1218 = vrot.lane.b32.xlu0 %v1178_v31, %s2961_s24  ;;  %2567 = vmatprep.subr.msk.bf16.mxu1 %vm3977_vm0, %v1178_v31  ;;  %v1267_v35 = vsel %vm3977_vm0, %v1178_v31, 0  ;;  %v1086_v41 = vadd.f32 %v1085_v53, %v892_v32 }
 0x172   : > { %v894_v36 = vpop.f32.mrf.mxu0  ;;  %2424 = vmatpush3.bf16.xpose.msra.mxu1 %v1267_v35  ;;  %v1125_v58 = vpop.f32.mrf.mxu1 }
 0x173   : > { %v1088_v38 = vadd.f32 %v1087_v57, %v894_v36  ;;  %2568 = vmatprep.subr.msk.bf16.mxu1 %vm3977_vm0, %v1176_v16 }
 0x174   : > { %v896_v39 = vpop.f32.mrf.mxu0  ;;  %v1127_v61 = vpop.f32.mrf.mxu1 }
 0x175   : > { %v1090_v43 = vadd.f32 %v1089_v62, %v896_v39 }
 0x176   : > { %v898_v44 = vpop.f32.mrf.mxu0 }
 0x177   : > { %v3320_v46 = vpack.c.bf16 %v1090_v43, %v1086_v41  ;;  %v1092_v48 = vadd.f32 %v1091_v3, %v898_v44  ;;  %v1129_v3 = vpop.f32.mrf.mxu1 }
 0x178   : > { %v902_v49 = vpop.f32.mrf.mxu0 }
 0x179   : > { %v3322_v54 = vpack.c.bf16 %v1092_v48, %v1088_v38  ;;  %1374 = vrot.lane.b32.xlu1 %v3320_v46, %s2961_s24  ;;  %v1096_v62 = vadd.f32 %v1095_v7, %v902_v49  ;;  %v1131_v13 = vpop.f32.mrf.mxu1 }
 0x17a   : > { %v904_v57 = vpop.f32.mrf.mxu0  ;;  %2426 = vmatpush3.bf16.xpose.msra.mxu1 %v1264_v56 }
 0x17b   : > { %v1098_v60 = vadd.f32 %v1097_v11, %v904_v57  ;;  %2569 = vmatprep.subr.msk.bf16.mxu1 %vm3977_vm0, %v3303_v63  ;;  %v1261_v11 = vsel %vm3977_vm0, %v3303_v63, 0  ;;  %v1258_v63 = vsel %vm3977_vm0, %v3295_v47, 0 }
 0x17c   : > { %v906_v53 = vpop.f32.mrf.mxu0 }
 0x17d   : > { %v1100_v1 = vadd.f32 %v1099_v15, %v906_v53  ;;  %v1135_v15 = vpop.f32.mrf.mxu1 }
 0x17e   : > { %v908_v2 = vpop.f32.mrf.mxu0 }
 0x17f   : > { %v3329_v5 = vpack.c.bf16 %v1100_v1, %v1096_v62  ;;  %v1102_v8 = vadd.f32 %v1101_v19, %v908_v2  ;;  %v1137_v31 = vpop.f32.mrf.mxu1 }
 0x180   : > { %v912_v9 = vpop.f32.mrf.mxu0 }
 0x181   : > { %v3331_v12 = vpack.c.bf16 %v1102_v8, %v1098_v60  ;;  %1376 = vrot.lane.b32.xlu1 %v3329_v5, %s2961_s24  ;;  %v1106_v17 = vadd.f32 %v1105_v23, %v912_v9 }
 0x182   : > { %v914_v14 = vpop.f32.mrf.mxu0  ;;  %2428 = vmatpush3.bf16.xpose.msra.mxu1 %v1261_v11 }
 0x183   : > { %v1108_v16 = vadd.f32 %v1107_v27, %v914_v14  ;;  %2570 = vmatprep.subr.msk.bf16.mxu1 %vm3977_vm0, %v3295_v47  ;;  %v1255_v47 = vsel %vm3977_vm0, %v3287_v34, 0 }
 0x184   : > { %v916_v7 = vpop.f32.mrf.mxu0 }
 0x185   : > { %v1110_v18 = vadd.f32 %v1109_v26, %v916_v7  ;;  %v1139_v26 = vpop.f32.mrf.mxu1 }
 0x186   : > { %v918_v19 = vpop.f32.mrf.mxu0 }
 0x187   : > { %v3339_v25 = vpack.c.bf16 %v1110_v18, %v1106_v17  ;;  %v1112_v28 = vadd.f32 %v1111_v33, %v918_v19  ;;  %v1141_v44 = vpop.f32.mrf.mxu1 }
 0x188   : > { %v922_v29 = vpop.f32.mrf.mxu0 }
 0x189   : > { %v3341_v32 = vpack.c.bf16 %v1112_v28, %v1108_v16  ;;  %1378 = vrot.lane.b32.xlu1 %v3339_v25, %s2961_s24  ;;  %v1116_v36 = vadd.f32 %v1115_v0, %v922_v29 }
 0x18a   : > { %v924_v27 = vpop.f32.mrf.mxu0  ;;  %2430 = vmatpush3.bf16.xpose.msra.mxu1 %v1258_v63 }
 0x18b   : > { %v1118_v35 = vadd.f32 %v1117_v40, %v924_v27  ;;  %2571 = vmatprep.subr.msk.bf16.mxu1 %vm3977_vm0, %v3287_v34  ;;  %v1252_v34 = vsel %vm3977_vm0, %v3281_v20, 0 }
 0x18c   : > { %v926_v23 = vpop.f32.mrf.mxu0 }
 0x18d   : > { %v1120_v33 = vadd.f32 %v1119_v45, %v926_v23  ;;  %v1145_v45 = vpop.f32.mrf.mxu1  ;;  %v1078_v23 = vadd.f32 %v3293_v42, %v3312_v22 }
 0x18e   : > { %v928_v38 = vpop.f32.mrf.mxu0 }
 0x18f   : > { %v3349_v39 = vpack.c.bf16 %v1120_v33, %v1116_v36  ;;  %v1122_v41 = vadd.f32 %v1121_v52, %v928_v38  ;;  %v1147_v1 = vpop.f32.mrf.mxu1 }
 0x190   : > { %v932_v43 = vpop.f32.mrf.mxu0 }
 0x191   : > { %v3351_v48 = vpack.c.bf16 %v1122_v41, %v1118_v35  ;;  %1380 = vrot.lane.b32.xlu1 %v3349_v39, %s2961_s24  ;;  %v1126_v56 = vadd.f32 %v1125_v58, %v932_v43  ;;  %v1246_v43 = vsel %vm3977_vm0, %v3269_v55, 0 }
 0x192   : > { %v934_v40 = vpop.f32.mrf.mxu0  ;;  %2432 = vmatpush3.bf16.xpose.msra.mxu1 %v1255_v47 }
 0x193   : > { %v1128_v49 = vadd.f32 %v1127_v61, %v934_v40  ;;  %2572 = vmatprep.subr.msk.bf16.mxu1 %vm3977_vm0, %v3281_v20  ;;  %v1249_v20 = vsel %vm3977_vm0, %v3275_v6, 0 }
 0x194   : > { %v936_v0 = vpop.f32.mrf.mxu0 }
 0x195   : > { %v1130_v52 = vadd.f32 %v1129_v3, %v936_v0  ;;  %v1149_v3 = vpop.f32.mrf.mxu1 }
 0x196   : > { %v938_v57 = vpop.f32.mrf.mxu0 }
 0x197   : > { %v3359_v60 = vpack.c.bf16 %v1130_v52, %v1126_v56  ;;  %v1132_v53 = vadd.f32 %v1131_v13, %v938_v57  ;;  %v1151_v17 = vpop.f32.mrf.mxu1 }
 0x198   : > { %v942_v62 = vpop.f32.mrf.mxu0 }
 0x199   : > { %v3361_v2 = vpack.c.bf16 %v1132_v53, %v1128_v49  ;;  %1382 = vrot.lane.b32.xlu0 %v3359_v60, %s2961_s24  ;;  %v1136_v9 = vadd.f32 %v1135_v15, %v942_v62  ;;  %v1155_v15 = vpop.f32.mrf.mxu1 }
 0x19a   : > { %v944_v61 = vpop.f32.mrf.mxu0  ;;  %2434 = vmatpush3.bf16.xpose.msra.mxu1 %v1252_v34 }
 0x19b   : > { %v1138_v8 = vadd.f32 %v1137_v31, %v944_v61  ;;  %2573 = vmatprep.subr.msk.bf16.mxu1 %vm3977_vm0, %v3275_v6  ;;  %v1082_v31 = vadd.f32 %v3297_v50, %v3314_v30  ;;  %v1157_v6 = vpop.f32.mrf.mxu1 }
 0x19c   : > { %v946_v58 = vpop.f32.mrf.mxu0 }
 0x19d   : > { %v1140_v13 = vadd.f32 %v1139_v26, %v946_v58  ;;  %v1179_v38 = vpack.c.bf16 %v1082_v31, %v1078_v23  ;;  %v1159_v30 = vpop.f32.mrf.mxu1 }
 0x19e   : > { %v948_v11 = vpop.f32.mrf.mxu0 }
 0x19f   : > { %v1190_v14 = vpack.c.bf16 %v1140_v13, %v1136_v9  ;;  %v1142_v16 = vadd.f32 %v1141_v44, %v948_v11  ;;  %v1161_v52 = vpop.f32.mrf.mxu1  ;;  %v1535_v13 = vlaneseq }
 0x1a0   : > { %v952_v7 = vpop.f32.mrf.mxu0 }
 0x1a1   : > { %v3369_v18 = vpack.c.bf16 %v1142_v16, %v1138_v8  ;;  %1384 = vrot.lane.b32.xlu1 %v1190_v14, %s2961_s24  ;;  %v1146_v63 = vadd.f32 %v1145_v45, %v952_v7  ;;  %v1430_v56 = vsel %vm3977_vm0, %v1190_v14, 0  ;;  %v3461_v11 = vshrl.u32 %v1535_v13, 7 }
 0x1a2   : > { %v954_v19 = vpop.f32.mrf.mxu0  ;;  %2436 = vmatpush3.bf16.xpose.msra.mxu1 %v1249_v20  ;;  %v3466_v16 = vand.u32 127, %v1535_v13 }
 0x1a3   : > { %v1148_v28 = vadd.f32 %v1147_v1, %v954_v19  ;;  %2574 = vmatprep.subr.msk.bf16.mxu1 %vm3977_vm0, %v3269_v55  ;;  %v3512_v23 = vadd.s32 56, %v3461_v11 }
 0x1a4   : > { %v956_v29 = vpop.f32.mrf.mxu0  ;;  %vm1554_vm2 = vcmp.ge.s32.totalorder %v3461_v11, %v3466_v16 }
 0x1a5   : > { %v1150_v27 = vadd.f32 %v1149_v3, %v956_v29  ;;  %vm1561_vm6 = vcmp.ge.s32.totalorder %v3512_v23, %v3466_v16 }
 0x1a6   : > { %v958_v35 = vpop.f32.mrf.mxu0 }
 0x1a7   : > { %v1192_v26 = vpack.c.bf16 %v1150_v27, %v1146_v63  ;;  %v1152_v36 = vadd.f32 %v1151_v17, %v958_v35  ;;  %v3471_v17 = vadd.s32 8, %v3461_v11  ;;  %v3507_v35 = vadd.s32 48, %v3461_v11 }
 0x1a8   : > { %v962_v33 = vpop.f32.mrf.mxu0 }
 0x1a9   : > { %v3380_v41 = vpack.c.bf16 %v1152_v36, %v1148_v28  ;;  %1386 = vrot.lane.b32.xlu0 %v1192_v26, %s2961_s24  ;;  %v1156_v42 = vadd.f32 %v1155_v15, %v962_v33  ;;  %v1433_v55 = vsel %vm3977_vm0, %v1192_v26, 0  ;;  %v3482_v28 = vadd.s32 24, %v3461_v11 }
 0x1aa   : > { %v964_v44 = vpop.f32.mrf.mxu0  ;;  %2438 = vmatpush3.bf16.xpose.msra.mxu1 %v1246_v43  ;;  %vm1555_vm3 = vcmp.ge.s32.totalorder %v3471_v17, %v3466_v16  ;;  %vm1560_vm5 = vcmp.ge.s32.totalorder %v3507_v35, %v3466_v16 }
 0x1ab   : > { %v1205_v50 = vpop.permute.xlu0 %1204  ;;  %2487 = vmatprep.subr.bf16.mxu1 %v1179_v38  ;;  %vm1557_vm4 = vcmp.ge.s32.totalorder %v3482_v28, %v3466_v16 }
 0x1ac   : > { %v966_v47 = vpop.f32.mrf.mxu0  ;;  %2439 = vmatprep.mubr.msk.bf16.mxu1 %vm3977_vm0, %v1205_v50 }
 0x1ad   : > { %v1160_v22 = vadd.f32 %v1159_v30, %v966_v47 }
 0x1af   : > { %v1194_v40 = vpack.c.bf16 %v1160_v22, %v1156_v42  ;;  %v1546_v42 = vadd.s32 80, %v3461_v11  ;;  %v3553_v22 = vadd.s32 88, %v3461_v11 }
 0x1b1   : > { %1388 = vrot.lane.b32.xlu1 %v1194_v40, %s2961_s24  ;;  %2575 = vmatprep.subr.msk.bf16.mxu0 %vm3977_vm0, %v1194_v40  ;;  %v1436_v49 = vsel %vm3977_vm0, %v1194_v40, 0  ;;  %vm1564_vm9 = vcmp.ge.s32.totalorder %v1546_v42, %v3466_v16  ;;  %v3556_v40 = vadd.s32 64, %v3461_v11  ;;  %vm1565_vm10 = vcmp.ge.s32.totalorder %v3553_v22, %v3466_v16 }
 0x1b2   : > { %2456 = vmatpush3.bf16.xpose.msra.mxu0 %v1436_v49 }
 0x1b3   : > { %v1207_v0 = vpop.permute.xlu0 %1206  ;;  %2576 = vmatprep.subr.msk.bf16.mxu0 %vm3977_vm0, %v1192_v26  ;;  %v3515_v26 = vadd.s32 32, %v3461_v11  ;;  %vm1562_vm11 = vcmp.ge.s32.totalorder %v3556_v40, %v3466_v16 }
 0x1b4   : > { %2440 = vmatmul.mubr.msk.bf16.vlgmr.msra.gmra.mxu1 %vm3977_vm0, %v1207_v0 }
 0x1b5   : > { %2488 = vmatpush3.bf16.msra.mxu1 %v1179_v38  ;;  %vm1558_vm7 = vcmp.ge.s32.totalorder %v3515_v26, %v3466_v16  ;;  %v3528_v38 = vadd.s32 40, %v3461_v11 }
 0x1b6   : > { %2489 = vmatprep.subr.bf16.mxu1 %v3309_v21 }
 0x1b7   : > { %vm1559_vm8 = vcmp.ge.s32.totalorder %v3528_v38, %v3466_v16 }
 0x1b9   : > { %2490 = vmatpush3.bf16.msra.mxu1 %v3309_v21 }
 0x1ba   : > { %2491 = vmatprep.subr.bf16.mxu1 %v3305_v4  ;;  %2458 = vmatpush3.bf16.xpose.msra.mxu0 %v1433_v55 }
 0x1bb   : > { %v1209_v45 = vpop.permute.xlu1 %1208  ;;  %2577 = vmatprep.subr.msk.bf16.mxu0 %vm3977_vm0, %v1190_v14  ;;  %v3464_v14 = vadd.s32 16, %v3461_v11 }
 0x1bc   : > { %2443 = vmatprep.mubr.msk.bf16.mxu1 %vm3977_vm0, %v1209_v45  ;;  %v1545_v45 = vadd.s32 72, %v3461_v11 }
 0x1bd   : > { %2492 = vmatpush3.bf16.msra.mxu1 %v3305_v4  ;;  %v968_v4 = vpop.f32.mrf.mxu0  ;;  %vm1556_vm1 = vcmp.ge.s32.totalorder %v3464_v14, %v3466_v16 }
 0x1be   : > { %2493 = vmatprep.subr.bf16.mxu1 %v3299_v51  ;;  %v1162_v53 = vadd.f32 %v1161_v52, %v968_v4  ;;  %vm1563_vm12 = vcmp.ge.s32.totalorder %v1545_v45, %v3466_v16 }
 0x1c1   : > { %2494 = vmatpush3.bf16.msra.mxu1 %v3299_v51  ;;  %v1427_v51 = vsel %vm3977_vm0, %v3359_v60, 0 }
 0x1c2   : > { %2495 = vmatprep.subr.bf16.mxu1 %v3289_v37  ;;  %2460 = vmatpush3.bf16.xpose.msra.mxu0 %v1430_v56 }
 0x1c3   : > { %v1211_v21 = vpop.permute.xlu1 %1210  ;;  %2578 = vmatprep.subr.msk.bf16.mxu0 %vm3977_vm0, %v3359_v60  ;;  %v1424_v60 = vsel %vm3977_vm0, %v3349_v39, 0 }
 0x1c4   : > { %2444 = vmatmul.mubr.msk.bf16.gmra.mxu1 %vm3977_vm0, %v1211_v21 }
 0x1c5   : > { %2496 = vmatpush3.bf16.msra.mxu1 %v3289_v37  ;;  %v1158_v37 = vadd.f32 %v1157_v6, %v964_v44 }
 0x1c6   : > { %2497 = vmatprep.subr.bf16.mxu1 %v3283_v24 }
 0x1c9   : > { %2498 = vmatpush3.bf16.msra.mxu1 %v3283_v24  ;;  %v3416_v24 = vpack.c.bf16 %v1162_v53, %v1158_v37  ;;  %v3592_v53 = vadd.s32 120, %v3461_v11  ;;  %v1548_v37 = vadd.s32 96, %v3461_v11 }
 0x1ca   : > { %2499 = vmatprep.subr.bf16.mxu1 %v3277_v10  ;;  %2462 = vmatpush3.bf16.xpose.msra.mxu0 %v1427_v51 }
 0x1cb   : > { %v1213_v57 = vpop.permute.xlu0 %1212  ;;  %2579 = vmatprep.subr.msk.bf16.mxu0 %vm3977_vm0, %v3349_v39  ;;  %vm1569_vm14 = vcmp.ge.s32.totalorder %v3592_v53, %v3466_v16  ;;  %vm1566_vm15 = vcmp.ge.s32.totalorder %v1548_v37, %v3466_v16 }
 0x1cc   : > { %2447 = vmatprep.mubr.msk.bf16.mxu1 %vm3977_vm0, %v1213_v57  ;;  %v3587_v57 = vadd.s32 112, %v3461_v11 }
 0x1cd   : > { %2500 = vmatpush3.bf16.msra.mxu1 %v3277_v10  ;;  %v1421_v10 = vsel %vm3977_vm0, %v3339_v25, 0 }
 0x1ce   : > { %2501 = vmatprep.subr.bf16.mxu1 %v3271_v59  ;;  %vm1568_vm13 = vcmp.ge.s32.totalorder %v3587_v57, %v3466_v16 }
 0x1d1   : > { %2502 = vmatpush3.bf16.msra.mxu1 %v3271_v59  ;;  %v1418_v59 = vsel %vm3977_vm0, %v3329_v5, 0 }
 0x1d2   : > { %2551 = vmatprep.subr.bf16.mxu1 %v3416_v24  ;;  %2464 = vmatpush3.bf16.xpose.msra.mxu0 %v1424_v60 }
 0x1d3   : > { %v1215_v62 = vpop.permute.xlu0 %1214  ;;  %2580 = vmatprep.subr.msk.bf16.mxu0 %vm3977_vm0, %v3339_v25  ;;  %v1415_v25 = vsel %vm3977_vm0, %v3320_v46, 0 }
 0x1d4   : > { %2448 = vmatmul.mubr.msk.bf16.gmra.mxu1 %vm3977_vm0, %v1215_v62 }
 0x1da   : > { %2466 = vmatpush3.bf16.xpose.msra.mxu0 %v1421_v10 }
 0x1db   : > { %v1217_v1 = vpop.permute.xlu0 %1216  ;;  %2581 = vmatprep.subr.msk.bf16.mxu0 %vm3977_vm0, %v3329_v5 }
 0x1dc   : > { %2451 = vmatprep.mubr.msk.bf16.mxu1 %vm3977_vm0, %v1217_v1  ;;  %v1549_v1 = vadd.s32 104, %v3461_v11 }
 0x1e2   : > { %2468 = vmatpush3.bf16.xpose.msra.mxu0 %v1418_v59 }
 0x1e3   : > { %v1219_v39 = vpop.permute.xlu0 %1218  ;;  %2582 = vmatprep.subr.msk.bf16.mxu0 %vm3977_vm0, %v3320_v46 }
 0x1e4   : > { %2452 = vmatmul.mubr.msk.bf16.gmra.mxu1 %vm3977_vm0, %v1219_v39 }
 0x1ea   : > { %2470 = vmatpush3.bf16.xpose.msra.mxu0 %v1415_v25 }
 0x1eb   : > { %v1375_v34 = vpop.permute.xlu1 %1374  ;;  %2519 = vmatprep.subr.bf16.mxu0 %v3416_v24 }
 0x1ec   : > { %2471 = vmatprep.mubr.msk.bf16.mxu0 %vm3977_vm0, %v1375_v34 }
 0x1f3   : > { %v1377_v61 = vpop.permute.xlu1 %1376 }
 0x1f4   : > { %2472 = vmatmul.mubr.msk.bf16.vlgmr.msra.gmra.mxu0 %vm3977_vm0, %v1377_v61 }
 0x1f5   : > { %2520 = vmatpush3.bf16.msra.mxu0 %v3416_v24 }
 0x1f6   : > { %2521 = vmatprep.subr.bf16.mxu0 %v3380_v41 }
 0x1f9   : > { %2522 = vmatpush3.bf16.msra.mxu0 %v3380_v41 }
 0x1fa   : > { %2523 = vmatprep.subr.bf16.mxu0 %v3369_v18 }
 0x1fb   : > { %v1379_v5 = vpop.permute.xlu1 %1378 }
 0x1fc   : > { %2475 = vmatprep.mubr.msk.bf16.mxu0 %vm3977_vm0, %v1379_v5 }
 0x1fd   : > { %2524 = vmatpush3.bf16.msra.mxu0 %v3369_v18 }
 0x1fe   : > { %2525 = vmatprep.subr.bf16.mxu0 %v3361_v2 }
 0x201   : > { %2526 = vmatpush3.bf16.msra.mxu0 %v3361_v2 }
 0x202   : > { %2527 = vmatprep.subr.bf16.mxu0 %v3351_v48 }
 0x203   : > { %v1381_v46 = vpop.permute.xlu1 %1380 }
 0x204   : > { %2476 = vmatmul.mubr.msk.bf16.gmra.mxu0 %vm3977_vm0, %v1381_v46 }
 0x205   : > { %2528 = vmatpush3.bf16.msra.mxu0 %v3351_v48 }
 0x206   : > { %2529 = vmatprep.subr.bf16.mxu0 %v3341_v32 }
 0x209   : > { %2530 = vmatpush3.bf16.msra.mxu0 %v3341_v32 }
 0x20a   : > { %2531 = vmatprep.subr.bf16.mxu0 %v3331_v12 }
 0x20b   : > { %v1383_v8 = vpop.permute.xlu0 %1382 }
 0x20c   : > { %2479 = vmatprep.mubr.msk.bf16.mxu0 %vm3977_vm0, %v1383_v8 }
 0x20d   : > { %2532 = vmatpush3.bf16.msra.mxu0 %v3331_v12 }
 0x20e   : > { %2533 = vmatprep.subr.bf16.mxu0 %v3322_v54 }
 0x211   : > { %2534 = vmatpush3.bf16.msra.mxu0 %v3322_v54 }
 0x213   : > { %v1385_v58 = vpop.permute.xlu1 %1384 }
 0x214   : > { %2480 = vmatmul.mubr.msk.bf16.gmra.mxu0 %vm3977_vm0, %v1385_v58 }
 0x21b   : > { %v1387_v3 = vpop.permute.xlu0 %1386 }
 0x21c   : > { %2483 = vmatprep.mubr.msk.bf16.mxu0 %vm3977_vm0, %v1387_v3 }
 0x223   : > { %v1389_v9 = vpop.permute.xlu1 %1388 }
 0x224   : > { %2484 = vmatmul.mubr.msk.bf16.gmra.mxu0 %vm3977_vm0, %v1389_v9  ;;  %vm1567_vm0 = vcmp.ge.s32.totalorder %v1549_v1, %v3466_v16 }
 0x274   : > { %v2441_v7 = vpop.f32.mrf.mxu1 }
 0x275   : > { %v3476_v20 = vsel %vm1556_vm1, %v2441_v7, -1e+30 }
 0x276   : > { %v1303_v19 = vpop.f32.mrf.mxu1  ;;  %1638 = vmax.xlane.f32.xlu0 %v3476_v20 }
 0x277   : > { %v3489_v29 = vsel %vm1554_vm2, %v1303_v19, -1e+30 }
 0x278   : > { %v2442_v15 = vpop.f32.mrf.mxu1 }
 0x279   : > { %v3503_v27 = vsel %vm1557_vm4, %v2442_v15, -1e+30 }
 0x27a   : > { %v1306_v31 = vpop.f32.mrf.mxu1  ;;  %1634 = vmax.xlane.f32.xlu0 %v3489_v29 }
 0x27b   : > { %v3497_v63 = vsel %vm1555_vm3, %v1306_v31, -1e+30 }
 0x27c   : > { %1636 = vmax.xlane.f32.xlu1 %v3497_v63 }
 0x27e   : > { %1640 = vmax.xlane.f32.xlu0 %v3503_v27 }
 0x284   : > { %v2445_v36 = vpop.f32.mrf.mxu1 }
 0x285   : > { %v3520_v6 = vsel %vm1560_vm5, %v2445_v36, -1e+30 }
 0x286   : > { %v1319_v33 = vpop.f32.mrf.mxu1  ;;  %1646 = vmax.xlane.f32.xlu1 %v3520_v6 }
 0x287   : > { %v3538_v50 = vsel %vm1558_vm7, %v1319_v33, -1e+30 }
 0x288   : > { %v2446_v43 = vpop.f32.mrf.mxu1 }
 0x289   : > { %v3533_v44 = vsel %vm1561_vm6, %v2446_v43, -1e+30 }
 0x28a   : > { %v1322_v30 = vpop.f32.mrf.mxu1  ;;  %1648 = vmax.xlane.f32.xlu0 %v3533_v44  ;;  %1642 = vmax.xlane.f32.xlu1 %v3538_v50 }
 0x28b   : > { %v3547_v47 = vsel %vm1559_vm8, %v1322_v30, -1e+30 }
 0x28e   : > { %1644 = vmax.xlane.f32.xlu0 %v3547_v47 }
 0x294   : > { %v2449_v49 = vpop.f32.mrf.mxu1 }
 0x295   : > { %v3560_v0 = vsel %vm1564_vm9, %v2449_v49, -1e+30 }
 0x296   : > { %v1335_v55 = vpop.f32.mrf.mxu1  ;;  %1654 = vmax.xlane.f32.xlu1 %v3560_v0 }
 0x297   : > { %v3576_v4 = vsel %vm1562_vm11, %v1335_v55, -1e+30 }
 0x298   : > { %v2450_v56 = vpop.f32.mrf.mxu1 }
 0x299   : > { %v3571_v21 = vsel %vm1565_vm10, %v2450_v56, -1e+30 }
 0x29a   : > { %v1338_v51 = vpop.f32.mrf.mxu1  ;;  %1656 = vmax.xlane.f32.xlu0 %v3571_v21  ;;  %1650 = vmax.xlane.f32.xlu1 %v3576_v4 }
 0x29b   : > { %v3583_v52 = vsel %vm1563_vm12, %v1338_v51, -1e+30 }
 0x29e   : > { %1652 = vmax.xlane.f32.xlu0 %v3583_v52 }
 0x2a4   : > { %v2453_v60 = vpop.f32.mrf.mxu1 }
 0x2a5   : > { %v3598_v62 = vsel %vm1568_vm13, %v2453_v60, -1e+30 }
 0x2a6   : > { %v1351_v10 = vpop.f32.mrf.mxu1  ;;  %1662 = vmax.xlane.f32.xlu1 %v3598_v62 }
 0x2a7   : > { %v3612_v25 = vsel %vm1566_vm15, %v1351_v10, -1e+30 }
 0x2a8   : > { %v2454_v59 = vpop.f32.mrf.mxu1 }
 0x2a9   : > { %v3608_v39 = vsel %vm1569_vm14, %v2454_v59, -1e+30 }
 0x2aa   : > { %v1354_v34 = vpop.f32.mrf.mxu1  ;;  %1664 = vmax.xlane.f32.xlu0 %v3608_v39  ;;  %1658 = vmax.xlane.f32.xlu1 %v3612_v25 }
 0x2ab   : > { %v3619_v61 = vsel %vm1567_vm0, %v1354_v34, -1e+30 }
 0x2ae   : > { %1660 = vmax.xlane.f32.xlu0 %v3619_v61 }
 0x2b4   : > { %v2473_v5 = vpop.f32.mrf.mxu0 }
 0x2b5   : > { %v3625_v46 = vsel %vm1556_vm1, %v2473_v5, -1e+30 }
 0x2b6   : > { %1670 = vmax.xlane.f32.xlu1 %v3625_v46  ;;  %v1472_v8 = vpop.f32.mrf.mxu0 }
 0x2b7   : > { %v3631_v3 = vsel %vm1554_vm2, %v1472_v8, -1e+30 }
 0x2b8   : > { %v2474_v58 = vpop.f32.mrf.mxu0 }
 0x2b9   : > { %v3636_v9 = vsel %vm1557_vm4, %v2474_v58, -1e+30 }
 0x2ba   : > { %1666 = vmax.xlane.f32.xlu1 %v3631_v3  ;;  %1672 = vmax.xlane.f32.xlu0 %v3636_v9  ;;  %v1475_v13 = vpop.f32.mrf.mxu0 }
 0x2bb   : > { %v3643_v14 = vsel %vm1555_vm3, %v1475_v13, -1e+30 }
 0x2be   : > { %1668 = vmax.xlane.f32.xlu0 %v3643_v14 }
 0x2c4   : > { %v2477_v11 = vpop.f32.mrf.mxu0 }
 0x2c5   : > { %v3678_v42 = vsel %vm1560_vm5, %v2477_v11, -1e+30 }
 0x2c6   : > { %v1488_v7 = vpop.f32.mrf.mxu0 }
 0x2c7   : > { %v3649_v19 = vsel %vm1558_vm7, %v1488_v7, -1e+30 }
 0x2c8   : > { %1674 = vmax.xlane.f32.xlu1 %v3649_v19  ;;  %v2478_v28 = vpop.f32.mrf.mxu0 }
 0x2c9   : > { %v3689_v22 = vsel %vm1561_vm6, %v2478_v28, -1e+30 }
 0x2ca   : > { %v1491_v15 = vpop.f32.mrf.mxu0 }
 0x2cb   : > { %v3655_v31 = vsel %vm1559_vm8, %v1491_v15, -1e+30 }
 0x2cc   : > { %1676 = vmax.xlane.f32.xlu0 %v3655_v31 }
 0x2d4   : > { %v2481_v17 = vpop.f32.mrf.mxu0 }
 0x2d5   : > { %v3660_v36 = vsel %vm1564_vm9, %v2481_v17, -1e+30 }
 0x2d6   : > { %1686 = vmax.xlane.f32.xlu1 %v3660_v36  ;;  %v1504_v26 = vpop.f32.mrf.mxu0 }
 0x2d7   : > { %v3666_v43 = vsel %vm1562_vm11, %v1504_v26, -1e+30 }
 0x2d8   : > { %v2482_v33 = vpop.f32.mrf.mxu0 }
 0x2d9   : > { %v3671_v38 = vsel %vm1565_vm10, %v2482_v33, -1e+30 }
 0x2da   : > { %1682 = vmax.xlane.f32.xlu1 %v3666_v43  ;;  %1688 = vmax.xlane.f32.xlu0 %v3671_v38  ;;  %v1507_v30 = vpop.f32.mrf.mxu0 }
 0x2db   : > { %v3682_v40 = vsel %vm1563_vm12, %v1507_v30, -1e+30 }
 0x2de   : > { %1678 = vmax.xlane.f32.xlu1 %v3678_v42  ;;  %1684 = vmax.xlane.f32.xlu0 %v3682_v40 }
 0x2e2   : > { %1680 = vmax.xlane.f32.xlu0 %v3689_v22 }
 0x2e4   : > { %v2485_v49 = vpop.f32.mrf.mxu0 }
 0x2e5   : > { %v3700_v51 = vsel %vm1568_vm13, %v2485_v49, -1e+30 }
 0x2e6   : > { %v1520_v55 = vpop.f32.mrf.mxu0 }
 0x2e7   : > { %v3694_v35 = vsel %vm1566_vm15, %v1520_v55, -1e+30 }
 0x2e8   : > { %1690 = vmax.xlane.f32.xlu1 %v3694_v35  ;;  %v2486_v45 = vpop.f32.mrf.mxu0 }
 0x2e9   : > { %v3711_v37 = vsel %vm1569_vm14, %v2486_v45, -1e+30 }
 0x2ea   : > { %v1523_v56 = vpop.f32.mrf.mxu0 }
 0x2eb   : > { %v3704_v23 = vsel %vm1567_vm0, %v1523_v56, -1e+30  ;;  %vm3982_vm0 = vcmask 523264  }
 0x2ec   : > { %1694 = vmax.xlane.f32.xlu1 %v3700_v51  ;;  %1692 = vmax.xlane.f32.xlu0 %v3704_v23  ;;  %vm3983_vm1 = vmmov %vm3982_vm0 }
 0x2ed   : > { %vm3984_vm2 = vmmov %vm3982_vm0 }
 0x2ee   : > { %vm3985_vm3 = vmmov %vm3982_vm0 }
 0x2ef   : > { %vm3986_vm4 = vmmov %vm3982_vm0 }
 0x2f0   : > { %1696 = vmax.xlane.f32.xlu0 %v3711_v37  ;;  %vm3987_vm5 = vmmov %vm3982_vm0 }
 0x2f1   : > { %vm3988_vm6 = vmmov %vm3982_vm0 }
 0x2f2   : > { %vm3989_vm7 = vmmov %vm3982_vm0 }
 0x2f3   : > { %vm3990_vm8 = vmmov %vm3982_vm0 }
 0x2f4   : > { %vm3991_vm9 = vmmov %vm3982_vm0 }
 0x2f5   : > { %vm3992_vm10 = vmmov %vm3982_vm0 }
 0x2f6   : > { %vm3993_vm11 = vmmov %vm3982_vm0 }
 0x2f7   : > { %vm3994_vm12 = vmmov %vm3982_vm0 }
 0x2f8   : > { %vm3995_vm13 = vmmov %vm3982_vm0 }
 0x2f9   : > { %vm3996_vm14 = vmmov %vm3982_vm0 }
 0x2fa   : > { %vm3997_vm15 = vmmov %vm3982_vm0 }
 0x2ff   : > { %v1639_v60 = vpop.xlane.xlu0 %1638 }
 0x300   : > { %v1700_v57 = vsub.f32 %v3476_v20, %v1639_v60 }
 0x302   : > { %v1734_v10 = vmul.f32 1.442695, %v1700_v57 }
 0x303   : > { %v1635_v59 = vpop.xlane.xlu0 %1634 }
 0x304   : > { %2765 = vpow2.f32 %v1734_v10  ;;  %v1698_v1 = vsub.f32 %v3489_v29, %v1635_v59 }
 0x305   : > { %v1637_v34 = vpop.xlane.xlu1 %1636 }
 0x306   : > { %v1730_v5 = vmul.f32 1.442695, %v1698_v1  ;;  %v1699_v58 = vsub.f32 %v3497_v63, %v1637_v34 }
 0x307   : > { %v1641_v8 = vpop.xlane.xlu0 %1640 }
 0x308   : > { %2767 = vpow2.f32 %v1730_v5  ;;  %v1701_v16 = vsub.f32 %v3503_v27, %v1641_v8  ;;  %v1732_v13 = vmul.f32 1.442695, %v1699_v58 }
 0x30a   : > { %v1736_v53 = vmul.f32 1.442695, %v1701_v16 }
 0x30c   : > { %2769 = vpow2.f32 %v1736_v53 }
 0x30d   : > { %2771 = vpow2.f32 %v1732_v13 }
 0x30f   : > { %v1647_v11 = vpop.xlane.xlu1 %1646 }
 0x310   : > { %v1704_v20 = vsub.f32 %v3520_v6, %v1647_v11 }
 0x311   : > { %v3719_v7 = vpop.eup %2765 }
 0x312   : > { %v1742_v28 = vmul.f32 1.442695, %v1704_v20  ;;  %1798 = vadd.xlane.f32.xlu1 %v3719_v7 }
 0x313   : > { %v1649_v29 = vpop.xlane.xlu0 %1648  ;;  %v1643_v15 = vpop.xlane.xlu1 %1642 }
 0x314   : > { %2773 = vpow2.f32 %v1742_v28  ;;  %v1705_v17 = vsub.f32 %v3533_v44, %v1649_v29  ;;  %v1702_v63 = vsub.f32 %v3538_v50, %v1643_v15 }
 0x315   : > { %v3724_v27 = vpop.eup %2767 }
 0x316   : > { %v1744_v26 = vmul.f32 1.442695, %v1705_v17  ;;  %v1738_v33 = vmul.f32 1.442695, %v1702_v63  ;;  %1794 = vadd.xlane.f32.xlu1 %v3724_v27 }
 0x317   : > { %v1645_v30 = vpop.xlane.xlu0 %1644 }
 0x318   : > { %2775 = vpow2.f32 %v1744_v26  ;;  %v1703_v6 = vsub.f32 %v3547_v47, %v1645_v30 }
 0x319   : > { %v3728_v49 = vpop.eup %2769  ;;  %2777 = vpow2.f32 %v1738_v33 }
 0x31a   : > { %v1740_v55 = vmul.f32 1.442695, %v1703_v6  ;;  %1800 = vadd.xlane.f32.xlu0 %v3728_v49  ;;  %v3731_v44 = vpop.eup %2771 }
 0x31c   : > { %2779 = vpow2.f32 %v1740_v55 }
 0x31e   : > { %1796 = vadd.xlane.f32.xlu0 %v3731_v44 }
 0x31f   : > { %v1655_v50 = vpop.xlane.xlu1 %1654 }
 0x320   : > { %v1708_v45 = vsub.f32 %v3560_v0, %v1655_v50 }
 0x321   : > { %v3735_v56 = vpop.eup %2773 }
 0x322   : > { %v1750_v60 = vmul.f32 1.442695, %v1708_v45  ;;  %1806 = vadd.xlane.f32.xlu1 %v3735_v56 }
 0x323   : > { %v1657_v47 = vpop.xlane.xlu0 %1656  ;;  %v1651_v57 = vpop.xlane.xlu1 %1650 }
 0x324   : > { %2781 = vpow2.f32 %v1750_v60  ;;  %v1709_v10 = vsub.f32 %v3571_v21, %v1657_v47  ;;  %v1706_v59 = vsub.f32 %v3576_v4, %v1651_v57 }
 0x325   : > { %v3740_v1 = vpop.eup %2775 }
 0x326   : > { %v3742_v34 = vpop.eup %2777  ;;  %v1752_v5 = vmul.f32 1.442695, %v1709_v10  ;;  %v1746_v8 = vmul.f32 1.442695, %v1706_v59  ;;  %1808 = vadd.xlane.f32.xlu0 %v3740_v1 }
 0x327   : > { %1802 = vadd.xlane.f32.xlu1 %v3742_v34  ;;  %v1653_v0 = vpop.xlane.xlu0 %1652 }
 0x328   : > { %2783 = vpow2.f32 %v1752_v5  ;;  %v1707_v58 = vsub.f32 %v3583_v52, %v1653_v0 }
 0x329   : > { %v3747_v16 = vpop.eup %2779  ;;  %2785 = vpow2.f32 %v1746_v8 }
 0x32a   : > { %v1748_v21 = vmul.f32 1.442695, %v1707_v58  ;;  %1804 = vadd.xlane.f32.xlu0 %v3747_v16 }
 0x32c   : > { %2787 = vpow2.f32 %v1748_v21 }
 0x32f   : > { %v1663_v4 = vpop.xlane.xlu1 %1662 }
 0x330   : > { %v1712_v53 = vsub.f32 %v3598_v62, %v1663_v4 }
 0x331   : > { %v3751_v13 = vpop.eup %2781 }
 0x332   : > { %v1758_v11 = vmul.f32 1.442695, %v1712_v53  ;;  %1814 = vadd.xlane.f32.xlu1 %v3751_v13 }
 0x333   : > { %v1665_v20 = vpop.xlane.xlu0 %1664  ;;  %v1659_v28 = vpop.xlane.xlu1 %1658 }
 0x334   : > { %2789 = vpow2.f32 %v1758_v11  ;;  %v1713_v52 = vsub.f32 %v3608_v39, %v1665_v20  ;;  %v1710_v29 = vsub.f32 %v3612_v25, %v1659_v28 }
 0x335   : > { %v3756_v15 = vpop.eup %2783 }
 0x336   : > { %v3758_v17 = vpop.eup %2785  ;;  %v1760_v63 = vmul.f32 1.442695, %v1713_v52  ;;  %v1754_v26 = vmul.f32 1.442695, %v1710_v29  ;;  %1816 = vadd.xlane.f32.xlu0 %v3756_v15 }
 0x337   : > { %1810 = vadd.xlane.f32.xlu1 %v3758_v17  ;;  %v1661_v62 = vpop.xlane.xlu0 %1660 }
 0x338   : > { %2791 = vpow2.f32 %v1760_v63  ;;  %v1711_v33 = vsub.f32 %v3619_v61, %v1661_v62 }
 0x339   : > { %v3763_v30 = vpop.eup %2787  ;;  %2793 = vpow2.f32 %v1754_v26 }
 0x33a   : > { %v1756_v39 = vmul.f32 1.442695, %v1711_v33  ;;  %1812 = vadd.xlane.f32.xlu0 %v3763_v30 }
 0x33c   : > { %2795 = vpow2.f32 %v1756_v39 }
 0x33f   : > { %v1671_v25 = vpop.xlane.xlu1 %1670 }
 0x340   : > { %v1716_v6 = vsub.f32 %v3625_v46, %v1671_v25 }
 0x341   : > { %v3767_v55 = vpop.eup %2789 }
 0x342   : > { %v1766_v50 = vmul.f32 1.442695, %v1716_v6  ;;  %1822 = vadd.xlane.f32.xlu1 %v3767_v55 }
 0x343   : > { %v1667_v45 = vpop.xlane.xlu1 %1666  ;;  %v1673_v60 = vpop.xlane.xlu0 %1672 }
 0x344   : > { %2797 = vpow2.f32 %v1766_v50  ;;  %v1714_v61 = vsub.f32 %v3631_v3, %v1667_v45  ;;  %v1717_v47 = vsub.f32 %v3636_v9, %v1673_v60 }
 0x345   : > { %v3772_v57 = vpop.eup %2791 }
 0x346   : > { %v3774_v10 = vpop.eup %2793  ;;  %v1762_v59 = vmul.f32 1.442695, %v1714_v61  ;;  %v1768_v5 = vmul.f32 1.442695, %v1717_v47  ;;  %1824 = vadd.xlane.f32.xlu0 %v3772_v57 }
 0x347   : > { %1818 = vadd.xlane.f32.xlu1 %v3774_v10  ;;  %v1669_v46 = vpop.xlane.xlu0 %1668 }
 0x348   : > { %2799 = vpow2.f32 %v1762_v59  ;;  %v1715_v8 = vsub.f32 %v3643_v14, %v1669_v46 }
 0x349   : > { %v3779_v0 = vpop.eup %2795  ;;  %2801 = vpow2.f32 %v1768_v5 }
 0x34a   : > { %v1764_v3 = vmul.f32 1.442695, %v1715_v8  ;;  %1820 = vadd.xlane.f32.xlu0 %v3779_v0 }
 0x34c   : > { %2803 = vpow2.f32 %v1764_v3 }
 0x351   : > { %v3782_v9 = vpop.eup %2797  ;;  %v1675_v58 = vpop.xlane.xlu1 %1674 }
 0x352   : > { %v1718_v21 = vsub.f32 %v3649_v19, %v1675_v58  ;;  %1830 = vadd.xlane.f32.xlu1 %v3782_v9 }
 0x354   : > { %v1770_v4 = vmul.f32 1.442695, %v1718_v21 }
 0x355   : > { %v3786_v53 = vpop.eup %2799  ;;  %v1677_v11 = vpop.xlane.xlu0 %1676 }
 0x356   : > { %v3788_v20 = vpop.eup %2801  ;;  %2805 = vpow2.f32 %v1770_v4  ;;  %v1719_v14 = vsub.f32 %v3655_v31, %v1677_v11  ;;  %1826 = vadd.xlane.f32.xlu1 %v3786_v53 }
 0x357   : > { %1832 = vadd.xlane.f32.xlu0 %v3788_v20 }
 0x358   : > { %v1772_v28 = vmul.f32 1.442695, %v1719_v14 }
 0x359   : > { %v3793_v52 = vpop.eup %2803 }
 0x35a   : > { %2807 = vpow2.f32 %v1772_v28 }
 0x35b   : > { %1828 = vadd.xlane.f32.xlu0 %v3793_v52 }
 0x35f   : > { %v1687_v19 = vpop.xlane.xlu1 %1686 }
 0x360   : > { %v1724_v29 = vsub.f32 %v3660_v36, %v1687_v19 }
 0x362   : > { %v1782_v63 = vmul.f32 1.442695, %v1724_v29 }
 0x363   : > { %v3797_v26 = vpop.eup %2805  ;;  %v1683_v62 = vpop.xlane.xlu1 %1682 }
 0x364   : > { %v1689_v33 = vpop.xlane.xlu0 %1688  ;;  %2809 = vpow2.f32 %v1782_v63  ;;  %v1722_v31 = vsub.f32 %v3666_v43, %v1683_v62  ;;  %1834 = vadd.xlane.f32.xlu1 %v3797_v26 }
 0x365   : > { %v1725_v39 = vsub.f32 %v3671_v38, %v1689_v33 }
 0x366   : > { %v1778_v25 = vmul.f32 1.442695, %v1722_v31 }
 0x367   : > { %v1784_v6 = vmul.f32 1.442695, %v1725_v39  ;;  %v3802_v50 = vpop.eup %2807  ;;  %v1679_v45 = vpop.xlane.xlu1 %1678 }
 0x368   : > { %v1685_v60 = vpop.xlane.xlu0 %1684  ;;  %2811 = vpow2.f32 %v1778_v25  ;;  %v1720_v36 = vsub.f32 %v3678_v42, %v1679_v45  ;;  %1836 = vadd.xlane.f32.xlu0 %v3802_v50 }
 0x369   : > { %v1723_v61 = vsub.f32 %v3682_v40, %v1685_v60  ;;  %2813 = vpow2.f32 %v1784_v6 }
 0x36a   : > { %v1774_v47 = vmul.f32 1.442695, %v1720_v36 }
 0x36b   : > { %v1780_v43 = vmul.f32 1.442695, %v1723_v61 }
 0x36c   : > { %v1681_v59 = vpop.xlane.xlu0 %1680  ;;  %2815 = vpow2.f32 %v1774_v47 }
 0x36d   : > { %v1721_v38 = vsub.f32 %v3689_v22, %v1681_v59  ;;  %2817 = vpow2.f32 %v1780_v43 }
 0x36f   : > { %v1776_v5 = vmul.f32 1.442695, %v1721_v38 }
 0x371   : > { %2819 = vpow2.f32 %v1776_v5  ;;  %v3808_v46 = vpop.eup %2809  ;;  %v1691_v8 = vpop.xlane.xlu1 %1690 }
 0x372   : > { %v1726_v3 = vsub.f32 %v3694_v35, %v1691_v8  ;;  %1846 = vadd.xlane.f32.xlu1 %v3808_v46 }
 0x374   : > { %v1786_v42 = vmul.f32 1.442695, %v1726_v3 }
 0x375   : > { %v3812_v40 = vpop.eup %2811  ;;  %v1695_v58 = vpop.xlane.xlu1 %1694 }
 0x376   : > { %v1693_v21 = vpop.xlane.xlu0 %1692  ;;  %v3814_v4 = vpop.eup %2813  ;;  %2821 = vpow2.f32 %v1786_v42  ;;  %v1728_v22 = vsub.f32 %v3700_v51, %v1695_v58  ;;  %1842 = vadd.xlane.f32.xlu1 %v3812_v40 }
 0x377   : > { %v1727_v11 = vsub.f32 %v3704_v23, %v1693_v21  ;;  %1848 = vadd.xlane.f32.xlu0 %v3814_v4 }
 0x378   : > { %v1790_v14 = vmul.f32 1.442695, %v1728_v22 }
 0x379   : > { %v1788_v35 = vmul.f32 1.442695, %v1727_v11  ;;  %v3820_v28 = vpop.eup %2815 }
 0x37a   : > { %v1697_v19 = vpop.xlane.xlu0 %1696  ;;  %v3822_v29 = vpop.eup %2817  ;;  %2823 = vpow2.f32 %v1790_v14  ;;  %1838 = vadd.xlane.f32.xlu1 %v3820_v28 }
 0x37b   : > { %v1729_v63 = vsub.f32 %v3711_v37, %v1697_v19  ;;  %2825 = vpow2.f32 %v1788_v35  ;;  %1844 = vadd.xlane.f32.xlu0 %v3822_v29 }
 0x37d   : > { %v1792_v51 = vmul.f32 1.442695, %v1729_v63 }
 0x37e   : > { %v3827_v23 = vpop.eup %2819 }
 0x37f   : > { %2827 = vpow2.f32 %v1792_v51  ;;  %1840 = vadd.xlane.f32.xlu0 %v3827_v23 }
 0x383   : > { %v3830_v62 = vpop.eup %2821 }
 0x384   : > { %1850 = vadd.xlane.f32.xlu1 %v3830_v62 }
 0x387   : > { %v3833_v33 = vpop.eup %2823 }
 0x388   : > { %v3835_v31 = vpop.eup %2825  ;;  %1854 = vadd.xlane.f32.xlu1 %v3833_v33 }
 0x389   : > { %1852 = vadd.xlane.f32.xlu0 %v3835_v31 }
 0x38c   : > { %v3839_v37 = vpop.eup %2827 }
 0x38d   : > { %1856 = vadd.xlane.f32.xlu0 %v3839_v37 }
 0x39b   : > { %v1799_v39 = vpop.xlane.xlu1 %1798 }
 0x39f   : > { %v1795_v25 = vpop.xlane.xlu1 %1794 }
 0x3a3   : > { %v1801_v6 = vpop.xlane.xlu0 %1800 }
 0x3a4   : > { %2829 = vrcp.f32 %v1801_v6 }
 0x3a5   : > { %2831 = vrcp.f32 %v1795_v25 }
 0x3a6   : > { %2833 = vrcp.f32 %v1799_v39 }
 0x3a7   : > { %v1797_v45 = vpop.xlane.xlu0 %1796 }
 0x3a8   : > { %2835 = vrcp.f32 %v1797_v45 }
 0x3ab   : > { %v1807_v60 = vpop.xlane.xlu1 %1806 }
 0x3af   : > { %v1809_v36 = vpop.xlane.xlu0 %1808 }
 0x3b0   : > { %v1803_v61 = vpop.xlane.xlu1 %1802  ;;  %2837 = vrcp.f32 %v1809_v36 }
 0x3b1   : > { %v2830_v47 = vpop.eup %2829  ;;  %2839 = vrcp.f32 %v1803_v61 }
 0x3b2   : > { %v2832_v43 = vpop.eup %2831  ;;  %2841 = vrcp.f32 %v1807_v60  ;;  %v1893_v8 = vmul.f32 %v2830_v47, %v3728_v49 }
 0x3b3   : > { %v1805_v59 = vpop.xlane.xlu0 %1804  ;;  %v2834_v38 = vpop.eup %2833  ;;  %v1890_v3 = vmul.f32 %v2832_v43, %v3724_v27 }
 0x3b4   : > { %2843 = vrcp.f32 %v1805_v59  ;;  %v1892_v58 = vmul.f32 %v2834_v38, %v3719_v7 }
 0x3b5   : > { %v2836_v5 = vpop.eup %2835 }
 0x3b6   : > { %v1891_v42 = vmul.f32 %v2836_v5, %v3731_v44  ;;  %v1923_v22 = vpack.c.bf16 %v1893_v8, %v1892_v58 }
 0x3b8   : > { %v1922_v21 = vpack.c.bf16 %v1891_v42, %v1890_v3 }
 0x3ba   : > { %2503 = vmatprep.mubr.bf16.mxu1 %v1922_v21 }
 0x3bb   : > { %v1815_v11 = vpop.xlane.xlu1 %1814  ;;  %2504 = vmatmul.mubr.bf16.vlgmr.msra.gmra.mxu1 %v1923_v22 }
 0x3bc   : > { %2559 = vmatpush3.bf16.msra.mxu1 %v3416_v24 }
 0x3bd   : > { %2552 = vmatprep.subr.bf16.mxu1 %v3380_v41  ;;  %v2838_v14 = vpop.eup %2837 }
 0x3be   : > { %v2840_v35 = vpop.eup %2839  ;;  %v1897_v7 = vmul.f32 %v2838_v14, %v3740_v1 }
 0x3bf   : > { %v1817_v19 = vpop.xlane.xlu0 %1816  ;;  %v2842_v63 = vpop.eup %2841  ;;  %v1894_v44 = vmul.f32 %v2840_v35, %v3742_v34 }
 0x3c0   : > { %v1811_v49 = vpop.xlane.xlu1 %1810  ;;  %2560 = vmatpush3.bf16.msra.mxu1 %v3380_v41  ;;  %2845 = vrcp.f32 %v1817_v19  ;;  %v1896_v39 = vmul.f32 %v2842_v63, %v3735_v56 }
 0x3c1   : > { %v2844_v27 = vpop.eup %2843  ;;  %2553 = vmatprep.subr.bf16.mxu1 %v3369_v18  ;;  %2847 = vrcp.f32 %v1811_v49 }
 0x3c2   : > { %v1895_v24 = vmul.f32 %v2844_v27, %v3747_v16  ;;  %2849 = vrcp.f32 %v1815_v11  ;;  %v1925_v41 = vpack.c.bf16 %v1897_v7, %v1896_v39 }
 0x3c3   : > { %v1813_v51 = vpop.xlane.xlu0 %1812 }
 0x3c4   : > { %2851 = vrcp.f32 %v1813_v51  ;;  %2561 = vmatpush3.bf16.msra.mxu1 %v3369_v18  ;;  %v1924_v25 = vpack.c.bf16 %v1895_v24, %v1894_v44 }
 0x3c5   : > { %2554 = vmatprep.subr.bf16.mxu1 %v3361_v2 }
 0x3c6   : > { %2507 = vmatprep.mubr.bf16.mxu1 %v1924_v25 }
 0x3c7   : > { %2508 = vmatmul.mubr.bf16.gmra.mxu1 %v1925_v41 }
 0x3c8   : > { %2562 = vmatpush3.bf16.msra.mxu1 %v3361_v2 }
 0x3c9   : > { %2555 = vmatprep.subr.bf16.mxu1 %v3351_v48 }
 0x3cb   : > { %v1823_v1 = vpop.xlane.xlu1 %1822 }
 0x3cc   : > { %2563 = vmatpush3.bf16.msra.mxu1 %v3351_v48 }
 0x3cd   : > { %2556 = vmatprep.subr.bf16.mxu1 %v3341_v32  ;;  %v2846_v34 = vpop.eup %2845 }
 0x3ce   : > { %v2848_v56 = vpop.eup %2847  ;;  %v1901_v2 = vmul.f32 %v2846_v34, %v3756_v15 }
 0x3cf   : > { %v1825_v16 = vpop.xlane.xlu0 %1824  ;;  %v2850_v6 = vpop.eup %2849  ;;  %v1898_v60 = vmul.f32 %v2848_v56, %v3758_v17 }
 0x3d0   : > { %v1819_v18 = vpop.xlane.xlu1 %1818  ;;  %2564 = vmatpush3.bf16.msra.mxu1 %v3341_v32  ;;  %2853 = vrcp.f32 %v1825_v16  ;;  %v1900_v61 = vmul.f32 %v2850_v6, %v3751_v13 }
 0x3d1   : > { %v2852_v45 = vpop.eup %2851  ;;  %2557 = vmatprep.subr.bf16.mxu1 %v3331_v12  ;;  %2855 = vrcp.f32 %v1819_v18 }
 0x3d2   : > { %v1899_v48 = vmul.f32 %v2852_v45, %v3763_v30  ;;  %2857 = vrcp.f32 %v1823_v1  ;;  %v1927_v32 = vpack.c.bf16 %v1901_v2, %v1900_v61 }
 0x3d3   : > { %v1821_v36 = vpop.xlane.xlu0 %1820 }
 0x3d4   : > { %2859 = vrcp.f32 %v1821_v36  ;;  %2565 = vmatpush3.bf16.msra.mxu1 %v3331_v12  ;;  %v1926_v47 = vpack.c.bf16 %v1899_v48, %v1898_v60 }
 0x3d5   : > { %2558 = vmatprep.subr.bf16.mxu1 %v3322_v54 }
 0x3d6   : > { %2511 = vmatprep.mubr.bf16.mxu1 %v1926_v47 }
 0x3d7   : > { %2512 = vmatmul.mubr.bf16.gmra.mxu1 %v1927_v32 }
 0x3d8   : > { %2566 = vmatpush3.bf16.msra.mxu1 %v3322_v54 }
 0x3db   : > { %v1831_v15 = vpop.xlane.xlu1 %1830 }
 0x3dd   : > { %v2854_v43 = vpop.eup %2853 }
 0x3de   : > { %v2856_v17 = vpop.eup %2855  ;;  %v1905_v13 = vmul.f32 %v2854_v43, %v3772_v57 }
 0x3df   : > { %v2858_v59 = vpop.eup %2857  ;;  %v1827_v30 = vpop.xlane.xlu1 %1826  ;;  %v1902_v12 = vmul.f32 %v2856_v17, %v3774_v10 }
 0x3e0   : > { %v1833_v38 = vpop.xlane.xlu0 %1832  ;;  %v1904_v3 = vmul.f32 %v2858_v59, %v3767_v55 }
 0x3e1   : > { %v2860_v5 = vpop.eup %2859  ;;  %2861 = vrcp.f32 %v1833_v38 }
 0x3e2   : > { %v1903_v8 = vmul.f32 %v2860_v5, %v3779_v0  ;;  %2863 = vrcp.f32 %v1827_v30  ;;  %v1929_v58 = vpack.c.bf16 %v1905_v13, %v1904_v3 }
 0x3e3   : > { %2865 = vrcp.f32 %v1831_v15 }
 0x3e4   : > { %v1829_v42 = vpop.xlane.xlu0 %1828  ;;  %v1928_v54 = vpack.c.bf16 %v1903_v8, %v1902_v12 }
 0x3e5   : > { %2867 = vrcp.f32 %v1829_v42 }
 0x3e6   : > { %2515 = vmatprep.mubr.bf16.mxu1 %v1928_v54 }
 0x3e7   : > { %2516 = vmatmul.mubr.bf16.gmra.mxu1 %v1929_v58 }
 0x3ed   : > { %v1835_v21 = vpop.xlane.xlu1 %1834 }
 0x3ee   : > { %v2862_v22 = vpop.eup %2861  ;;  %2869 = vrcp.f32 %v1835_v21 }
 0x3ef   : > { %v2864_v11 = vpop.eup %2863  ;;  %v1909_v10 = vmul.f32 %v2862_v22, %v3788_v20 }
 0x3f0   : > { %v2866_v57 = vpop.eup %2865  ;;  %v1906_v0 = vmul.f32 %v2864_v11, %v3786_v53 }
 0x3f1   : > { %v1837_v14 = vpop.xlane.xlu0 %1836  ;;  %v1908_v19 = vmul.f32 %v2866_v57, %v3782_v9 }
 0x3f2   : > { %v2868_v35 = vpop.eup %2867  ;;  %2871 = vrcp.f32 %v1837_v14 }
 0x3f3   : > { %v1907_v55 = vmul.f32 %v2868_v35, %v3793_v52  ;;  %v1931_v49 = vpack.c.bf16 %v1909_v10, %v1908_v19 }
 0x3f5   : > { %v1930_v63 = vpack.c.bf16 %v1907_v55, %v1906_v0 }
 0x3f7   : > { %2535 = vmatprep.mubr.bf16.mxu0 %v1930_v63 }
 0x3f8   : > { %2536 = vmatmul.mubr.bf16.vlgmr.msra.gmra.mxu0 %v1931_v49 }
 0x3fb   : > { %v1847_v27 = vpop.xlane.xlu1 %1846  ;;  %v2870_v7 = vpop.eup %2869 }
 0x3fc   : > { %v1910_v39 = vmul.f32 %v2870_v7, %v3797_v26 }
 0x3ff   : > { %v2872_v44 = vpop.eup %2871  ;;  %v1843_v24 = vpop.xlane.xlu1 %1842 }
 0x400   : > { %v1849_v51 = vpop.xlane.xlu0 %1848  ;;  %v1911_v25 = vmul.f32 %v2872_v44, %v3802_v50 }
 0x401   : > { %2873 = vrcp.f32 %v1849_v51 }
 0x402   : > { %v1932_v20 = vpack.c.bf16 %v1911_v25, %v1910_v39  ;;  %2875 = vrcp.f32 %v1843_v24 }
 0x403   : > { %2877 = vrcp.f32 %v1847_v27  ;;  %v1839_v53 = vpop.xlane.xlu1 %1838 }
 0x404   : > { %v1845_v52 = vpop.xlane.xlu0 %1844  ;;  %2539 = vmatprep.mubr.bf16.mxu0 %v1932_v20 }
 0x405   : > { %2879 = vrcp.f32 %v1845_v52 }
 0x406   : > { %2881 = vrcp.f32 %v1839_v53 }
 0x408   : > { %v1841_v9 = vpop.xlane.xlu0 %1840 }
 0x409   : > { %2883 = vrcp.f32 %v1841_v9 }
 0x40d   : > { %v1851_v41 = vpop.xlane.xlu1 %1850 }
 0x40e   : > { %v2874_v1 = vpop.eup %2873  ;;  %2885 = vrcp.f32 %v1851_v41 }
 0x40f   : > { %v2876_v34 = vpop.eup %2875  ;;  %v1917_v50 = vmul.f32 %v2874_v1, %v3814_v4 }
 0x410   : > { %v2878_v56 = vpop.eup %2877  ;;  %v1914_v18 = vmul.f32 %v2876_v34, %v3812_v40 }
 0x411   : > { %v1855_v26 = vpop.xlane.xlu1 %1854  ;;  %v1916_v60 = vmul.f32 %v2878_v56, %v3808_v46 }
 0x412   : > { %v2880_v16 = vpop.eup %2879  ;;  %v1853_v6 = vpop.xlane.xlu0 %1852 }
 0x413   : > { %2887 = vrcp.f32 %v1853_v6  ;;  %v1915_v45 = vmul.f32 %v2880_v16, %v3822_v29  ;;  %v2882_v2 = vpop.eup %2881  ;;  %v1935_v47 = vpack.c.bf16 %v1917_v50, %v1916_v60 }
 0x414   : > { %2889 = vrcp.f32 %v1855_v26  ;;  %v1912_v32 = vmul.f32 %v2882_v2, %v3820_v28 }
 0x415   : > { %v1934_v48 = vpack.c.bf16 %v1915_v45, %v1914_v18 }
 0x416   : > { %v2884_v36 = vpop.eup %2883  ;;  %v1857_v61 = vpop.xlane.xlu0 %1856 }
 0x417   : > { %2891 = vrcp.f32 %v1857_v61  ;;  %2543 = vmatprep.mubr.bf16.mxu1 %v1934_v48  ;;  %v1913_v15 = vmul.f32 %v2884_v36, %v3827_v23 }
 0x418   : > { %2544 = vmatmul.mubr.bf16.vlgmr.msra.gmra.mxu1 %v1935_v47 }
 0x419   : > { %v1933_v4 = vpack.c.bf16 %v1913_v15, %v1912_v32 }
 0x41b   : > { %2540 = vmatmul.mubr.bf16.gmra.mxu0 %v1933_v4  ;;  %v2886_v40 = vpop.eup %2885 }
 0x41c   : > { %v1918_v43 = vmul.f32 %v2886_v40, %v3830_v62 }
 0x420   : > { %v2888_v29 = vpop.eup %2887 }
 0x421   : > { %v1919_v46 = vmul.f32 %v2888_v29, %v3835_v31  ;;  %v2890_v17 = vpop.eup %2889 }
 0x422   : > { %v1920_v38 = vmul.f32 %v2890_v17, %v3833_v33 }
 0x423   : > { %v1936_v59 = vpack.c.bf16 %v1919_v46, %v1918_v43 }
 0x424   : > { %v2892_v30 = vpop.eup %2891 }
 0x425   : > { %2547 = vmatprep.mubr.bf16.mxu1 %v1936_v59  ;;  %v1921_v28 = vmul.f32 %v2892_v30, %v3839_v37 }
 0x427   : > { %v1937_v5 = vpack.c.bf16 %v1921_v28, %v1920_v38 }
 0x429   : > { %2548 = vmatmul.mubr.bf16.gmra.mxu1 %v1937_v5 }
 0x47b   : > { %v2505_v23 = vpop.f32.mrf.mxu1 }
 0x47c   : > { %2134 = vst.msk [vmem:[%s3894_s16 + $0x10] sm:$0xff] %vm3982_vm0, %v2505_v23 }
 0x47d   : > { %v1972_v62 = vpop.f32.mrf.mxu1 }
 0x47e   : > { %2132 = vst.msk [vmem:[%s3894_s16] sm:$0xff] %vm3983_vm1, %v1972_v62  ;;  %vm3998_vm1 = vmmov %vm3982_vm0 }
 0x47f   : > { %v2506_v33 = vpop.f32.mrf.mxu1 }
 0x480   : > { %2135 = vst.msk [vmem:[%s3894_s16 + $0x18] sm:$0xff] %vm3984_vm2, %v2506_v33  ;;  %vm3999_vm2 = vmmov %vm3982_vm0 }
 0x481   : > { %v1975_v31 = vpop.f32.mrf.mxu1 }
 0x482   : > { %2133 = vst.msk [vmem:[%s3894_s16 + $0x8] sm:$0xff] %vm3985_vm3, %v1975_v31  ;;  %vm4000_vm3 = vmmov %vm3982_vm0 }
 0x487   : > { %v2509_v37 = vpop.f32.mrf.mxu1 }
 0x488   : > { %2138 = vst.msk [vmem:[%s3894_s16 + $0x30] sm:$0xff] %vm3986_vm4, %v2509_v37  ;;  %vm4001_vm4 = vmmov %vm3982_vm0 }
 0x489   : > { %v1988_v13 = vpop.f32.mrf.mxu1 }
 0x48a   : > { %2136 = vst.msk [vmem:[%s3894_s16 + $0x20] sm:$0xff] %vm3987_vm5, %v1988_v13  ;;  %vm4002_vm5 = vmmov %vm3982_vm0 }
 0x48b   : > { %v2510_v12 = vpop.f32.mrf.mxu1 }
 0x48c   : > { %2139 = vst.msk [vmem:[%s3894_s16 + $0x38] sm:$0xff] %vm3988_vm6, %v2510_v12  ;;  %vm4003_vm6 = vmmov %vm3982_vm0 }
 0x48d   : > { %v1991_v8 = vpop.f32.mrf.mxu1 }
 0x48e   : > { %2137 = vst.msk [vmem:[%s3894_s16 + $0x28] sm:$0xff] %vm3989_vm7, %v1991_v8  ;;  %vm4004_vm7 = vmmov %vm3982_vm0 }
 0x497   : > { %v2513_v3 = vpop.f32.mrf.mxu1 }
 0x498   : > { %2142 = vst.msk [vmem:[%s3894_s16 + $0x50] sm:$0xff] %vm3990_vm8, %v2513_v3  ;;  %vm4005_vm8 = vmmov %vm3982_vm0 }
 0x499   : > { %v2004_v42 = vpop.f32.mrf.mxu1 }
 0x49a   : > { %2140 = vst.msk [vmem:[%s3894_s16 + $0x40] sm:$0xff] %vm3991_vm9, %v2004_v42  ;;  %vm4006_vm9 = vmmov %vm3982_vm0 }
 0x49b   : > { %v2514_v54 = vpop.f32.mrf.mxu1 }
 0x49c   : > { %2143 = vst.msk [vmem:[%s3894_s16 + $0x58] sm:$0xff] %vm3992_vm10, %v2514_v54  ;;  %vm4007_vm10 = vmmov %vm3982_vm0 }
 0x49d   : > { %v2007_v58 = vpop.f32.mrf.mxu1 }
 0x49e   : > { %2141 = vst.msk [vmem:[%s3894_s16 + $0x48] sm:$0xff] %vm3993_vm11, %v2007_v58  ;;  %vm4008_vm11 = vmmov %vm3982_vm0 }
 0x4a7   : > { %v2517_v21 = vpop.f32.mrf.mxu1 }
 0x4a8   : > { %2146 = vst.msk [vmem:[%s3894_s16 + $0x70] sm:$0xff] %vm3994_vm12, %v2517_v21  ;;  %vm4009_vm12 = vmmov %vm3982_vm0 }
 0x4a9   : > { %v2020_v22 = vpop.f32.mrf.mxu1 }
 0x4aa   : > { %2144 = vst.msk [vmem:[%s3894_s16 + $0x60] sm:$0xff] %vm3995_vm13, %v2020_v22  ;;  %vm4010_vm13 = vmmov %vm3982_vm0 }
 0x4ab   : > { %v2518_v11 = vpop.f32.mrf.mxu1 }
 0x4ac   : > { %2147 = vst.msk [vmem:[%s3894_s16 + $0x78] sm:$0xff] %vm3996_vm14, %v2518_v11  ;;  %vm4011_vm14 = vmmov %vm3982_vm0 }
 0x4ad   : > { %v2023_v57 = vpop.f32.mrf.mxu1 }
 0x4ae   : > { %2145 = vst.msk [vmem:[%s3894_s16 + $0x68] sm:$0xff] %vm3997_vm15, %v2023_v57  ;;  %vm4012_vm15 = vmmov %vm3982_vm0 }
 0x4b8   : > { %v2537_v14 = vpop.f32.mrf.mxu0 }
 0x4b9   : > { %2150 = vst.msk [vmem:[%s3894_s16 + $0x90] sm:$0xff] %vm3982_vm0, %v2537_v14 }
 0x4ba   : > { %v2069_v35 = vpop.f32.mrf.mxu0 }
 0x4bb   : > { %2148 = vst.msk [vmem:[%s3894_s16 + $0x80] sm:$0xff] %vm3998_vm1, %v2069_v35 }
 0x4bc   : > { %v2538_v10 = vpop.f32.mrf.mxu0 }
 0x4bd   : > { %2151 = vst.msk [vmem:[%s3894_s16 + $0x98] sm:$0xff] %vm3999_vm2, %v2538_v10 }
 0x4be   : > { %v2072_v0 = vpop.f32.mrf.mxu0 }
 0x4bf   : > { %2149 = vst.msk [vmem:[%s3894_s16 + $0x88] sm:$0xff] %vm4000_vm3, %v2072_v0 }
 0x4d8   : > { %v2545_v55 = vpop.f32.mrf.mxu1 }
 0x4d9   : > { %2158 = vst.msk [vmem:[%s3894_s16 + $0xd0] sm:$0xff] %vm4001_vm4, %v2545_v55 }
 0x4da   : > { %v2101_v19 = vpop.f32.mrf.mxu1 }
 0x4db   : > { %2156 = vst.msk [vmem:[%s3894_s16 + $0xc0] sm:$0xff] %vm4002_vm5, %v2101_v19  ;;  %v2541_v63 = vpop.f32.mrf.mxu0 }
 0x4dc   : > { %2154 = vst.msk [vmem:[%s3894_s16 + $0xb0] sm:$0xff] %vm4003_vm6, %v2541_v63  ;;  %v2546_v49 = vpop.f32.mrf.mxu1 }
 0x4dd   : > { %2159 = vst.msk [vmem:[%s3894_s16 + $0xd8] sm:$0xff] %vm4004_vm7, %v2546_v49  ;;  %v2085_v27 = vpop.f32.mrf.mxu0 }
 0x4de   : > { %2152 = vst.msk [vmem:[%s3894_s16 + $0xa0] sm:$0xff] %vm4005_vm8, %v2085_v27  ;;  %v2104_v7 = vpop.f32.mrf.mxu1 }
 0x4df   : > { %2157 = vst.msk [vmem:[%s3894_s16 + $0xc8] sm:$0xff] %vm4006_vm9, %v2104_v7  ;;  %v2542_v44 = vpop.f32.mrf.mxu0 }
 0x4e0   : > { %2155 = vst.msk [vmem:[%s3894_s16 + $0xb8] sm:$0xff] %vm4007_vm10, %v2542_v44 }
 0x4e1   : > { %v2088_v24 = vpop.f32.mrf.mxu0 }
 0x4e2   : > { %2153 = vst.msk [vmem:[%s3894_s16 + $0xa8] sm:$0xff] %vm4008_vm11, %v2088_v24 }
 0x4e9   : > { %v2549_v51 = vpop.f32.mrf.mxu1 }
 0x4ea   : > { %2162 = vst.msk [vmem:[%s3894_s16 + $0xf0] sm:$0xff] %vm4009_vm12, %v2549_v51 }
 0x4eb   : > { %v2117_v39 = vpop.f32.mrf.mxu1 }
 0x4ec   : > { %2160 = vst.msk [vmem:[%s3894_s16 + $0xe0] sm:$0xff] %vm4010_vm13, %v2117_v39 }
 0x4ed   : > { %v2550_v25 = vpop.f32.mrf.mxu1 }
 0x4ee   : > { %2163 = vst.msk [vmem:[%s3894_s16 + $0xf8] sm:$0xff] %vm4011_vm14, %v2550_v25 }
 0x4ef   : > { %v2120_v20 = vpop.f32.mrf.mxu1 }
 0x4f0   : > { %2161 = vst.msk [vmem:[%s3894_s16 + $0xe8] sm:$0xff] %vm4012_vm15, %v2120_v20 }
 0x4f1 PF: > { %p12_p9 = scmp.ge.s32.totalorder %s2997_s14, 6   ;;  %s4013_s9 = smov %s2947_s10 }
 0x4f2   : > { %s4014_s10 = smov %s2951_s11  ;;  %s4015_s11 = smov %s3007_s17 }
 0x4f3   : > { %s4016_s12 = smov %s2997_s14  ;;  %14 = sbr.rel (!%p12_p9) target bundleno = 3 (0x3), region = 68 }
 0x4f8   :  { %2188 = vsyncpa [#allocation3], 1 }
 0x4f9   :  { %2190 = vsyncpa [#allocation3 + $0x1], 1 }

</bundles_post_ra>
